<compile_context>
chip_gen: v6e
topology: v6e:2x2x1
jax: 0.10.0
libtpu: 0.0.40
codegen_flags: <defaults>
</compile_context>

<pallas_src>
import functools
import math

import jax
import jax.numpy as jnp
from jax.experimental import pallas as pl
from jax.experimental.pallas import tpu as pltpu

_VMEM_LIMIT = 64 * 1024 * 1024  # safe on v5e/v6e (128 MiB) and v7x (64 MiB)


# ----------------------------------------------------------------------------
# helpers
# ----------------------------------------------------------------------------
def _round_up(x, m):
    return ((x + m - 1) // m) * m


def _choose_row_tile(m, target):
    """Row tile: multiple of 8, <= target.  Rows are zero-padded to a multiple
    of the tile, so any M works (no tm=8 collapse at e.g. M = B*F*197).  For
    small M aim for >= 2 grid steps so the 'parallel' axis can use both v7x
    TensorCores."""
    if m > target:
        return target
    if m > 8:
        return max(8, _round_up((m + 1) // 2, 8))
    return 8


def _pad_rows(a, m_pad):
    m = a.shape[0]
    if m_pad == m:
        return a
    return jnp.pad(a, ((0, m_pad - m), (0, 0)))


def _cparams(n_axes=1):
    return pltpu.CompilerParams(
        dimension_semantics=("parallel",) * n_axes,
        vmem_limit_bytes=_VMEM_LIMIT)


def _ln_f32(x, g, b, eps):
    mean = jnp.mean(x, axis=-1, keepdims=True)
    xc = x - mean
    var = jnp.mean(xc * xc, axis=-1, keepdims=True)
    return xc * jax.lax.rsqrt(var + eps) * g + b


def _apply_act(x, act):
    if act == "gelu":
        # TODO(synk): HF ViT uses exact (erf) GELU; tanh approximation used here
        # for a robust Mosaic/EUP lowering.
        return jax.nn.gelu(x, approximate=True)
    if act == "relu":
        return jnp.maximum(x, 0.0)
    return x


# ----------------------------------------------------------------------------
# Pallas kernels
# ----------------------------------------------------------------------------
def _linear_kernel(*refs, act, pre_ln, add_res, post_ln, eps_pre, eps_post):
    """[pre-LN] -> x @ W + b -> [act] -> [+residual] -> [post-LN]."""
    refs = list(refs)
    o_ref = refs.pop()
    x_ref = refs.pop(0)
    if pre_ln:
        g_ref = refs.pop(0)
        b_ref = refs.pop(0)
    w_ref = refs.pop(0)
    bias_ref = refs.pop(0)
    if add_res:
        r_ref = refs.pop(0)
    if post_ln:
        pg_ref = refs.pop(0)
        pb_ref = refs.pop(0)

    x_in = x_ref[...]
    if pre_ln:
        xl = _ln_f32(x_in.astype(jnp.float32), g_ref[...].astype(jnp.float32),
                     b_ref[...].astype(jnp.float32), eps_pre)
        x_mm = xl.astype(jnp.bfloat16)
    else:
        x_mm = x_in.astype(jnp.bfloat16)
    # weights are bf16 at rest -> no in-kernel weight cast.
    y = jnp.dot(x_mm, w_ref[...], preferred_element_type=jnp.float32)
    y = y + bias_ref[...].astype(jnp.float32)
    y = _apply_act(y, act)
    if add_res:
        y = y + r_ref[...].astype(jnp.float32)
    if post_ln:
        y = _ln_f32(y, pg_ref[...].astype(jnp.float32),
                    pb_ref[...].astype(jnp.float32), eps_post)
    o_ref[...] = y.astype(o_ref.dtype)


def fused_linear(x, w, b, *, act="none", pre_ln=None, residual=None, post_ln=None,
                 eps_pre=1e-12, eps_post=1e-5, tm_target=512, out_dtype=None):
    """x:(M,K) @ w:(K,N) + b:(N,) with fused optional LN / activation / residual.
    Rows are zero-padded to the tile; output is sliced back to M rows."""
    M, K = x.shape
    N = w.shape[1]
    out_dtype = out_dtype or x.dtype
    tm = _choose_row_tile(M, tm_target)
    m_pad = _round_up(M, tm)

    def vec(d):
        return pl.BlockSpec((1, d), lambda i: (0, 0))

    operands = [_pad_rows(x, m_pad)]
    in_specs = [pl.BlockSpec((tm, K), lambda i: (i, 0))]
    if pre_ln is not None:
        g, bb = pre_ln
        operands += [g.reshape(1, K), bb.reshape(1, K)]
        in_specs += [vec(K), vec(K)]
    operands += [w, b.reshape(1, N)]
    # constant index_map -> weight/bias blocks are not re-fetched per grid step.
    in_specs += [pl.BlockSpec((K, N), lambda i: (0, 0)), vec(N)]
    if residual is not None:
        operands.append(_pad_rows(residual, m_pad))
        in_specs.append(pl.BlockSpec((tm, N), lambda i: (i, 0)))
    if post_ln is not None:
        pg, pb = post_ln
        operands += [pg.reshape(1, N), pb.reshape(1, N)]
        in_specs += [vec(N), vec(N)]

    kernel = functools.partial(
        _linear_kernel, act=act, pre_ln=pre_ln is not None,
        add_res=residual is not None, post_ln=post_ln is not None,
        eps_pre=eps_pre, eps_post=eps_post)

    out = pl.pallas_call(
        kernel,
        out_shape=jax.ShapeDtypeStruct((m_pad, N), out_dtype),
        grid=(m_pad // tm,),
        in_specs=in_specs,
        out_specs=pl.BlockSpec((tm, N), lambda i: (i, 0)),
        compiler_params=_cparams(),
    )(*operands)
    return out if m_pad == M else out[:M]


def _mlp_kernel(*refs, act, pre_ln, post_ln, eps_pre, eps_post):
    """[pre-LN] -> fc1 -> act -> fc2 -> +x (residual) -> [post-LN].
    The (tm, Dff) hidden tile stays resident in VMEM."""
    refs = list(refs)
    o_ref = refs.pop()
    x_ref = refs.pop(0)
    if pre_ln:
        g_ref = refs.pop(0)
        b_ref = refs.pop(0)
    w1_ref = refs.pop(0)
    b1_ref = refs.pop(0)
    w2_ref = refs.pop(0)
    b2_ref = refs.pop(0)
    if post_ln:
        pg_ref = refs.pop(0)
        pb_ref = refs.pop(0)

    x = x_ref[...].astype(jnp.float32)
    h = _ln_f32(x, g_ref[...].astype(jnp.float32),
                b_ref[...].astype(jnp.float32), eps_pre) if pre_ln else x
    h = jnp.dot(h.astype(jnp.bfloat16), w1_ref[...],
                preferred_element_type=jnp.float32) + b1_ref[...].astype(jnp.float32)
    h = _apply_act(h, act)
    y = jnp.dot(h.astype(jnp.bfloat16), w2_ref[...],
                preferred_element_type=jnp.float32) + b2_ref[...].astype(jnp.float32)
    y = y + x  # residual with the raw block input
    if post_ln:
        y = _ln_f32(y, pg_ref[...].astype(jnp.float32),
                    pb_ref[...].astype(jnp.float32), eps_post)
    o_ref[...] = y.astype(o_ref.dtype)


def fused_mlp(x, w1, b1, w2, b2, *, act, pre_ln=None, post_ln=None,
              eps_pre=1e-12, eps_post=1e-5, tm_target=256):
    M, D = x.shape
    Dff = w1.shape[1]
    tm = _choose_row_tile(M, tm_target)
    m_pad = _round_up(M, tm)

    def vec(d):
        return pl.BlockSpec((1, d), lambda i: (0, 0))

    operands = [_pad_rows(x, m_pad)]
    in_specs = [pl.BlockSpec((tm, D), lambda i: (i, 0))]
    if pre_ln is not None:
        g, bb = pre_ln
        operands += [g.reshape(1, D), bb.reshape(1, D)]
        in_specs += [vec(D), vec(D)]
    operands += [w1, b1.reshape(1, Dff), w2, b2.reshape(1, D)]
    in_specs += [pl.BlockSpec((D, Dff), lambda i: (0, 0)), vec(Dff),
                 pl.BlockSpec((Dff, D), lambda i: (0, 0)), vec(D)]
    if post_ln is not None:
        pg, pb = post_ln
        operands += [pg.reshape(1, D), pb.reshape(1, D)]
        in_specs += [vec(D), vec(D)]

    kernel = functools.partial(
        _mlp_kernel, act=act, pre_ln=pre_ln is not None,
        post_ln=post_ln is not None, eps_pre=eps_pre, eps_post=eps_post)

    out = pl.pallas_call(
        kernel,
        out_shape=jax.ShapeDtypeStruct((m_pad, D), x.dtype),
        grid=(m_pad // tm,),
        in_specs=in_specs,
        out_specs=pl.BlockSpec((tm, D), lambda i: (i, 0)),
        compiler_params=_cparams(),
    )(*operands)
    return out if m_pad == M else out[:M]


def _layernorm_kernel(x_ref, g_ref, b_ref, o_ref, *, eps):
    x = x_ref[...].astype(jnp.float32)
    o_ref[...] = _ln_f32(x, g_ref[...].astype(jnp.float32),
                         b_ref[...].astype(jnp.float32), eps).astype(o_ref.dtype)


def layernorm(x, g, b, eps, tm_target=512):
    M, D = x.shape
    tm = _choose_row_tile(M, tm_target)
    m_pad = _round_up(M, tm)
    out = pl.pallas_call(
        functools.partial(_layernorm_kernel, eps=eps),
        out_shape=jax.ShapeDtypeStruct((m_pad, D), x.dtype),
        grid=(m_pad // tm,),
        in_specs=[pl.BlockSpec((tm, D), lambda i: (i, 0)),
                  pl.BlockSpec((1, D), lambda i: (0, 0)),
                  pl.BlockSpec((1, D), lambda i: (0, 0))],
        out_specs=pl.BlockSpec((tm, D), lambda i: (i, 0)),
        compiler_params=_cparams(),
    )(_pad_rows(x, m_pad), g.reshape(1, D), b.reshape(1, D))
    return out if m_pad == M else out[:M]


def _attention_kernel(qkv_ref, o_ref, *, num_heads, head_dim):
    """All heads for one batch element: reads the packed (S, 3D) bf16 QKV block,
    writes the merged-head (S, D) context (lane-dense store).
    The 1/sqrt(Dh) scale is pre-folded into the Q projection weights."""
    D = num_heads * head_dim
    qkv = qkv_ref[0]                        # (S, 3D) bf16
    outs = []
    for h in range(num_heads):              # static unroll over heads
        q = qkv[:, h * head_dim:(h + 1) * head_dim]
        k = qkv[:, D + h * head_dim:D + (h + 1) * head_dim]
        v = qkv[:, 2 * D + h * head_dim:2 * D + (h + 1) * head_dim]
        s = jax.lax.dot_general(q, k, (((1,), (1,)), ((), ())),
                                preferred_element_type=jnp.float32)   # (S, S)
        s = s - jnp.max(s, axis=-1, keepdims=True)
        p = jnp.exp(s)
        p = p * pl.reciprocal(jnp.sum(p, axis=-1, keepdims=True), approx=True)
        outs.append(jnp.dot(p.astype(jnp.bfloat16), v,
                            preferred_element_type=jnp.float32))      # (S, Dh)
    o_ref[0] = jnp.concatenate(outs, axis=-1).astype(o_ref.dtype)      # (S, D)


def fused_mha(qkv, num_heads):
    """qkv: (batch, S, 3D) bf16 -> merged-head context (batch, S, D) bf16."""
    Bt, S, threeD = qkv.shape
    D = threeD // 3
    # TODO(synk): at real scale (S=197) pad S to 256 with a -inf key mask for
    # fully lane-dense score/softmax tiles; unnecessary at demo shapes.
    return pl.pallas_call(
        functools.partial(_attention_kernel, num_heads=num_heads,
                          head_dim=D // num_heads),
        out_shape=jax.ShapeDtypeStruct((Bt, S, D), qkv.dtype),
        grid=(Bt,),
        in_specs=[pl.BlockSpec((1, S, threeD), lambda b: (b, 0, 0))],
        out_specs=pl.BlockSpec((1, S, D), lambda b: (b, 0, 0)),
        compiler_params=_cparams(),
    )(qkv)


# ----------------------------------------------------------------------------
# model composition (free reshapes in XLA, all compute in the kernels above)
# ----------------------------------------------------------------------------
def vit_encoder_layer(x, p, num_heads, D):
    """HF ViT block: pre-LN attention + pre-LN GELU MLP with residuals."""
    N, S, _ = x.shape
    xf = x.reshape(N * S, D)
    # fused pre-LN + QKV projection (one matmul vs the (D, 3D) weight), bf16 out
    qkv = fused_linear(xf, p["wqkv"], p["bqkv"],
                       pre_ln=(p["ln1_g"], p["ln1_b"]), eps_pre=1e-12,
                       out_dtype=jnp.bfloat16)
    ctx = fused_mha(qkv.reshape(N, S, 3 * D), num_heads)        # (N, S, D) bf16
    # fused output projection + residual add (residual stream stays f32)
    x1 = fused_linear(ctx.reshape(N * S, D), p["wo"], p["bo"], residual=xf,
                      out_dtype=jnp.float32)
    # fused pre-LN MLP (fc1 -> GELU -> fc2) + residual
    x2 = fused_mlp(x1, p["fc1_w"], p["fc1_b"], p["fc2_w"], p["fc2_b"],
                   act="gelu", pre_ln=(p["ln2_g"], p["ln2_b"]), eps_pre=1e-12)
    return x2.reshape(N, S, D)


def head_layer(x, p, num_heads, D):
    """PyTorch nn.TransformerEncoderLayer defaults (post-norm, ReLU).
    x: (S, Bt, D) -- batch_first=False: dim0 is the sequence (= video batch B)."""
    S, Bt, _ = x.shape
    xf = x.transpose(1, 0, 2).reshape(Bt * S, D)            # (batch, seq) flattened
    qkv = fused_linear(xf, p["wqkv"], p["bqkv"], out_dtype=jnp.bfloat16)
    ctx = fused_mha(qkv.reshape(Bt, S, 3 * D), num_heads)    # (Bt, S, D) bf16
    # x = LN1(x + attn_proj): projection + residual + post-LN fused
    x1 = fused_linear(ctx.reshape(Bt * S, D), p["wo"], p["bo"], residual=xf,
                      post_ln=(p["ln1_g"], p["ln1_b"]), eps_post=1e-5,
                      out_dtype=jnp.float32)
    # x = LN2(x + fc2(relu(fc1(x)))): fully fused MLP with post-LN
    x2 = fused_mlp(x1, p["fc1_w"], p["fc1_b"], p["fc2_w"], p["fc2_b"],
                   act="relu", post_ln=(p["ln2_g"], p["ln2_b"]), eps_post=1e-5)
    return x2.reshape(Bt, S, D).transpose(1, 0, 2)


def vit_forward(imgs, p, cfg):
    """imgs: (N, C, H, W) -> CLS features (N, D)."""
    N, C, H, W = imgs.shape
    P, D = cfg["patch"], cfg["d"]
    nh, nw = H // P, W // P
    # Conv2d(C, D, kernel=P, stride=P) == patch-flatten + matmul.
    patches = imgs.reshape(N, C, nh, P, nw, P)
    patches = patches.transpose(0, 2, 4, 1, 3, 5).reshape(N * nh * nw, C * P * P)
    tok = fused_linear(patches, p["patch_w"], p["patch_b"],
                       out_dtype=jnp.float32).reshape(N, nh * nw, D)
    cls = jnp.broadcast_to(p["cls"], (N, 1, D))
    tok = jnp.concatenate([cls, tok], axis=1) + p["pos"]
    for lp in p["vit_layers"]:
        tok = vit_encoder_layer(tok, lp, cfg["vit_heads"], D)
    # Final LN applied only to the CLS rows that are actually consumed.
    return layernorm(tok[:, 0], p["vit_ln_g"], p["vit_ln_b"], eps=1e-12)


def action_predictor_forward(x, params, cfg):
    """x: (B, F, C, H, W) -> logits (B, F, num_classes)."""
    B, F, C, H, W = x.shape
    D = cfg["d"]
    imgs = x.reshape(B * F, C, H, W)
    feats = vit_forward(imgs, params["vit"], cfg).reshape(B, F, D)
    # nn.TransformerEncoderLayer has batch_first=False, so (B, F, D) is
    # interpreted as (seq=B, batch=F, D): attention mixes across the video/batch
    # axis.  Reproduced faithfully.
    feats = head_layer(feats, params["head"], cfg["head_heads"], D)
    logits = fused_linear(feats.reshape(B * F, D), params["cls_w"], params["cls_b"],
                          out_dtype=jnp.float32)
    # classifier weights are lane-padded to 128 outputs; slice the real classes.
    return logits[:, :cfg["num_classes"]].reshape(B, F, cfg["num_classes"])


# ----------------------------------------------------------------------------
# deterministic parameter initialization (synthetic; no checkpoint load)
# ----------------------------------------------------------------------------
def init_params(key, cfg):
    keys = iter(jax.random.split(key, 128))
    D = cfg["d"]

    def dense(fan_in, fan_out):
        w = jax.random.normal(next(keys), (fan_in, fan_out), jnp.float32) * 0.02
        return w, jnp.zeros((fan_out,), jnp.float32)

    def ln():
        return jnp.ones((D,), jnp.float32), jnp.zeros((D,), jnp.float32)

    def encoder_layer(ffn_dim, num_heads):
        wqkv, bqkv = dense(D, 3 * D)          # fused Q/K/V projection
        # fold the 1/sqrt(Dh) softmax scale into the Q columns (zero-cost at runtime)
        scale = 1.0 / math.sqrt(D // num_heads)
        wqkv = wqkv.at[:, :D].multiply(scale)
        bqkv = bqkv.at[:D].multiply(scale)
        wo, bo = dense(D, D)
        g1, b1 = ln()
        g2, b2 = ln()
        fc1_w, fc1_b = dense(D, ffn_dim)
        fc2_w, fc2_b = dense(ffn_dim, D)
        # matmul weights are bf16 at rest; biases & LN params stay f32.
        return dict(wqkv=wqkv.astype(jnp.bfloat16), bqkv=bqkv,
                    wo=wo.astype(jnp.bfloat16), bo=bo,
                    ln1_g=g1, ln1_b=b1, ln2_g=g2, ln2_b=b2,
                    fc1_w=fc1_w.astype(jnp.bfloat16), fc1_b=fc1_b,
                    fc2_w=fc2_w.astype(jnp.bfloat16), fc2_b=fc2_b)

    patch_dim = cfg["channels"] * cfg["patch"] ** 2
    num_patches = (cfg["image"] // cfg["patch"]) ** 2
    patch_w, patch_b = dense(patch_dim, D)
    vit = dict(
        patch_w=patch_w.astype(jnp.bfloat16), patch_b=patch_b,
        cls=jax.random.normal(next(keys), (1, 1, D), jnp.float32) * 0.02,
        pos=jax.random.normal(next(keys), (1, num_patches + 1, D), jnp.float32) * 0.02,
        vit_layers=[encoder_layer(cfg["vit_ffn"], cfg["vit_heads"])
                    for _ in range(cfg["vit_layers"])],
    )
    vit["vit_ln_g"], vit["vit_ln_b"] = ln()

    head = encoder_layer(cfg["head_ffn"], cfg["head_heads"])

    # Lane-dense classifier: pad num_classes up to a multiple of 128.
    nc = cfg["num_classes"]
    nc_pad = max(128, ((nc + 127) // 128) * 128)
    cls_w, cls_b = dense(D, nc)
    cls_w = jnp.zeros((D, nc_pad), jnp.float32).at[:, :nc].set(cls_w)
    cls_b = jnp.zeros((nc_pad,), jnp.float32).at[:nc].set(cls_b)
    return dict(vit=vit, head=head, cls_w=cls_w.astype(jnp.bfloat16), cls_b=cls_b)


# ----------------------------------------------------------------------------
if __name__ == "__main__":
    # Scaled-down config (real module: d_model=768, 12 ViT layers, patch 16, 224px).
    # d padded to 128 so every feature axis is lane-dense.
    cfg = dict(d=128, vit_heads=8, head_heads=8, vit_layers=2, vit_ffn=256,
               head_ffn=256, patch=8, image=16, channels=3, num_classes=10)

    key = jax.random.PRNGKey(0)
    pkey, xkey = jax.random.split(key)
    params = init_params(pkey, cfg)

    B, F = 2, 4
    x = jax.random.normal(
        xkey, (B, F, cfg["channels"], cfg["image"], cfg["image"]), jnp.float32)

    fwd = jax.jit(functools.partial(action_predictor_forward, cfg=cfg))
    out = fwd(x, params)
    out = jax.block_until_ready(out)
    assert out.shape == (B, F, cfg["num_classes"]), out.shape
    assert jnp.all(jnp.isfinite(out))
    print("KERNEL_OK")
</pallas_src>

<mosaic_0001>
module attributes {stable_mosaic.version = 11 : i64} {
  func.func @_linear_kernel(%arg0: i32, %arg1: memref<16x192xf32, #tpu.memory_space<vmem>>, %arg2: memref<192x128xbf16, #tpu.memory_space<vmem>>, %arg3: memref<1x128xf32, #tpu.memory_space<vmem>>, %arg4: memref<16x128xf32, #tpu.memory_space<vmem>>) attributes {dimension_semantics = [#tpu.dimension_semantics<parallel>], iteration_bounds = array<i64: 2>, scalar_prefetch = 0 : i64, scratch_operands = 0 : i64, tpu.core_type = #tpu.core_type<tc>, window_params = [{transform_indices = @transform_0, window_bounds = array<i64: 16, 192>}, {pipeline_mode = #tpu.pipeline_mode<synchronous>, transform_indices = @transform_1, window_bounds = array<i64: 192, 128>}, {pipeline_mode = #tpu.pipeline_mode<synchronous>, transform_indices = @transform_2, window_bounds = array<i64: 1, 128>}, {transform_indices = @transform_3, window_bounds = array<i64: 16, 128>}]} {
    %c0 = arith.constant 0 : index
    %c0_0 = arith.constant 0 : index
    %0 = vector.load %arg1[%c0, %c0_0] : memref<16x192xf32, #tpu.memory_space<vmem>>, vector<16x192xf32>
    %1 = arith.truncf %0 : vector<16x192xf32> to vector<16x192xbf16>
    %c0_1 = arith.constant 0 : index
    %c0_2 = arith.constant 0 : index
    %2 = vector.load %arg2[%c0_1, %c0_2] : memref<192x128xbf16, #tpu.memory_space<vmem>>, vector<192x128xbf16>
    %cst = arith.constant dense<0.000000e+00> : vector<16x128xf32>
    %3 = tpu.matmul %1, %2, %cst {dimension_numbers = #tpu.dot_dimension_numbers<[1], [0], [0], [1], [0, 0, 1, 1], [], []>} : vector<16x192xbf16>, vector<192x128xbf16>, vector<16x128xf32> -> vector<16x128xf32>
    %c0_3 = arith.constant 0 : index
    %c0_4 = arith.constant 0 : index
    %4 = vector.load %arg3[%c0_3, %c0_4] : memref<1x128xf32, #tpu.memory_space<vmem>>, vector<1x128xf32>
    %5 = vector.broadcast %4 : vector<1x128xf32> to vector<16x128xf32>
    %6 = arith.addf %3, %5 : vector<16x128xf32>
    %c0_5 = arith.constant 0 : index
    %c0_6 = arith.constant 0 : index
    %7 = vector.load %arg4[%c0_5, %c0_6] : memref<16x128xf32, #tpu.memory_space<vmem>>, vector<16x128xf32>
    tpu.vector_store %arg4[%c0_5, %c0_6], %6 {strides = array<i32>} : memref<16x128xf32, #tpu.memory_space<vmem>>, vector<16x128xf32>,
    return
  }
  func.func @transform_0(%arg0: i32) -> (i32, i32) {
    %c0_i32 = arith.constant 0 : i32
    %c0_i32_0 = arith.constant 0 : i32
    return %arg0, %c0_i32 : i32, i32
  }
  func.func @transform_1(%arg0: i32) -> (i32, i32) {
    %c0_i32 = arith.constant 0 : i32
    %c0_i32_0 = arith.constant 0 : i32
    %c0_i32_1 = arith.constant 0 : i32
    return %c0_i32, %c0_i32_0 : i32, i32
  }
  func.func @transform_2(%arg0: i32) -> (i32, i32) {
    %c0_i32 = arith.constant 0 : i32
    %c0_i32_0 = arith.constant 0 : i32
    %c0_i32_1 = arith.constant 0 : i32
    return %c0_i32, %c0_i32_0 : i32, i32
  }
  func.func @transform_3(%arg0: i32) -> (i32, i32) {
    %c0_i32 = arith.constant 0 : i32
    %c0_i32_0 = arith.constant 0 : i32
    return %arg0, %c0_i32 : i32, i32
  }
}

module attributes {stable_mosaic.version = 11 : i64} {
  func.func @_linear_kernel(%arg0: i32, %arg1: memref<24x128xf32, #tpu.memory_space<vmem>>, %arg2: memref<1x128xf32, #tpu.memory_space<vmem>>, %arg3: memref<1x128xf32, #tpu.memory_space<vmem>>, %arg4: memref<128x384xbf16, #tpu.memory_space<vmem>>, %arg5: memref<1x384xf32, #tpu.memory_space<vmem>>, %arg6: memref<24x384xbf16, #tpu.memory_space<vmem>>) attributes {dimension_semantics = [#tpu.dimension_semantics<parallel>], iteration_bounds = array<i64: 2>, scalar_prefetch = 0 : i64, scratch_operands = 0 : i64, tpu.core_type = #tpu.core_type<tc>, window_params = [{transform_indices = @transform_0, window_bounds = array<i64: 24, 128>}, {pipeline_mode = #tpu.pipeline_mode<synchronous>, transform_indices = @transform_1, window_bounds = array<i64: 1, 128>}, {pipeline_mode = #tpu.pipeline_mode<synchronous>, transform_indices = @transform_2, window_bounds = array<i64: 1, 128>}, {pipeline_mode = #tpu.pipeline_mode<synchronous>, transform_indices = @transform_3, window_bounds = array<i64: 128, 384>}, {pipeline_mode = #tpu.pipeline_mode<synchronous>, transform_indices = @transform_4, window_bounds = array<i64: 1, 384>}, {transform_indices = @transform_5, window_bounds = array<i64: 24, 384>}]} {
    %c0 = arith.constant 0 : index
    %c0_0 = arith.constant 0 : index
    %0 = vector.load %arg1[%c0, %c0_0] : memref<24x128xf32, #tpu.memory_space<vmem>>, vector<24x128xf32>
    %c0_1 = arith.constant 0 : index
    %c0_2 = arith.constant 0 : index
    %1 = vector.load %arg2[%c0_1, %c0_2] : memref<1x128xf32, #tpu.memory_space<vmem>>, vector<1x128xf32>
    %c0_3 = arith.constant 0 : index
    %c0_4 = arith.constant 0 : index
    %2 = vector.load %arg3[%c0_3, %c0_4] : memref<1x128xf32, #tpu.memory_space<vmem>>, vector<1x128xf32>
    %cst = arith.constant dense<0.000000e+00> : vector<24xf32>
    %3 = vector.multi_reduction <add>, %0, %cst [1] : vector<24x128xf32> to vector<24xf32>
    %4 = vector.shape_cast %3 : vector<24xf32> to vector<24x1xf32>
    %cst_5 = arith.constant 1.280000e+02 : f32
    %5 = vector.broadcast %cst_5 : f32 to vector<24x1xf32>
    %6 = arith.divf %4, %5 : vector<24x1xf32>
    %7 = vector.broadcast %6 : vector<24x1xf32> to vector<24x128xf32>
    %8 = arith.subf %0, %7 : vector<24x128xf32>
    %9 = arith.mulf %8, %8 : vector<24x128xf32>
    %cst_6 = arith.constant dense<0.000000e+00> : vector<24xf32>
    %10 = vector.multi_reduction <add>, %9, %cst_6 [1] : vector<24x128xf32> to vector<24xf32>
    %11 = vector.shape_cast %10 : vector<24xf32> to vector<24x1xf32>
    %cst_7 = arith.constant 1.280000e+02 : f32
    %12 = vector.broadcast %cst_7 : f32 to vector<24x1xf32>
    %13 = arith.divf %11, %12 : vector<24x1xf32>
    %cst_8 = arith.constant 9.99999996E-13 : f32
    %14 = vector.broadcast %cst_8 : f32 to vector<24x1xf32>
    %15 = arith.addf %13, %14 : vector<24x1xf32>
    %16 = math.rsqrt %15 : vector<24x1xf32>
    %17 = vector.broadcast %16 : vector<24x1xf32> to vector<24x128xf32>
    %18 = arith.mulf %8, %17 : vector<24x128xf32>
    %19 = vector.broadcast %1 : vector<1x128xf32> to vector<24x128xf32>
    %20 = arith.mulf %18, %19 : vector<24x128xf32>
    %21 = vector.broadcast %2 : vector<1x128xf32> to vector<24x128xf32>
    %22 = arith.addf %20, %21 : vector<24x128xf32>
    %23 = arith.truncf %22 : vector<24x128xf32> to vector<24x128xbf16>
    %c0_9 = arith.constant 0 : index
    %c0_10 = arith.constant 0 : index
    %24 = vector.load %arg4[%c0_9, %c0_10] : memref<128x384xbf16, #tpu.memory_space<vmem>>, vector<128x384xbf16>
    %cst_11 = arith.constant dense<0.000000e+00> : vector<24x384xf32>
    %25 = tpu.matmul %23, %24, %cst_11 {dimension_numbers = #tpu.dot_dimension_numbers<[1], [0], [0], [1], [0, 0, 1, 1], [], []>} : vector<24x128xbf16>, vector<128x384xbf16>, vector<24x384xf32> -> vector<24x384xf32>
    %c0_12 = arith.constant 0 : index
    %c0_13 = arith.constant 0 : index
    %26 = vector.load %arg5[%c0_12, %c0_13] : memref<1x384xf32, #tpu.memory_space<vmem>>, vector<1x384xf32>
    %27 = vector.broadcast %26 : vector<1x384xf32> to vector<24x384xf32>
    %28 = arith.addf %25, %27 : vector<24x384xf32>
    %29 = arith.truncf %28 : vector<24x384xf32> to vector<24x384xbf16>
    %c0_14 = arith.constant 0 : index
    %c0_15 = arith.constant 0 : index
    %30 = vector.load %arg6[%c0_14, %c0_15] : memref<24x384xbf16, #tpu.memory_space<vmem>>, vector<24x384xbf16>
    tpu.vector_store %arg6[%c0_14, %c0_15], %29 {strides = array<i32>} : memref<24x384xbf16, #tpu.memory_space<vmem>>, vector<24x384xbf16>,
    return
  }
  func.func @transform_0(%arg0: i32) -> (i32, i32) {
    %c0_i32 = arith.constant 0 : i32
    %c0_i32_0 = arith.constant 0 : i32
    return %arg0, %c0_i32 : i32, i32
  }
  func.func @transform_1(%arg0: i32) -> (i32, i32) {
    %c0_i32 = arith.constant 0 : i32
    %c0_i32_0 = arith.constant 0 : i32
    %c0_i32_1 = arith.constant 0 : i32
    return %c0_i32, %c0_i32_0 : i32, i32
  }
  func.func @transform_2(%arg0: i32) -> (i32, i32) {
    %c0_i32 = arith.constant 0 : i32
    %c0_i32_0 = arith.constant 0 : i32
    %c0_i32_1 = arith.constant 0 : i32
    return %c0_i32, %c0_i32_0 : i32, i32
  }
  func.func @transform_3(%arg0: i32) -> (i32, i32) {
    %c0_i32 = arith.constant 0 : i32
    %c0_i32_0 = arith.constant 0 : i32
    %c0_i32_1 = arith.constant 0 : i32
    return %c0_i32, %c0_i32_0 : i32, i32
  }
  func.func @transform_4(%arg0: i32) -> (i32, i32) {
    %c0_i32 = arith.constant 0 : i32
    %c0_i32_0 = arith.constant 0 : i32
    %c0_i32_1 = arith.constant 0 : i32
    return %c0_i32, %c0_i32_0 : i32, i32
  }
  func.func @transform_5(%arg0: i32) -> (i32, i32) {
    %c0_i32 = arith.constant 0 : i32
    %c0_i32_0 = arith.constant 0 : i32
    return %arg0, %c0_i32 : i32, i32
  }
}

module attributes {stable_mosaic.version = 11 : i64} {
  func.func @_linear_kernel(%arg0: i32, %arg1: memref<24x128xbf16, #tpu.memory_space<vmem>>, %arg2: memref<128x128xbf16, #tpu.memory_space<vmem>>, %arg3: memref<1x128xf32, #tpu.memory_space<vmem>>, %arg4: memref<24x128xf32, #tpu.memory_space<vmem>>, %arg5: memref<24x128xf32, #tpu.memory_space<vmem>>) attributes {dimension_semantics = [#tpu.dimension_semantics<parallel>], iteration_bounds = array<i64: 2>, scalar_prefetch = 0 : i64, scratch_operands = 0 : i64, tpu.core_type = #tpu.core_type<tc>, window_params = [{transform_indices = @transform_0, window_bounds = array<i64: 24, 128>}, {pipeline_mode = #tpu.pipeline_mode<synchronous>, transform_indices = @transform_1, window_bounds = array<i64: 128, 128>}, {pipeline_mode = #tpu.pipeline_mode<synchronous>, transform_indices = @transform_2, window_bounds = array<i64: 1, 128>}, {transform_indices = @transform_3, window_bounds = array<i64: 24, 128>}, {transform_indices = @transform_4, window_bounds = array<i64: 24, 128>}]} {
    %c0 = arith.constant 0 : index
    %c0_0 = arith.constant 0 : index
    %0 = vector.load %arg1[%c0, %c0_0] : memref<24x128xbf16, #tpu.memory_space<vmem>>, vector<24x128xbf16>
    %c0_1 = arith.constant 0 : index
    %c0_2 = arith.constant 0 : index
    %1 = vector.load %arg2[%c0_1, %c0_2] : memref<128x128xbf16, #tpu.memory_space<vmem>>, vector<128x128xbf16>
    %cst = arith.constant dense<0.000000e+00> : vector<24x128xf32>
    %2 = tpu.matmul %0, %1, %cst {dimension_numbers = #tpu.dot_dimension_numbers<[1], [0], [0], [1], [0, 0, 1, 1], [], []>} : vector<24x128xbf16>, vector<128x128xbf16>, vector<24x128xf32> -> vector<24x128xf32>
    %c0_3 = arith.constant 0 : index
    %c0_4 = arith.constant 0 : index
    %3 = vector.load %arg3[%c0_3, %c0_4] : memref<1x128xf32, #tpu.memory_space<vmem>>, vector<1x128xf32>
    %4 = vector.broadcast %3 : vector<1x128xf32> to vector<24x128xf32>
    %5 = arith.addf %2, %4 : vector<24x128xf32>
    %c0_5 = arith.constant 0 : index
    %c0_6 = arith.constant 0 : index
    %6 = vector.load %arg4[%c0_5, %c0_6] : memref<24x128xf32, #tpu.memory_space<vmem>>, vector<24x128xf32>
    %7 = arith.addf %5, %6 : vector<24x128xf32>
    %c0_7 = arith.constant 0 : index
    %c0_8 = arith.constant 0 : index
    %8 = vector.load %arg5[%c0_7, %c0_8] : memref<24x128xf32, #tpu.memory_space<vmem>>, vector<24x128xf32>
    tpu.vector_store %arg5[%c0_7, %c0_8], %7 {strides = array<i32>} : memref<24x128xf32, #tpu.memory_space<vmem>>, vector<24x128xf32>,
    return
  }
  func.func @transform_0(%arg0: i32) -> (i32, i32) {
    %c0_i32 = arith.constant 0 : i32
    %c0_i32_0 = arith.constant 0 : i32
    return %arg0, %c0_i32 : i32, i32
  }
  func.func @transform_1(%arg0: i32) -> (i32, i32) {
    %c0_i32 = arith.constant 0 : i32
    %c0_i32_0 = arith.constant 0 : i32
    %c0_i32_1 = arith.constant 0 : i32
    return %c0_i32, %c0_i32_0 : i32, i32
  }
  func.func @transform_2(%arg0: i32) -> (i32, i32) {
    %c0_i32 = arith.constant 0 : i32
    %c0_i32_0 = arith.constant 0 : i32
    %c0_i32_1 = arith.constant 0 : i32
    return %c0_i32, %c0_i32_0 : i32, i32
  }
  func.func @transform_3(%arg0: i32) -> (i32, i32) {
    %c0_i32 = arith.constant 0 : i32
    %c0_i32_0 = arith.constant 0 : i32
    return %arg0, %c0_i32 : i32, i32
  }
  func.func @transform_4(%arg0: i32) -> (i32, i32) {
    %c0_i32 = arith.constant 0 : i32
    %c0_i32_0 = arith.constant 0 : i32
    return %arg0, %c0_i32 : i32, i32
  }
}

module attributes {stable_mosaic.version = 11 : i64} {
  func.func @_attention_kernel(%arg0: i32, %arg1: memref<1x5x384xbf16, #tpu.memory_space<vmem>>, %arg2: memref<1x5x128xbf16, #tpu.memory_space<vmem>>) attributes {dimension_semantics = [#tpu.dimension_semantics<parallel>], iteration_bounds = array<i64: 8>, scalar_prefetch = 0 : i64, scratch_operands = 0 : i64, tpu.core_type = #tpu.core_type<tc>, window_params = [{transform_indices = @transform_0, window_bounds = array<i64: 1, 5, 384>}, {transform_indices = @transform_1, window_bounds = array<i64: 1, 5, 128>}]} {
    %c0 = arith.constant 0 : index
    %c0_0 = arith.constant 0 : index
    %c0_1 = arith.constant 0 : index
    %0 = vector.load %arg1[%c0, %c0_0, %c0_1] : memref<1x5x384xbf16, #tpu.memory_space<vmem>>, vector<1x5x384xbf16>
    %1 = vector.shape_cast %0 : vector<1x5x384xbf16> to vector<5x384xbf16>
    %2 = vector.extract_strided_slice %1 {offsets = [0, 0], sizes = [5, 16], strides = [1, 1]} : vector<5x384xbf16> to vector<5x16xbf16>
    %3 = vector.extract_strided_slice %1 {offsets = [0, 128], sizes = [5, 16], strides = [1, 1]} : vector<5x384xbf16> to vector<5x16xbf16>
    %4 = vector.extract_strided_slice %1 {offsets = [0, 256], sizes = [5, 16], strides = [1, 1]} : vector<5x384xbf16> to vector<5x16xbf16>
    %cst = arith.constant dense<0.000000e+00> : vector<5x5xf32>
    %5 = tpu.matmul %2, %3, %cst {dimension_numbers = #tpu.dot_dimension_numbers<[1], [1], [0], [0], [0, 0, 1, 0], [], []>} : vector<5x16xbf16>, vector<5x16xbf16>, vector<5x5xf32> -> vector<5x5xf32>
    %cst_2 = arith.constant dense<0xFF800000> : vector<5xf32>
    %6 = vector.multi_reduction <maximumf>, %5, %cst_2 [1] : vector<5x5xf32> to vector<5xf32>
    %7 = vector.shape_cast %6 : vector<5xf32> to vector<5x1xf32>
    %8 = vector.broadcast %7 : vector<5x1xf32> to vector<5x5xf32>
    %9 = arith.subf %5, %8 : vector<5x5xf32>
    %10 = math.exp %9 : vector<5x5xf32>
    %cst_3 = arith.constant dense<0.000000e+00> : vector<5xf32>
    %11 = vector.multi_reduction <add>, %10, %cst_3 [1] : vector<5x5xf32> to vector<5xf32>
    %12 = vector.shape_cast %11 : vector<5xf32> to vector<5x1xf32>
    %13 = tpu.reciprocal %12 {approx = true} : vector<5x1xf32> -> vector<5x1xf32>
    %14 = vector.broadcast %13 : vector<5x1xf32> to vector<5x5xf32>
    %15 = arith.mulf %10, %14 : vector<5x5xf32>
    %16 = arith.truncf %15 : vector<5x5xf32> to vector<5x5xbf16>
    %cst_4 = arith.constant dense<0.000000e+00> : vector<5x16xf32>
    %17 = tpu.matmul %16, %4, %cst_4 {dimension_numbers = #tpu.dot_dimension_numbers<[1], [0], [0], [1], [0, 0, 1, 1], [], []>} : vector<5x5xbf16>, vector<5x16xbf16>, vector<5x16xf32> -> vector<5x16xf32>
    %18 = vector.extract_strided_slice %1 {offsets = [0, 16], sizes = [5, 16], strides = [1, 1]} : vector<5x384xbf16> to vector<5x16xbf16>
    %19 = vector.extract_strided_slice %1 {offsets = [0, 144], sizes = [5, 16], strides = [1, 1]} : vector<5x384xbf16> to vector<5x16xbf16>
    %20 = vector.extract_strided_slice %1 {offsets = [0, 272], sizes = [5, 16], strides = [1, 1]} : vector<5x384xbf16> to vector<5x16xbf16>
    %cst_5 = arith.constant dense<0.000000e+00> : vector<5x5xf32>
    %21 = tpu.matmul %18, %19, %cst_5 {dimension_numbers = #tpu.dot_dimension_numbers<[1], [1], [0], [0], [0, 0, 1, 0], [], []>} : vector<5x16xbf16>, vector<5x16xbf16>, vector<5x5xf32> -> vector<5x5xf32>
    %cst_6 = arith.constant dense<0xFF800000> : vector<5xf32>
    %22 = vector.multi_reduction <maximumf>, %21, %cst_6 [1] : vector<5x5xf32> to vector<5xf32>
    %23 = vector.shape_cast %22 : vector<5xf32> to vector<5x1xf32>
    %24 = vector.broadcast %23 : vector<5x1xf32> to vector<5x5xf32>
    %25 = arith.subf %21, %24 : vector<5x5xf32>
    %26 = math.exp %25 : vector<5x5xf32>
    %cst_7 = arith.constant dense<0.000000e+00> : vector<5xf32>
    %27 = vector.multi_reduction <add>, %26, %cst_7 [1] : vector<5x5xf32> to vector<5xf32>
    %28 = vector.shape_cast %27 : vector<5xf32> to vector<5x1xf32>
    %29 = tpu.reciprocal %28 {approx = true} : vector<5x1xf32> -> vector<5x1xf32>
    %30 = vector.broadcast %29 : vector<5x1xf32> to vector<5x5xf32>
    %31 = arith.mulf %26, %30 : vector<5x5xf32>
    %32 = arith.truncf %31 : vector<5x5xf32> to vector<5x5xbf16>
    %cst_8 = arith.constant dense<0.000000e+00> : vector<5x16xf32>
    %33 = tpu.matmul %32, %20, %cst_8 {dimension_numbers = #tpu.dot_dimension_numbers<[1], [0], [0], [1], [0, 0, 1, 1], [], []>} : vector<5x5xbf16>, vector<5x16xbf16>, vector<5x16xf32> -> vector<5x16xf32>
    %34 = vector.extract_strided_slice %1 {offsets = [0, 32], sizes = [5, 16], strides = [1, 1]} : vector<5x384xbf16> to vector<5x16xbf16>
    %35 = vector.extract_strided_slice %1 {offsets = [0, 160], sizes = [5, 16], strides = [1, 1]} : vector<5x384xbf16> to vector<5x16xbf16>
    %36 = vector.extract_strided_slice %1 {offsets = [0, 288], sizes = [5, 16], strides = [1, 1]} : vector<5x384xbf16> to vector<5x16xbf16>
    %cst_9 = arith.constant dense<0.000000e+00> : vector<5x5xf32>
    %37 = tpu.matmul %34, %35, %cst_9 {dimension_numbers = #tpu.dot_dimension_numbers<[1], [1], [0], [0], [0, 0, 1, 0], [], []>} : vector<5x16xbf16>, vector<5x16xbf16>, vector<5x5xf32> -> vector<5x5xf32>
    %cst_10 = arith.constant dense<0xFF800000> : vector<5xf32>
    %38 = vector.multi_reduction <maximumf>, %37, %cst_10 [1] : vector<5x5xf32> to vector<5xf32>
    %39 = vector.shape_cast %38 : vector<5xf32> to vector<5x1xf32>
    %40 = vector.broadcast %39 : vector<5x1xf32> to vector<5x5xf32>
    %41 = arith.subf %37, %40 : vector<5x5xf32>
    %42 = math.exp %41 : vector<5x5xf32>
    %cst_11 = arith.constant dense<0.000000e+00> : vector<5xf32>
    %43 = vector.multi_reduction <add>, %42, %cst_11 [1] : vector<5x5xf32> to vector<5xf32>
    %44 = vector.shape_cast %43 : vector<5xf32> to vector<5x1xf32>
    %45 = tpu.reciprocal %44 {approx = true} : vector<5x1xf32> -> vector<5x1xf32>
    %46 = vector.broadcast %45 : vector<5x1xf32> to vector<5x5xf32>
    %47 = arith.mulf %42, %46 : vector<5x5xf32>
    %48 = arith.truncf %47 : vector<5x5xf32> to vector<5x5xbf16>
    %cst_12 = arith.constant dense<0.000000e+00> : vector<5x16xf32>
    %49 = tpu.matmul %48, %36, %cst_12 {dimension_numbers = #tpu.dot_dimension_numbers<[1], [0], [0], [1], [0, 0, 1, 1], [], []>} : vector<5x5xbf16>, vector<5x16xbf16>, vector<5x16xf32> -> vector<5x16xf32>
    %50 = vector.extract_strided_slice %1 {offsets = [0, 48], sizes = [5, 16], strides = [1, 1]} : vector<5x384xbf16> to vector<5x16xbf16>
    %51 = vector.extract_strided_slice %1 {offsets = [0, 176], sizes = [5, 16], strides = [1, 1]} : vector<5x384xbf16> to vector<5x16xbf16>
    %52 = vector.extract_strided_slice %1 {offsets = [0, 304], sizes = [5, 16], strides = [1, 1]} : vector<5x384xbf16> to vector<5x16xbf16>
    %cst_13 = arith.constant dense<0.000000e+00> : vector<5x5xf32>
    %53 = tpu.matmul %50, %51, %cst_13 {dimension_numbers = #tpu.dot_dimension_numbers<[1], [1], [0], [0], [0, 0, 1, 0], [], []>} : vector<5x16xbf16>, vector<5x16xbf16>, vector<5x5xf32> -> vector<5x5xf32>
    %cst_14 = arith.constant dense<0xFF800000> : vector<5xf32>
    %54 = vector.multi_reduction <maximumf>, %53, %cst_14 [1] : vector<5x5xf32> to vector<5xf32>
    %55 = vector.shape_cast %54 : vector<5xf32> to vector<5x1xf32>
    %56 = vector.broadcast %55 : vector<5x1xf32> to vector<5x5xf32>
    %57 = arith.subf %53, %56 : vector<5x5xf32>
    %58 = math.exp %57 : vector<5x5xf32>
    %cst_15 = arith.constant dense<0.000000e+00> : vector<5xf32>
    %59 = vector.multi_reduction <add>, %58, %cst_15 [1] : vector<5x5xf32> to vector<5xf32>
    %60 = vector.shape_cast %59 : vector<5xf32> to vector<5x1xf32>
    %61 = tpu.reciprocal %60 {approx = true} : vector<5x1xf32> -> vector<5x1xf32>
    %62 = vector.broadcast %61 : vector<5x1xf32> to vector<5x5xf32>
    %63 = arith.mulf %58, %62 : vector<5x5xf32>
    %64 = arith.truncf %63 : vector<5x5xf32> to vector<5x5xbf16>
    %cst_16 = arith.constant dense<0.000000e+00> : vector<5x16xf32>
    %65 = tpu.matmul %64, %52, %cst_16 {dimension_numbers = #tpu.dot_dimension_numbers<[1], [0], [0], [1], [0, 0, 1, 1], [], []>} : vector<5x5xbf16>, vector<5x16xbf16>, vector<5x16xf32> -> vector<5x16xf32>
    %66 = vector.extract_strided_slice %1 {offsets = [0, 64], sizes = [5, 16], strides = [1, 1]} : vector<5x384xbf16> to vector<5x16xbf16>
    %67 = vector.extract_strided_slice %1 {offsets = [0, 192], sizes = [5, 16], strides = [1, 1]} : vector<5x384xbf16> to vector<5x16xbf16>
    %68 = vector.extract_strided_slice %1 {offsets = [0, 320], sizes = [5, 16], strides = [1, 1]} : vector<5x384xbf16> to vector<5x16xbf16>
    %cst_17 = arith.constant dense<0.000000e+00> : vector<5x5xf32>
    %69 = tpu.matmul %66, %67, %cst_17 {dimension_numbers = #tpu.dot_dimension_numbers<[1], [1], [0], [0], [0, 0, 1, 0], [], []>} : vector<5x16xbf16>, vector<5x16xbf16>, vector<5x5xf32> -> vector<5x5xf32>
    %cst_18 = arith.constant dense<0xFF800000> : vector<5xf32>
    %70 = vector.multi_reduction <maximumf>, %69, %cst_18 [1] : vector<5x5xf32> to vector<5xf32>
    %71 = vector.shape_cast %70 : vector<5xf32> to vector<5x1xf32>
    %72 = vector.broadcast %71 : vector<5x1xf32> to vector<5x5xf32>
    %73 = arith.subf %69, %72 : vector<5x5xf32>
    %74 = math.exp %73 : vector<5x5xf32>
    %cst_19 = arith.constant dense<0.000000e+00> : vector<5xf32>
    %75 = vector.multi_reduction <add>, %74, %cst_19 [1] : vector<5x5xf32> to vector<5xf32>
    %76 = vector.shape_cast %75 : vector<5xf32> to vector<5x1xf32>
    %77 = tpu.reciprocal %76 {approx = true} : vector<5x1xf32> -> vector<5x1xf32>
    %78 = vector.broadcast %77 : vector<5x1xf32> to vector<5x5xf32>
    %79 = arith.mulf %74, %78 : vector<5x5xf32>
    %80 = arith.truncf %79 : vector<5x5xf32> to vector<5x5xbf16>
    %cst_20 = arith.constant dense<0.000000e+00> : vector<5x16xf32>
    %81 = tpu.matmul %80, %68, %cst_20 {dimension_numbers = #tpu.dot_dimension_numbers<[1], [0], [0], [1], [0, 0, 1, 1], [], []>} : vector<5x5xbf16>, vector<5x16xbf16>, vector<5x16xf32> -> vector<5x16xf32>
    %82 = vector.extract_strided_slice %1 {offsets = [0, 80], sizes = [5, 16], strides = [1, 1]} : vector<5x384xbf16> to vector<5x16xbf16>
    %83 = vector.extract_strided_slice %1 {offsets = [0, 208], sizes = [5, 16], strides = [1, 1]} : vector<5x384xbf16> to vector<5x16xbf16>
    %84 = vector.extract_strided_slice %1 {offsets = [0, 336], sizes = [5, 16], strides = [1, 1]} : vector<5x384xbf16> to vector<5x16xbf16>
    %cst_21 = arith.constant dense<0.000000e+00> : vector<5x5xf32>
    %85 = tpu.matmul %82, %83, %cst_21 {dimension_numbers = #tpu.dot_dimension_numbers<[1], [1], [0], [0], [0, 0, 1, 0], [], []>} : vector<5x16xbf16>, vector<5x16xbf16>, vector<5x5xf32> -> vector<5x5xf32>
    %cst_22 = arith.constant dense<0xFF800000> : vector<5xf32>
    %86 = vector.multi_reduction <maximumf>, %85, %cst_22 [1] : vector<5x5xf32> to vector<5xf32>
    %87 = vector.shape_cast %86 : vector<5xf32> to vector<5x1xf32>
    %88 = vector.broadcast %87 : vector<5x1xf32> to vector<5x5xf32>
    %89 = arith.subf %85, %88 : vector<5x5xf32>
    %90 = math.exp %89 : vector<5x5xf32>
    %cst_23 = arith.constant dense<0.000000e+00> : vector<5xf32>
    %91 = vector.multi_reduction <add>, %90, %cst_23 [1] : vector<5x5xf32> to vector<5xf32>
    %92 = vector.shape_cast %91 : vector<5xf32> to vector<5x1xf32>
    %93 = tpu.reciprocal %92 {approx = true} : vector<5x1xf32> -> vector<5x1xf32>
    %94 = vector.broadcast %93 : vector<5x1xf32> to vector<5x5xf32>
    %95 = arith.mulf %90, %94 : vector<5x5xf32>
    %96 = arith.truncf %95 : vector<5x5xf32> to vector<5x5xbf16>
    %cst_24 = arith.constant dense<0.000000e+00> : vector<5x16xf32>
    %97 = tpu.matmul %96, %84, %cst_24 {dimension_numbers = #tpu.dot_dimension_numbers<[1], [0], [0], [1], [0, 0, 1, 1], [], []>} : vector<5x5xbf16>, vector<5x16xbf16>, vector<5x16xf32> -> vector<5x16xf32>
    %98 = vector.extract_strided_slice %1 {offsets = [0, 96], sizes = [5, 16], strides = [1, 1]} : vector<5x384xbf16> to vector<5x16xbf16>
    %99 = vector.extract_strided_slice %1 {offsets = [0, 224], sizes = [5, 16], strides = [1, 1]} : vector<5x384xbf16> to vector<5x16xbf16>
    %100 = vector.extract_strided_slice %1 {offsets = [0, 352], sizes = [5, 16], strides = [1, 1]} : vector<5x384xbf16> to vector<5x16xbf16>
    %cst_25 = arith.constant dense<0.000000e+00> : vector<5x5xf32>
    %101 = tpu.matmul %98, %99, %cst_25 {dimension_numbers = #tpu.dot_dimension_numbers<[1], [1], [0], [0], [0, 0, 1, 0], [], []>} : vector<5x16xbf16>, vector<5x16xbf16>, vector<5x5xf32> -> vector<5x5xf32>
    %cst_26 = arith.constant dense<0xFF800000> : vector<5xf32>
    %102 = vector.multi_reduction <maximumf>, %101, %cst_26 [1] : vector<5x5xf32> to vector<5xf32>
    %103 = vector.shape_cast %102 : vector<5xf32> to vector<5x1xf32>
    %104 = vector.broadcast %103 : vector<5x1xf32> to vector<5x5xf32>
    %105 = arith.subf %101, %104 : vector<5x5xf32>
    %106 = math.exp %105 : vector<5x5xf32>
    %cst_27 = arith.constant dense<0.000000e+00> : vector<5xf32>
    %107 = vector.multi_reduction <add>, %106, %cst_27 [1] : vector<5x5xf32> to vector<5xf32>
    %108 = vector.shape_cast %107 : vector<5xf32> to vector<5x1xf32>
    %109 = tpu.reciprocal %108 {approx = true} : vector<5x1xf32> -> vector<5x1xf32>
    %110 = vector.broadcast %109 : vector<5x1xf32> to vector<5x5xf32>
    %111 = arith.mulf %106, %110 : vector<5x5xf32>
    %112 = arith.truncf %111 : vector<5x5xf32> to vector<5x5xbf16>
    %cst_28 = arith.constant dense<0.000000e+00> : vector<5x16xf32>
    %113 = tpu.matmul %112, %100, %cst_28 {dimension_numbers = #tpu.dot_dimension_numbers<[1], [0], [0], [1], [0, 0, 1, 1], [], []>} : vector<5x5xbf16>, vector<5x16xbf16>, vector<5x16xf32> -> vector<5x16xf32>
    %114 = vector.extract_strided_slice %1 {offsets = [0, 112], sizes = [5, 16], strides = [1, 1]} : vector<5x384xbf16> to vector<5x16xbf16>
    %115 = vector.extract_strided_slice %1 {offsets = [0, 240], sizes = [5, 16], strides = [1, 1]} : vector<5x384xbf16> to vector<5x16xbf16>
    %116 = vector.extract_strided_slice %1 {offsets = [0, 368], sizes = [5, 16], strides = [1, 1]} : vector<5x384xbf16> to vector<5x16xbf16>
    %cst_29 = arith.constant dense<0.000000e+00> : vector<5x5xf32>
    %117 = tpu.matmul %114, %115, %cst_29 {dimension_numbers = #tpu.dot_dimension_numbers<[1], [1], [0], [0], [0, 0, 1, 0], [], []>} : vector<5x16xbf16>, vector<5x16xbf16>, vector<5x5xf32> -> vector<5x5xf32>
    %cst_30 = arith.constant dense<0xFF800000> : vector<5xf32>
    %118 = vector.multi_reduction <maximumf>, %117, %cst_30 [1] : vector<5x5xf32> to vector<5xf32>
    %119 = vector.shape_cast %118 : vector<5xf32> to vector<5x1xf32>
    %120 = vector.broadcast %119 : vector<5x1xf32> to vector<5x5xf32>
    %121 = arith.subf %117, %120 : vector<5x5xf32>
    %122 = math.exp %121 : vector<5x5xf32>
    %cst_31 = arith.constant dense<0.000000e+00> : vector<5xf32>
    %123 = vector.multi_reduction <add>, %122, %cst_31 [1] : vector<5x5xf32> to vector<5xf32>
    %124 = vector.shape_cast %123 : vector<5xf32> to vector<5x1xf32>
    %125 = tpu.reciprocal %124 {approx = true} : vector<5x1xf32> -> vector<5x1xf32>
    %126 = vector.broadcast %125 : vector<5x1xf32> to vector<5x5xf32>
    %127 = arith.mulf %122, %126 : vector<5x5xf32>
    %128 = arith.truncf %127 : vector<5x5xf32> to vector<5x5xbf16>
    %cst_32 = arith.constant dense<0.000000e+00> : vector<5x16xf32>
    %129 = tpu.matmul %128, %116, %cst_32 {dimension_numbers = #tpu.dot_dimension_numbers<[1], [0], [0], [1], [0, 0, 1, 1], [], []>} : vector<5x5xbf16>, vector<5x16xbf16>, vector<5x16xf32> -> vector<5x16xf32>
    %130 = tpu.concatenate %17, %33, %49, %65, %81, %97, %113, %129 in 1 : vector<5x16xf32>, vector<5x16xf32>, vector<5x16xf32>, vector<5x16xf32>, vector<5x16xf32>, vector<5x16xf32>, vector<5x16xf32>, vector<5x16xf32> -> vector<5x128xf32>
    %131 = arith.truncf %130 : vector<5x128xf32> to vector<5x128xbf16>
    %c0_33 = arith.constant 0 : index
    %c0_34 = arith.constant 0 : index
    %c0_35 = arith.constant 0 : index
    %132 = vector.load %arg2[%c0_33, %c0_34, %c0_35] : memref<1x5x128xbf16, #tpu.memory_space<vmem>>, vector<1x5x128xbf16>
    %133 = vector.shape_cast %132 : vector<1x5x128xbf16> to vector<5x128xbf16>
    %134 = vector.shape_cast %131 : vector<5x128xbf16> to vector<1x5x128xbf16>
    tpu.vector_store %arg2[%c0_33, %c0_34, %c0_35], %134 {strides = array<i32>} : memref<1x5x128xbf16, #tpu.memory_space<vmem>>, vector<1x5x128xbf16>,
    return
  }
  func.func @transform_0(%arg0: i32) -> (i32, i32, i32) {
    %c0_i32 = arith.constant 0 : i32
    %c0_i32_0 = arith.constant 0 : i32
    %c0_i32_1 = arith.constant 0 : i32
    return %arg0, %c0_i32, %c0_i32_0 : i32, i32, i32
  }
  func.func @transform_1(%arg0: i32) -> (i32, i32, i32) {
    %c0_i32 = arith.constant 0 : i32
    %c0_i32_0 = arith.constant 0 : i32
    %c0_i32_1 = arith.constant 0 : i32
    return %arg0, %c0_i32, %c0_i32_0 : i32, i32, i32
  }
}

module attributes {stable_mosaic.version = 11 : i64} {
  func.func @_mlp_kernel(%arg0: i32, %arg1: memref<24x128xf32, #tpu.memory_space<vmem>>, %arg2: memref<1x128xf32, #tpu.memory_space<vmem>>, %arg3: memref<1x128xf32, #tpu.memory_space<vmem>>, %arg4: memref<128x256xbf16, #tpu.memory_space<vmem>>, %arg5: memref<1x256xf32, #tpu.memory_space<vmem>>, %arg6: memref<256x128xbf16, #tpu.memory_space<vmem>>, %arg7: memref<1x128xf32, #tpu.memory_space<vmem>>, %arg8: memref<24x128xf32, #tpu.memory_space<vmem>>) attributes {dimension_semantics = [#tpu.dimension_semantics<parallel>], iteration_bounds = array<i64: 2>, scalar_prefetch = 0 : i64, scratch_operands = 0 : i64, tpu.core_type = #tpu.core_type<tc>, window_params = [{transform_indices = @transform_0, window_bounds = array<i64: 24, 128>}, {pipeline_mode = #tpu.pipeline_mode<synchronous>, transform_indices = @transform_1, window_bounds = array<i64: 1, 128>}, {pipeline_mode = #tpu.pipeline_mode<synchronous>, transform_indices = @transform_2, window_bounds = array<i64: 1, 128>}, {pipeline_mode = #tpu.pipeline_mode<synchronous>, transform_indices = @transform_3, window_bounds = array<i64: 128, 256>}, {pipeline_mode = #tpu.pipeline_mode<synchronous>, transform_indices = @transform_4, window_bounds = array<i64: 1, 256>}, {pipeline_mode = #tpu.pipeline_mode<synchronous>, transform_indices = @transform_5, window_bounds = array<i64: 256, 128>}, {pipeline_mode = #tpu.pipeline_mode<synchronous>, transform_indices = @transform_6, window_bounds = array<i64: 1, 128>}, {transform_indices = @transform_7, window_bounds = array<i64: 24, 128>}]} {
    %c0 = arith.constant 0 : index
    %c0_0 = arith.constant 0 : index
    %0 = vector.load %arg1[%c0, %c0_0] : memref<24x128xf32, #tpu.memory_space<vmem>>, vector<24x128xf32>
    %c0_1 = arith.constant 0 : index
    %c0_2 = arith.constant 0 : index
    %1 = vector.load %arg2[%c0_1, %c0_2] : memref<1x128xf32, #tpu.memory_space<vmem>>, vector<1x128xf32>
    %c0_3 = arith.constant 0 : index
    %c0_4 = arith.constant 0 : index
    %2 = vector.load %arg3[%c0_3, %c0_4] : memref<1x128xf32, #tpu.memory_space<vmem>>, vector<1x128xf32>
    %cst = arith.constant dense<0.000000e+00> : vector<24xf32>
    %3 = vector.multi_reduction <add>, %0, %cst [1] : vector<24x128xf32> to vector<24xf32>
    %4 = vector.shape_cast %3 : vector<24xf32> to vector<24x1xf32>
    %cst_5 = arith.constant 1.280000e+02 : f32
    %5 = vector.broadcast %cst_5 : f32 to vector<24x1xf32>
    %6 = arith.divf %4, %5 : vector<24x1xf32>
    %7 = vector.broadcast %6 : vector<24x1xf32> to vector<24x128xf32>
    %8 = arith.subf %0, %7 : vector<24x128xf32>
    %9 = arith.mulf %8, %8 : vector<24x128xf32>
    %cst_6 = arith.constant dense<0.000000e+00> : vector<24xf32>
    %10 = vector.multi_reduction <add>, %9, %cst_6 [1] : vector<24x128xf32> to vector<24xf32>
    %11 = vector.shape_cast %10 : vector<24xf32> to vector<24x1xf32>
    %cst_7 = arith.constant 1.280000e+02 : f32
    %12 = vector.broadcast %cst_7 : f32 to vector<24x1xf32>
    %13 = arith.divf %11, %12 : vector<24x1xf32>
    %cst_8 = arith.constant 9.99999996E-13 : f32
    %14 = vector.broadcast %cst_8 : f32 to vector<24x1xf32>
    %15 = arith.addf %13, %14 : vector<24x1xf32>
    %16 = math.rsqrt %15 : vector<24x1xf32>
    %17 = vector.broadcast %16 : vector<24x1xf32> to vector<24x128xf32>
    %18 = arith.mulf %8, %17 : vector<24x128xf32>
    %19 = vector.broadcast %1 : vector<1x128xf32> to vector<24x128xf32>
    %20 = arith.mulf %18, %19 : vector<24x128xf32>
    %21 = vector.broadcast %2 : vector<1x128xf32> to vector<24x128xf32>
    %22 = arith.addf %20, %21 : vector<24x128xf32>
    %23 = arith.truncf %22 : vector<24x128xf32> to vector<24x128xbf16>
    %c0_9 = arith.constant 0 : index
    %c0_10 = arith.constant 0 : index
    %24 = vector.load %arg4[%c0_9, %c0_10] : memref<128x256xbf16, #tpu.memory_space<vmem>>, vector<128x256xbf16>
    %cst_11 = arith.constant dense<0.000000e+00> : vector<24x256xf32>
    %25 = tpu.matmul %23, %24, %cst_11 {dimension_numbers = #tpu.dot_dimension_numbers<[1], [0], [0], [1], [0, 0, 1, 1], [], []>} : vector<24x128xbf16>, vector<128x256xbf16>, vector<24x256xf32> -> vector<24x256xf32>
    %c0_12 = arith.constant 0 : index
    %c0_13 = arith.constant 0 : index
    %26 = vector.load %arg5[%c0_12, %c0_13] : memref<1x256xf32, #tpu.memory_space<vmem>>, vector<1x256xf32>
    %27 = vector.broadcast %26 : vector<1x256xf32> to vector<24x256xf32>
    %28 = arith.addf %25, %27 : vector<24x256xf32>
    %29 = arith.mulf %28, %28 : vector<24x256xf32>
    %30 = arith.mulf %28, %29 : vector<24x256xf32>
    %cst_14 = arith.constant 4.471500e-02 : f32
    %31 = vector.broadcast %cst_14 : f32 to vector<24x256xf32>
    %32 = arith.mulf %31, %30 : vector<24x256xf32>
    %33 = arith.addf %28, %32 : vector<24x256xf32>
    %cst_15 = arith.constant 0.797884583 : f32
    %34 = vector.broadcast %cst_15 : f32 to vector<24x256xf32>
    %35 = arith.mulf %34, %33 : vector<24x256xf32>
    %36 = math.tanh %35 : vector<24x256xf32>
    %cst_16 = arith.constant 1.000000e+00 : f32
    %37 = vector.broadcast %cst_16 : f32 to vector<24x256xf32>
    %38 = arith.addf %37, %36 : vector<24x256xf32>
    %cst_17 = arith.constant 5.000000e-01 : f32
    %39 = vector.broadcast %cst_17 : f32 to vector<24x256xf32>
    %40 = arith.mulf %39, %38 : vector<24x256xf32>
    %41 = arith.mulf %28, %40 : vector<24x256xf32>
    %42 = arith.truncf %41 : vector<24x256xf32> to vector<24x256xbf16>
    %c0_18 = arith.constant 0 : index
    %c0_19 = arith.constant 0 : index
    %43 = vector.load %arg6[%c0_18, %c0_19] : memref<256x128xbf16, #tpu.memory_space<vmem>>, vector<256x128xbf16>
    %cst_20 = arith.constant dense<0.000000e+00> : vector<24x128xf32>
    %44 = tpu.matmul %42, %43, %cst_20 {dimension_numbers = #tpu.dot_dimension_numbers<[1], [0], [0], [1], [0, 0, 1, 1], [], []>} : vector<24x256xbf16>, vector<256x128xbf16>, vector<24x128xf32> -> vector<24x128xf32>
    %c0_21 = arith.constant 0 : index
    %c0_22 = arith.constant 0 : index
    %45 = vector.load %arg7[%c0_21, %c0_22] : memref<1x128xf32, #tpu.memory_space<vmem>>, vector<1x128xf32>
    %46 = vector.broadcast %45 : vector<1x128xf32> to vector<24x128xf32>
    %47 = arith.addf %44, %46 : vector<24x128xf32>
    %48 = arith.addf %47, %0 : vector<24x128xf32>
    %c0_23 = arith.constant 0 : index
    %c0_24 = arith.constant 0 : index
    %49 = vector.load %arg8[%c0_23, %c0_24] : memref<24x128xf32, #tpu.memory_space<vmem>>, vector<24x128xf32>
    tpu.vector_store %arg8[%c0_23, %c0_24], %48 {strides = array<i32>} : memref<24x128xf32, #tpu.memory_space<vmem>>, vector<24x128xf32>,
    return
  }
  func.func @transform_0(%arg0: i32) -> (i32, i32) {
    %c0_i32 = arith.constant 0 : i32
    %c0_i32_0 = arith.constant 0 : i32
    return %arg0, %c0_i32 : i32, i32
  }
  func.func @transform_1(%arg0: i32) -> (i32, i32) {
    %c0_i32 = arith.constant 0 : i32
    %c0_i32_0 = arith.constant 0 : i32
    %c0_i32_1 = arith.constant 0 : i32
    return %c0_i32, %c0_i32_0 : i32, i32
  }
  func.func @transform_2(%arg0: i32) -> (i32, i32) {
    %c0_i32 = arith.constant 0 : i32
    %c0_i32_0 = arith.constant 0 : i32
    %c0_i32_1 = arith.constant 0 : i32
    return %c0_i32, %c0_i32_0 : i32, i32
  }
  func.func @transform_3(%arg0: i32) -> (i32, i32) {
    %c0_i32 = arith.constant 0 : i32
    %c0_i32_0 = arith.constant 0 : i32
    %c0_i32_1 = arith.constant 0 : i32
    return %c0_i32, %c0_i32_0 : i32, i32
  }
  func.func @transform_4(%arg0: i32) -> (i32, i32) {
    %c0_i32 = arith.constant 0 : i32
    %c0_i32_0 = arith.constant 0 : i32
    %c0_i32_1 = arith.constant 0 : i32
    return %c0_i32, %c0_i32_0 : i32, i32
  }
  func.func @transform_5(%arg0: i32) -> (i32, i32) {
    %c0_i32 = arith.constant 0 : i32
    %c0_i32_0 = arith.constant 0 : i32
    %c0_i32_1 = arith.constant 0 : i32
    return %c0_i32, %c0_i32_0 : i32, i32
  }
  func.func @transform_6(%arg0: i32) -> (i32, i32) {
    %c0_i32 = arith.constant 0 : i32
    %c0_i32_0 = arith.constant 0 : i32
    %c0_i32_1 = arith.constant 0 : i32
    return %c0_i32, %c0_i32_0 : i32, i32
  }
  func.func @transform_7(%arg0: i32) -> (i32, i32) {
    %c0_i32 = arith.constant 0 : i32
    %c0_i32_0 = arith.constant 0 : i32
    return %arg0, %c0_i32 : i32, i32
  }
}

module attributes {stable_mosaic.version = 11 : i64} {
  func.func @_layernorm_kernel(%arg0: i32, %arg1: memref<8x128xf32, #tpu.memory_space<vmem>>, %arg2: memref<1x128xf32, #tpu.memory_space<vmem>>, %arg3: memref<1x128xf32, #tpu.memory_space<vmem>>, %arg4: memref<8x128xf32, #tpu.memory_space<vmem>>) attributes {dimension_semantics = [#tpu.dimension_semantics<parallel>], iteration_bounds = array<i64: 1>, scalar_prefetch = 0 : i64, scratch_operands = 0 : i64, tpu.core_type = #tpu.core_type<tc>, window_params = [{transform_indices = @transform_0, window_bounds = array<i64: 8, 128>}, {pipeline_mode = #tpu.pipeline_mode<synchronous>, transform_indices = @transform_1, window_bounds = array<i64: 1, 128>}, {pipeline_mode = #tpu.pipeline_mode<synchronous>, transform_indices = @transform_2, window_bounds = array<i64: 1, 128>}, {transform_indices = @transform_3, window_bounds = array<i64: 8, 128>}]} {
    %c0 = arith.constant 0 : index
    %c0_0 = arith.constant 0 : index
    %0 = vector.load %arg1[%c0, %c0_0] : memref<8x128xf32, #tpu.memory_space<vmem>>, vector<8x128xf32>
    %c0_1 = arith.constant 0 : index
    %c0_2 = arith.constant 0 : index
    %1 = vector.load %arg2[%c0_1, %c0_2] : memref<1x128xf32, #tpu.memory_space<vmem>>, vector<1x128xf32>
    %c0_3 = arith.constant 0 : index
    %c0_4 = arith.constant 0 : index
    %2 = vector.load %arg3[%c0_3, %c0_4] : memref<1x128xf32, #tpu.memory_space<vmem>>, vector<1x128xf32>
    %cst = arith.constant dense<0.000000e+00> : vector<8xf32>
    %3 = vector.multi_reduction <add>, %0, %cst [1] : vector<8x128xf32> to vector<8xf32>
    %4 = vector.shape_cast %3 : vector<8xf32> to vector<8x1xf32>
    %cst_5 = arith.constant 1.280000e+02 : f32
    %5 = vector.broadcast %cst_5 : f32 to vector<8x1xf32>
    %6 = arith.divf %4, %5 : vector<8x1xf32>
    %7 = vector.broadcast %6 : vector<8x1xf32> to vector<8x128xf32>
    %8 = arith.subf %0, %7 : vector<8x128xf32>
    %9 = arith.mulf %8, %8 : vector<8x128xf32>
    %cst_6 = arith.constant dense<0.000000e+00> : vector<8xf32>
    %10 = vector.multi_reduction <add>, %9, %cst_6 [1] : vector<8x128xf32> to vector<8xf32>
    %11 = vector.shape_cast %10 : vector<8xf32> to vector<8x1xf32>
    %cst_7 = arith.constant 1.280000e+02 : f32
    %12 = vector.broadcast %cst_7 : f32 to vector<8x1xf32>
    %13 = arith.divf %11, %12 : vector<8x1xf32>
    %cst_8 = arith.constant 9.99999996E-13 : f32
    %14 = vector.broadcast %cst_8 : f32 to vector<8x1xf32>
    %15 = arith.addf %13, %14 : vector<8x1xf32>
    %16 = math.rsqrt %15 : vector<8x1xf32>
    %17 = vector.broadcast %16 : vector<8x1xf32> to vector<8x128xf32>
    %18 = arith.mulf %8, %17 : vector<8x128xf32>
    %19 = vector.broadcast %1 : vector<1x128xf32> to vector<8x128xf32>
    %20 = arith.mulf %18, %19 : vector<8x128xf32>
    %21 = vector.broadcast %2 : vector<1x128xf32> to vector<8x128xf32>
    %22 = arith.addf %20, %21 : vector<8x128xf32>
    %c0_9 = arith.constant 0 : index
    %c0_10 = arith.constant 0 : index
    %23 = vector.load %arg4[%c0_9, %c0_10] : memref<8x128xf32, #tpu.memory_space<vmem>>, vector<8x128xf32>
    tpu.vector_store %arg4[%c0_9, %c0_10], %22 {strides = array<i32>} : memref<8x128xf32, #tpu.memory_space<vmem>>, vector<8x128xf32>,
    return
  }
  func.func @transform_0(%arg0: i32) -> (i32, i32) {
    %c0_i32 = arith.constant 0 : i32
    %c0_i32_0 = arith.constant 0 : i32
    return %arg0, %c0_i32 : i32, i32
  }
  func.func @transform_1(%arg0: i32) -> (i32, i32) {
    %c0_i32 = arith.constant 0 : i32
    %c0_i32_0 = arith.constant 0 : i32
    %c0_i32_1 = arith.constant 0 : i32
    return %c0_i32, %c0_i32_0 : i32, i32
  }
  func.func @transform_2(%arg0: i32) -> (i32, i32) {
    %c0_i32 = arith.constant 0 : i32
    %c0_i32_0 = arith.constant 0 : i32
    %c0_i32_1 = arith.constant 0 : i32
    return %c0_i32, %c0_i32_0 : i32, i32
  }
  func.func @transform_3(%arg0: i32) -> (i32, i32) {
    %c0_i32 = arith.constant 0 : i32
    %c0_i32_0 = arith.constant 0 : i32
    return %arg0, %c0_i32 : i32, i32
  }
}

module attributes {stable_mosaic.version = 11 : i64} {
  func.func @_linear_kernel(%arg0: i32, %arg1: memref<8x128xf32, #tpu.memory_space<vmem>>, %arg2: memref<128x384xbf16, #tpu.memory_space<vmem>>, %arg3: memref<1x384xf32, #tpu.memory_space<vmem>>, %arg4: memref<8x384xbf16, #tpu.memory_space<vmem>>) attributes {dimension_semantics = [#tpu.dimension_semantics<parallel>], iteration_bounds = array<i64: 1>, scalar_prefetch = 0 : i64, scratch_operands = 0 : i64, tpu.core_type = #tpu.core_type<tc>, window_params = [{transform_indices = @transform_0, window_bounds = array<i64: 8, 128>}, {pipeline_mode = #tpu.pipeline_mode<synchronous>, transform_indices = @transform_1, window_bounds = array<i64: 128, 384>}, {pipeline_mode = #tpu.pipeline_mode<synchronous>, transform_indices = @transform_2, window_bounds = array<i64: 1, 384>}, {transform_indices = @transform_3, window_bounds = array<i64: 8, 384>}]} {
    %c0 = arith.constant 0 : index
    %c0_0 = arith.constant 0 : index
    %0 = vector.load %arg1[%c0, %c0_0] : memref<8x128xf32, #tpu.memory_space<vmem>>, vector<8x128xf32>
    %1 = arith.truncf %0 : vector<8x128xf32> to vector<8x128xbf16>
    %c0_1 = arith.constant 0 : index
    %c0_2 = arith.constant 0 : index
    %2 = vector.load %arg2[%c0_1, %c0_2] : memref<128x384xbf16, #tpu.memory_space<vmem>>, vector<128x384xbf16>
    %cst = arith.constant dense<0.000000e+00> : vector<8x384xf32>
    %3 = tpu.matmul %1, %2, %cst {dimension_numbers = #tpu.dot_dimension_numbers<[1], [0], [0], [1], [0, 0, 1, 1], [], []>} : vector<8x128xbf16>, vector<128x384xbf16>, vector<8x384xf32> -> vector<8x384xf32>
    %c0_3 = arith.constant 0 : index
    %c0_4 = arith.constant 0 : index
    %4 = vector.load %arg3[%c0_3, %c0_4] : memref<1x384xf32, #tpu.memory_space<vmem>>, vector<1x384xf32>
    %5 = vector.broadcast %4 : vector<1x384xf32> to vector<8x384xf32>
    %6 = arith.addf %3, %5 : vector<8x384xf32>
    %7 = arith.truncf %6 : vector<8x384xf32> to vector<8x384xbf16>
    %c0_5 = arith.constant 0 : index
    %c0_6 = arith.constant 0 : index
    %8 = vector.load %arg4[%c0_5, %c0_6] : memref<8x384xbf16, #tpu.memory_space<vmem>>, vector<8x384xbf16>
    tpu.vector_store %arg4[%c0_5, %c0_6], %7 {strides = array<i32>} : memref<8x384xbf16, #tpu.memory_space<vmem>>, vector<8x384xbf16>,
    return
  }
  func.func @transform_0(%arg0: i32) -> (i32, i32) {
    %c0_i32 = arith.constant 0 : i32
    %c0_i32_0 = arith.constant 0 : i32
    return %arg0, %c0_i32 : i32, i32
  }
  func.func @transform_1(%arg0: i32) -> (i32, i32) {
    %c0_i32 = arith.constant 0 : i32
    %c0_i32_0 = arith.constant 0 : i32
    %c0_i32_1 = arith.constant 0 : i32
    return %c0_i32, %c0_i32_0 : i32, i32
  }
  func.func @transform_2(%arg0: i32) -> (i32, i32) {
    %c0_i32 = arith.constant 0 : i32
    %c0_i32_0 = arith.constant 0 : i32
    %c0_i32_1 = arith.constant 0 : i32
    return %c0_i32, %c0_i32_0 : i32, i32
  }
  func.func @transform_3(%arg0: i32) -> (i32, i32) {
    %c0_i32 = arith.constant 0 : i32
    %c0_i32_0 = arith.constant 0 : i32
    return %arg0, %c0_i32 : i32, i32
  }
}

module attributes {stable_mosaic.version = 11 : i64} {
  func.func @_attention_kernel(%arg0: i32, %arg1: memref<1x2x384xbf16, #tpu.memory_space<vmem>>, %arg2: memref<1x2x128xbf16, #tpu.memory_space<vmem>>) attributes {dimension_semantics = [#tpu.dimension_semantics<parallel>], iteration_bounds = array<i64: 4>, scalar_prefetch = 0 : i64, scratch_operands = 0 : i64, tpu.core_type = #tpu.core_type<tc>, window_params = [{transform_indices = @transform_0, window_bounds = array<i64: 1, 2, 384>}, {transform_indices = @transform_1, window_bounds = array<i64: 1, 2, 128>}]} {
    %c0 = arith.constant 0 : index
    %c0_0 = arith.constant 0 : index
    %c0_1 = arith.constant 0 : index
    %0 = vector.load %arg1[%c0, %c0_0, %c0_1] : memref<1x2x384xbf16, #tpu.memory_space<vmem>>, vector<1x2x384xbf16>
    %1 = vector.shape_cast %0 : vector<1x2x384xbf16> to vector<2x384xbf16>
    %2 = vector.extract_strided_slice %1 {offsets = [0, 0], sizes = [2, 16], strides = [1, 1]} : vector<2x384xbf16> to vector<2x16xbf16>
    %3 = vector.extract_strided_slice %1 {offsets = [0, 128], sizes = [2, 16], strides = [1, 1]} : vector<2x384xbf16> to vector<2x16xbf16>
    %4 = vector.extract_strided_slice %1 {offsets = [0, 256], sizes = [2, 16], strides = [1, 1]} : vector<2x384xbf16> to vector<2x16xbf16>
    %cst = arith.constant dense<0.000000e+00> : vector<2x2xf32>
    %5 = tpu.matmul %2, %3, %cst {dimension_numbers = #tpu.dot_dimension_numbers<[1], [1], [0], [0], [0, 0, 1, 0], [], []>} : vector<2x16xbf16>, vector<2x16xbf16>, vector<2x2xf32> -> vector<2x2xf32>
    %cst_2 = arith.constant dense<0xFF800000> : vector<2xf32>
    %6 = vector.multi_reduction <maximumf>, %5, %cst_2 [1] : vector<2x2xf32> to vector<2xf32>
    %7 = vector.shape_cast %6 : vector<2xf32> to vector<2x1xf32>
    %8 = vector.broadcast %7 : vector<2x1xf32> to vector<2x2xf32>
    %9 = arith.subf %5, %8 : vector<2x2xf32>
    %10 = math.exp %9 : vector<2x2xf32>
    %cst_3 = arith.constant dense<0.000000e+00> : vector<2xf32>
    %11 = vector.multi_reduction <add>, %10, %cst_3 [1] : vector<2x2xf32> to vector<2xf32>
    %12 = vector.shape_cast %11 : vector<2xf32> to vector<2x1xf32>
    %13 = tpu.reciprocal %12 {approx = true} : vector<2x1xf32> -> vector<2x1xf32>
    %14 = vector.broadcast %13 : vector<2x1xf32> to vector<2x2xf32>
    %15 = arith.mulf %10, %14 : vector<2x2xf32>
    %16 = arith.truncf %15 : vector<2x2xf32> to vector<2x2xbf16>
    %cst_4 = arith.constant dense<0.000000e+00> : vector<2x16xf32>
    %17 = tpu.matmul %16, %4, %cst_4 {dimension_numbers = #tpu.dot_dimension_numbers<[1], [0], [0], [1], [0, 0, 1, 1], [], []>} : vector<2x2xbf16>, vector<2x16xbf16>, vector<2x16xf32> -> vector<2x16xf32>
    %18 = vector.extract_strided_slice %1 {offsets = [0, 16], sizes = [2, 16], strides = [1, 1]} : vector<2x384xbf16> to vector<2x16xbf16>
    %19 = vector.extract_strided_slice %1 {offsets = [0, 144], sizes = [2, 16], strides = [1, 1]} : vector<2x384xbf16> to vector<2x16xbf16>
    %20 = vector.extract_strided_slice %1 {offsets = [0, 272], sizes = [2, 16], strides = [1, 1]} : vector<2x384xbf16> to vector<2x16xbf16>
    %cst_5 = arith.constant dense<0.000000e+00> : vector<2x2xf32>
    %21 = tpu.matmul %18, %19, %cst_5 {dimension_numbers = #tpu.dot_dimension_numbers<[1], [1], [0], [0], [0, 0, 1, 0], [], []>} : vector<2x16xbf16>, vector<2x16xbf16>, vector<2x2xf32> -> vector<2x2xf32>
    %cst_6 = arith.constant dense<0xFF800000> : vector<2xf32>
    %22 = vector.multi_reduction <maximumf>, %21, %cst_6 [1] : vector<2x2xf32> to vector<2xf32>
    %23 = vector.shape_cast %22 : vector<2xf32> to vector<2x1xf32>
    %24 = vector.broadcast %23 : vector<2x1xf32> to vector<2x2xf32>
    %25 = arith.subf %21, %24 : vector<2x2xf32>
    %26 = math.exp %25 : vector<2x2xf32>
    %cst_7 = arith.constant dense<0.000000e+00> : vector<2xf32>
    %27 = vector.multi_reduction <add>, %26, %cst_7 [1] : vector<2x2xf32> to vector<2xf32>
    %28 = vector.shape_cast %27 : vector<2xf32> to vector<2x1xf32>
    %29 = tpu.reciprocal %28 {approx = true} : vector<2x1xf32> -> vector<2x1xf32>
    %30 = vector.broadcast %29 : vector<2x1xf32> to vector<2x2xf32>
    %31 = arith.mulf %26, %30 : vector<2x2xf32>
    %32 = arith.truncf %31 : vector<2x2xf32> to vector<2x2xbf16>
    %cst_8 = arith.constant dense<0.000000e+00> : vector<2x16xf32>
    %33 = tpu.matmul %32, %20, %cst_8 {dimension_numbers = #tpu.dot_dimension_numbers<[1], [0], [0], [1], [0, 0, 1, 1], [], []>} : vector<2x2xbf16>, vector<2x16xbf16>, vector<2x16xf32> -> vector<2x16xf32>
    %34 = vector.extract_strided_slice %1 {offsets = [0, 32], sizes = [2, 16], strides = [1, 1]} : vector<2x384xbf16> to vector<2x16xbf16>
    %35 = vector.extract_strided_slice %1 {offsets = [0, 160], sizes = [2, 16], strides = [1, 1]} : vector<2x384xbf16> to vector<2x16xbf16>
    %36 = vector.extract_strided_slice %1 {offsets = [0, 288], sizes = [2, 16], strides = [1, 1]} : vector<2x384xbf16> to vector<2x16xbf16>
    %cst_9 = arith.constant dense<0.000000e+00> : vector<2x2xf32>
    %37 = tpu.matmul %34, %35, %cst_9 {dimension_numbers = #tpu.dot_dimension_numbers<[1], [1], [0], [0], [0, 0, 1, 0], [], []>} : vector<2x16xbf16>, vector<2x16xbf16>, vector<2x2xf32> -> vector<2x2xf32>
    %cst_10 = arith.constant dense<0xFF800000> : vector<2xf32>
    %38 = vector.multi_reduction <maximumf>, %37, %cst_10 [1] : vector<2x2xf32> to vector<2xf32>
    %39 = vector.shape_cast %38 : vector<2xf32> to vector<2x1xf32>
    %40 = vector.broadcast %39 : vector<2x1xf32> to vector<2x2xf32>
    %41 = arith.subf %37, %40 : vector<2x2xf32>
    %42 = math.exp %41 : vector<2x2xf32>
    %cst_11 = arith.constant dense<0.000000e+00> : vector<2xf32>
    %43 = vector.multi_reduction <add>, %42, %cst_11 [1] : vector<2x2xf32> to vector<2xf32>
    %44 = vector.shape_cast %43 : vector<2xf32> to vector<2x1xf32>
    %45 = tpu.reciprocal %44 {approx = true} : vector<2x1xf32> -> vector<2x1xf32>
    %46 = vector.broadcast %45 : vector<2x1xf32> to vector<2x2xf32>
    %47 = arith.mulf %42, %46 : vector<2x2xf32>
    %48 = arith.truncf %47 : vector<2x2xf32> to vector<2x2xbf16>
    %cst_12 = arith.constant dense<0.000000e+00> : vector<2x16xf32>
    %49 = tpu.matmul %48, %36, %cst_12 {dimension_numbers = #tpu.dot_dimension_numbers<[1], [0], [0], [1], [0, 0, 1, 1], [], []>} : vector<2x2xbf16>, vector<2x16xbf16>, vector<2x16xf32> -> vector<2x16xf32>
    %50 = vector.extract_strided_slice %1 {offsets = [0, 48], sizes = [2, 16], strides = [1, 1]} : vector<2x384xbf16> to vector<2x16xbf16>
    %51 = vector.extract_strided_slice %1 {offsets = [0, 176], sizes = [2, 16], strides = [1, 1]} : vector<2x384xbf16> to vector<2x16xbf16>
    %52 = vector.extract_strided_slice %1 {offsets = [0, 304], sizes = [2, 16], strides = [1, 1]} : vector<2x384xbf16> to vector<2x16xbf16>
    %cst_13 = arith.constant dense<0.000000e+00> : vector<2x2xf32>
    %53 = tpu.matmul %50, %51, %cst_13 {dimension_numbers = #tpu.dot_dimension_numbers<[1], [1], [0], [0], [0, 0, 1, 0], [], []>} : vector<2x16xbf16>, vector<2x16xbf16>, vector<2x2xf32> -> vector<2x2xf32>
    %cst_14 = arith.constant dense<0xFF800000> : vector<2xf32>
    %54 = vector.multi_reduction <maximumf>, %53, %cst_14 [1] : vector<2x2xf32> to vector<2xf32>
    %55 = vector.shape_cast %54 : vector<2xf32> to vector<2x1xf32>
    %56 = vector.broadcast %55 : vector<2x1xf32> to vector<2x2xf32>
    %57 = arith.subf %53, %56 : vector<2x2xf32>
    %58 = math.exp %57 : vector<2x2xf32>
    %cst_15 = arith.constant dense<0.000000e+00> : vector<2xf32>
    %59 = vector.multi_reduction <add>, %58, %cst_15 [1] : vector<2x2xf32> to vector<2xf32>
    %60 = vector.shape_cast %59 : vector<2xf32> to vector<2x1xf32>
    %61 = tpu.reciprocal %60 {approx = true} : vector<2x1xf32> -> vector<2x1xf32>
    %62 = vector.broadcast %61 : vector<2x1xf32> to vector<2x2xf32>
    %63 = arith.mulf %58, %62 : vector<2x2xf32>
    %64 = arith.truncf %63 : vector<2x2xf32> to vector<2x2xbf16>
    %cst_16 = arith.constant dense<0.000000e+00> : vector<2x16xf32>
    %65 = tpu.matmul %64, %52, %cst_16 {dimension_numbers = #tpu.dot_dimension_numbers<[1], [0], [0], [1], [0, 0, 1, 1], [], []>} : vector<2x2xbf16>, vector<2x16xbf16>, vector<2x16xf32> -> vector<2x16xf32>
    %66 = vector.extract_strided_slice %1 {offsets = [0, 64], sizes = [2, 16], strides = [1, 1]} : vector<2x384xbf16> to vector<2x16xbf16>
    %67 = vector.extract_strided_slice %1 {offsets = [0, 192], sizes = [2, 16], strides = [1, 1]} : vector<2x384xbf16> to vector<2x16xbf16>
    %68 = vector.extract_strided_slice %1 {offsets = [0, 320], sizes = [2, 16], strides = [1, 1]} : vector<2x384xbf16> to vector<2x16xbf16>
    %cst_17 = arith.constant dense<0.000000e+00> : vector<2x2xf32>
    %69 = tpu.matmul %66, %67, %cst_17 {dimension_numbers = #tpu.dot_dimension_numbers<[1], [1], [0], [0], [0, 0, 1, 0], [], []>} : vector<2x16xbf16>, vector<2x16xbf16>, vector<2x2xf32> -> vector<2x2xf32>
    %cst_18 = arith.constant dense<0xFF800000> : vector<2xf32>
    %70 = vector.multi_reduction <maximumf>, %69, %cst_18 [1] : vector<2x2xf32> to vector<2xf32>
    %71 = vector.shape_cast %70 : vector<2xf32> to vector<2x1xf32>
    %72 = vector.broadcast %71 : vector<2x1xf32> to vector<2x2xf32>
    %73 = arith.subf %69, %72 : vector<2x2xf32>
    %74 = math.exp %73 : vector<2x2xf32>
    %cst_19 = arith.constant dense<0.000000e+00> : vector<2xf32>
    %75 = vector.multi_reduction <add>, %74, %cst_19 [1] : vector<2x2xf32> to vector<2xf32>
    %76 = vector.shape_cast %75 : vector<2xf32> to vector<2x1xf32>
    %77 = tpu.reciprocal %76 {approx = true} : vector<2x1xf32> -> vector<2x1xf32>
    %78 = vector.broadcast %77 : vector<2x1xf32> to vector<2x2xf32>
    %79 = arith.mulf %74, %78 : vector<2x2xf32>
    %80 = arith.truncf %79 : vector<2x2xf32> to vector<2x2xbf16>
    %cst_20 = arith.constant dense<0.000000e+00> : vector<2x16xf32>
    %81 = tpu.matmul %80, %68, %cst_20 {dimension_numbers = #tpu.dot_dimension_numbers<[1], [0], [0], [1], [0, 0, 1, 1], [], []>} : vector<2x2xbf16>, vector<2x16xbf16>, vector<2x16xf32> -> vector<2x16xf32>
    %82 = vector.extract_strided_slice %1 {offsets = [0, 80], sizes = [2, 16], strides = [1, 1]} : vector<2x384xbf16> to vector<2x16xbf16>
    %83 = vector.extract_strided_slice %1 {offsets = [0, 208], sizes = [2, 16], strides = [1, 1]} : vector<2x384xbf16> to vector<2x16xbf16>
    %84 = vector.extract_strided_slice %1 {offsets = [0, 336], sizes = [2, 16], strides = [1, 1]} : vector<2x384xbf16> to vector<2x16xbf16>
    %cst_21 = arith.constant dense<0.000000e+00> : vector<2x2xf32>
    %85 = tpu.matmul %82, %83, %cst_21 {dimension_numbers = #tpu.dot_dimension_numbers<[1], [1], [0], [0], [0, 0, 1, 0], [], []>} : vector<2x16xbf16>, vector<2x16xbf16>, vector<2x2xf32> -> vector<2x2xf32>
    %cst_22 = arith.constant dense<0xFF800000> : vector<2xf32>
    %86 = vector.multi_reduction <maximumf>, %85, %cst_22 [1] : vector<2x2xf32> to vector<2xf32>
    %87 = vector.shape_cast %86 : vector<2xf32> to vector<2x1xf32>
    %88 = vector.broadcast %87 : vector<2x1xf32> to vector<2x2xf32>
    %89 = arith.subf %85, %88 : vector<2x2xf32>
    %90 = math.exp %89 : vector<2x2xf32>
    %cst_23 = arith.constant dense<0.000000e+00> : vector<2xf32>
    %91 = vector.multi_reduction <add>, %90, %cst_23 [1] : vector<2x2xf32> to vector<2xf32>
    %92 = vector.shape_cast %91 : vector<2xf32> to vector<2x1xf32>
    %93 = tpu.reciprocal %92 {approx = true} : vector<2x1xf32> -> vector<2x1xf32>
    %94 = vector.broadcast %93 : vector<2x1xf32> to vector<2x2xf32>
    %95 = arith.mulf %90, %94 : vector<2x2xf32>
    %96 = arith.truncf %95 : vector<2x2xf32> to vector<2x2xbf16>
    %cst_24 = arith.constant dense<0.000000e+00> : vector<2x16xf32>
    %97 = tpu.matmul %96, %84, %cst_24 {dimension_numbers = #tpu.dot_dimension_numbers<[1], [0], [0], [1], [0, 0, 1, 1], [], []>} : vector<2x2xbf16>, vector<2x16xbf16>, vector<2x16xf32> -> vector<2x16xf32>
    %98 = vector.extract_strided_slice %1 {offsets = [0, 96], sizes = [2, 16], strides = [1, 1]} : vector<2x384xbf16> to vector<2x16xbf16>
    %99 = vector.extract_strided_slice %1 {offsets = [0, 224], sizes = [2, 16], strides = [1, 1]} : vector<2x384xbf16> to vector<2x16xbf16>
    %100 = vector.extract_strided_slice %1 {offsets = [0, 352], sizes = [2, 16], strides = [1, 1]} : vector<2x384xbf16> to vector<2x16xbf16>
    %cst_25 = arith.constant dense<0.000000e+00> : vector<2x2xf32>
    %101 = tpu.matmul %98, %99, %cst_25 {dimension_numbers = #tpu.dot_dimension_numbers<[1], [1], [0], [0], [0, 0, 1, 0], [], []>} : vector<2x16xbf16>, vector<2x16xbf16>, vector<2x2xf32> -> vector<2x2xf32>
    %cst_26 = arith.constant dense<0xFF800000> : vector<2xf32>
    %102 = vector.multi_reduction <maximumf>, %101, %cst_26 [1] : vector<2x2xf32> to vector<2xf32>
    %103 = vector.shape_cast %102 : vector<2xf32> to vector<2x1xf32>
    %104 = vector.broadcast %103 : vector<2x1xf32> to vector<2x2xf32>
    %105 = arith.subf %101, %104 : vector<2x2xf32>
    %106 = math.exp %105 : vector<2x2xf32>
    %cst_27 = arith.constant dense<0.000000e+00> : vector<2xf32>
    %107 = vector.multi_reduction <add>, %106, %cst_27 [1] : vector<2x2xf32> to vector<2xf32>
    %108 = vector.shape_cast %107 : vector<2xf32> to vector<2x1xf32>
    %109 = tpu.reciprocal %108 {approx = true} : vector<2x1xf32> -> vector<2x1xf32>
    %110 = vector.broadcast %109 : vector<2x1xf32> to vector<2x2xf32>
    %111 = arith.mulf %106, %110 : vector<2x2xf32>
    %112 = arith.truncf %111 : vector<2x2xf32> to vector<2x2xbf16>
    %cst_28 = arith.constant dense<0.000000e+00> : vector<2x16xf32>
    %113 = tpu.matmul %112, %100, %cst_28 {dimension_numbers = #tpu.dot_dimension_numbers<[1], [0], [0], [1], [0, 0, 1, 1], [], []>} : vector<2x2xbf16>, vector<2x16xbf16>, vector<2x16xf32> -> vector<2x16xf32>
    %114 = vector.extract_strided_slice %1 {offsets = [0, 112], sizes = [2, 16], strides = [1, 1]} : vector<2x384xbf16> to vector<2x16xbf16>
    %115 = vector.extract_strided_slice %1 {offsets = [0, 240], sizes = [2, 16], strides = [1, 1]} : vector<2x384xbf16> to vector<2x16xbf16>
    %116 = vector.extract_strided_slice %1 {offsets = [0, 368], sizes = [2, 16], strides = [1, 1]} : vector<2x384xbf16> to vector<2x16xbf16>
    %cst_29 = arith.constant dense<0.000000e+00> : vector<2x2xf32>
    %117 = tpu.matmul %114, %115, %cst_29 {dimension_numbers = #tpu.dot_dimension_numbers<[1], [1], [0], [0], [0, 0, 1, 0], [], []>} : vector<2x16xbf16>, vector<2x16xbf16>, vector<2x2xf32> -> vector<2x2xf32>
    %cst_30 = arith.constant dense<0xFF800000> : vector<2xf32>
    %118 = vector.multi_reduction <maximumf>, %117, %cst_30 [1] : vector<2x2xf32> to vector<2xf32>
    %119 = vector.shape_cast %118 : vector<2xf32> to vector<2x1xf32>
    %120 = vector.broadcast %119 : vector<2x1xf32> to vector<2x2xf32>
    %121 = arith.subf %117, %120 : vector<2x2xf32>
    %122 = math.exp %121 : vector<2x2xf32>
    %cst_31 = arith.constant dense<0.000000e+00> : vector<2xf32>
    %123 = vector.multi_reduction <add>, %122, %cst_31 [1] : vector<2x2xf32> to vector<2xf32>
    %124 = vector.shape_cast %123 : vector<2xf32> to vector<2x1xf32>
    %125 = tpu.reciprocal %124 {approx = true} : vector<2x1xf32> -> vector<2x1xf32>
    %126 = vector.broadcast %125 : vector<2x1xf32> to vector<2x2xf32>
    %127 = arith.mulf %122, %126 : vector<2x2xf32>
    %128 = arith.truncf %127 : vector<2x2xf32> to vector<2x2xbf16>
    %cst_32 = arith.constant dense<0.000000e+00> : vector<2x16xf32>
    %129 = tpu.matmul %128, %116, %cst_32 {dimension_numbers = #tpu.dot_dimension_numbers<[1], [0], [0], [1], [0, 0, 1, 1], [], []>} : vector<2x2xbf16>, vector<2x16xbf16>, vector<2x16xf32> -> vector<2x16xf32>
    %130 = tpu.concatenate %17, %33, %49, %65, %81, %97, %113, %129 in 1 : vector<2x16xf32>, vector<2x16xf32>, vector<2x16xf32>, vector<2x16xf32>, vector<2x16xf32>, vector<2x16xf32>, vector<2x16xf32>, vector<2x16xf32> -> vector<2x128xf32>
    %131 = arith.truncf %130 : vector<2x128xf32> to vector<2x128xbf16>
    %c0_33 = arith.constant 0 : index
    %c0_34 = arith.constant 0 : index
    %c0_35 = arith.constant 0 : index
    %132 = vector.load %arg2[%c0_33, %c0_34, %c0_35] : memref<1x2x128xbf16, #tpu.memory_space<vmem>>, vector<1x2x128xbf16>
    %133 = vector.shape_cast %132 : vector<1x2x128xbf16> to vector<2x128xbf16>
    %134 = vector.shape_cast %131 : vector<2x128xbf16> to vector<1x2x128xbf16>
    tpu.vector_store %arg2[%c0_33, %c0_34, %c0_35], %134 {strides = array<i32>} : memref<1x2x128xbf16, #tpu.memory_space<vmem>>, vector<1x2x128xbf16>,
    return
  }
  func.func @transform_0(%arg0: i32) -> (i32, i32, i32) {
    %c0_i32 = arith.constant 0 : i32
    %c0_i32_0 = arith.constant 0 : i32
    %c0_i32_1 = arith.constant 0 : i32
    return %arg0, %c0_i32, %c0_i32_0 : i32, i32, i32
  }
  func.func @transform_1(%arg0: i32) -> (i32, i32, i32) {
    %c0_i32 = arith.constant 0 : i32
    %c0_i32_0 = arith.constant 0 : i32
    %c0_i32_1 = arith.constant 0 : i32
    return %arg0, %c0_i32, %c0_i32_0 : i32, i32, i32
  }
}

module attributes {stable_mosaic.version = 11 : i64} {
  func.func @_mlp_kernel(%arg0: i32, %arg1: memref<8x128xf32, #tpu.memory_space<vmem>>, %arg2: memref<128x256xbf16, #tpu.memory_space<vmem>>, %arg3: memref<1x256xf32, #tpu.memory_space<vmem>>, %arg4: memref<256x128xbf16, #tpu.memory_space<vmem>>, %arg5: memref<1x128xf32, #tpu.memory_space<vmem>>, %arg6: memref<1x128xf32, #tpu.memory_space<vmem>>, %arg7: memref<1x128xf32, #tpu.memory_space<vmem>>, %arg8: memref<8x128xf32, #tpu.memory_space<vmem>>) attributes {dimension_semantics = [#tpu.dimension_semantics<parallel>], iteration_bounds = array<i64: 1>, scalar_prefetch = 0 : i64, scratch_operands = 0 : i64, tpu.core_type = #tpu.core_type<tc>, window_params = [{transform_indices = @transform_0, window_bounds = array<i64: 8, 128>}, {pipeline_mode = #tpu.pipeline_mode<synchronous>, transform_indices = @transform_1, window_bounds = array<i64: 128, 256>}, {pipeline_mode = #tpu.pipeline_mode<synchronous>, transform_indices = @transform_2, window_bounds = array<i64: 1, 256>}, {pipeline_mode = #tpu.pipeline_mode<synchronous>, transform_indices = @transform_3, window_bounds = array<i64: 256, 128>}, {pipeline_mode = #tpu.pipeline_mode<synchronous>, transform_indices = @transform_4, window_bounds = array<i64: 1, 128>}, {pipeline_mode = #tpu.pipeline_mode<synchronous>, transform_indices = @transform_5, window_bounds = array<i64: 1, 128>}, {pipeline_mode = #tpu.pipeline_mode<synchronous>, transform_indices = @transform_6, window_bounds = array<i64: 1, 128>}, {transform_indices = @transform_7, window_bounds = array<i64: 8, 128>}]} {
    %c0 = arith.constant 0 : index
    %c0_0 = arith.constant 0 : index
    %0 = vector.load %arg1[%c0, %c0_0] : memref<8x128xf32, #tpu.memory_space<vmem>>, vector<8x128xf32>
    %1 = arith.truncf %0 : vector<8x128xf32> to vector<8x128xbf16>
    %c0_1 = arith.constant 0 : index
    %c0_2 = arith.constant 0 : index
    %2 = vector.load %arg2[%c0_1, %c0_2] : memref<128x256xbf16, #tpu.memory_space<vmem>>, vector<128x256xbf16>
    %cst = arith.constant dense<0.000000e+00> : vector<8x256xf32>
    %3 = tpu.matmul %1, %2, %cst {dimension_numbers = #tpu.dot_dimension_numbers<[1], [0], [0], [1], [0, 0, 1, 1], [], []>} : vector<8x128xbf16>, vector<128x256xbf16>, vector<8x256xf32> -> vector<8x256xf32>
    %c0_3 = arith.constant 0 : index
    %c0_4 = arith.constant 0 : index
    %4 = vector.load %arg3[%c0_3, %c0_4] : memref<1x256xf32, #tpu.memory_space<vmem>>, vector<1x256xf32>
    %5 = vector.broadcast %4 : vector<1x256xf32> to vector<8x256xf32>
    %6 = arith.addf %3, %5 : vector<8x256xf32>
    %cst_5 = arith.constant 0.000000e+00 : f32
    %7 = vector.broadcast %cst_5 : f32 to vector<8x256xf32>
    %8 = arith.maximumf %6, %7 : vector<8x256xf32>
    %9 = arith.truncf %8 : vector<8x256xf32> to vector<8x256xbf16>
    %c0_6 = arith.constant 0 : index
    %c0_7 = arith.constant 0 : index
    %10 = vector.load %arg4[%c0_6, %c0_7] : memref<256x128xbf16, #tpu.memory_space<vmem>>, vector<256x128xbf16>
    %cst_8 = arith.constant dense<0.000000e+00> : vector<8x128xf32>
    %11 = tpu.matmul %9, %10, %cst_8 {dimension_numbers = #tpu.dot_dimension_numbers<[1], [0], [0], [1], [0, 0, 1, 1], [], []>} : vector<8x256xbf16>, vector<256x128xbf16>, vector<8x128xf32> -> vector<8x128xf32>
    %c0_9 = arith.constant 0 : index
    %c0_10 = arith.constant 0 : index
    %12 = vector.load %arg5[%c0_9, %c0_10] : memref<1x128xf32, #tpu.memory_space<vmem>>, vector<1x128xf32>
    %13 = vector.broadcast %12 : vector<1x128xf32> to vector<8x128xf32>
    %14 = arith.addf %11, %13 : vector<8x128xf32>
    %15 = arith.addf %14, %0 : vector<8x128xf32>
    %c0_11 = arith.constant 0 : index
    %c0_12 = arith.constant 0 : index
    %16 = vector.load %arg6[%c0_11, %c0_12] : memref<1x128xf32, #tpu.memory_space<vmem>>, vector<1x128xf32>
    %c0_13 = arith.constant 0 : index
    %c0_14 = arith.constant 0 : index
    %17 = vector.load %arg7[%c0_13, %c0_14] : memref<1x128xf32, #tpu.memory_space<vmem>>, vector<1x128xf32>
    %cst_15 = arith.constant dense<0.000000e+00> : vector<8xf32>
    %18 = vector.multi_reduction <add>, %15, %cst_15 [1] : vector<8x128xf32> to vector<8xf32>
    %19 = vector.shape_cast %18 : vector<8xf32> to vector<8x1xf32>
    %cst_16 = arith.constant 1.280000e+02 : f32
    %20 = vector.broadcast %cst_16 : f32 to vector<8x1xf32>
    %21 = arith.divf %19, %20 : vector<8x1xf32>
    %22 = vector.broadcast %21 : vector<8x1xf32> to vector<8x128xf32>
    %23 = arith.subf %15, %22 : vector<8x128xf32>
    %24 = arith.mulf %23, %23 : vector<8x128xf32>
    %cst_17 = arith.constant dense<0.000000e+00> : vector<8xf32>
    %25 = vector.multi_reduction <add>, %24, %cst_17 [1] : vector<8x128xf32> to vector<8xf32>
    %26 = vector.shape_cast %25 : vector<8xf32> to vector<8x1xf32>
    %cst_18 = arith.constant 1.280000e+02 : f32
    %27 = vector.broadcast %cst_18 : f32 to vector<8x1xf32>
    %28 = arith.divf %26, %27 : vector<8x1xf32>
    %cst_19 = arith.constant 9.99999974E-6 : f32
    %29 = vector.broadcast %cst_19 : f32 to vector<8x1xf32>
    %30 = arith.addf %28, %29 : vector<8x1xf32>
    %31 = math.rsqrt %30 : vector<8x1xf32>
    %32 = vector.broadcast %31 : vector<8x1xf32> to vector<8x128xf32>
    %33 = arith.mulf %23, %32 : vector<8x128xf32>
    %34 = vector.broadcast %16 : vector<1x128xf32> to vector<8x128xf32>
    %35 = arith.mulf %33, %34 : vector<8x128xf32>
    %36 = vector.broadcast %17 : vector<1x128xf32> to vector<8x128xf32>
    %37 = arith.addf %35, %36 : vector<8x128xf32>
    %c0_20 = arith.constant 0 : index
    %c0_21 = arith.constant 0 : index
    %38 = vector.load %arg8[%c0_20, %c0_21] : memref<8x128xf32, #tpu.memory_space<vmem>>, vector<8x128xf32>
    tpu.vector_store %arg8[%c0_20, %c0_21], %37 {strides = array<i32>} : memref<8x128xf32, #tpu.memory_space<vmem>>, vector<8x128xf32>,
    return
  }
  func.func @transform_0(%arg0: i32) -> (i32, i32) {
    %c0_i32 = arith.constant 0 : i32
    %c0_i32_0 = arith.constant 0 : i32
    return %arg0, %c0_i32 : i32, i32
  }
  func.func @transform_1(%arg0: i32) -> (i32, i32) {
    %c0_i32 = arith.constant 0 : i32
    %c0_i32_0 = arith.constant 0 : i32
    %c0_i32_1 = arith.constant 0 : i32
    return %c0_i32, %c0_i32_0 : i32, i32
  }
  func.func @transform_2(%arg0: i32) -> (i32, i32) {
    %c0_i32 = arith.constant 0 : i32
    %c0_i32_0 = arith.constant 0 : i32
    %c0_i32_1 = arith.constant 0 : i32
    return %c0_i32, %c0_i32_0 : i32, i32
  }
  func.func @transform_3(%arg0: i32) -> (i32, i32) {
    %c0_i32 = arith.constant 0 : i32
    %c0_i32_0 = arith.constant 0 : i32
    %c0_i32_1 = arith.constant 0 : i32
    return %c0_i32, %c0_i32_0 : i32, i32
  }
  func.func @transform_4(%arg0: i32) -> (i32, i32) {
    %c0_i32 = arith.constant 0 : i32
    %c0_i32_0 = arith.constant 0 : i32
    %c0_i32_1 = arith.constant 0 : i32
    return %c0_i32, %c0_i32_0 : i32, i32
  }
  func.func @transform_5(%arg0: i32) -> (i32, i32) {
    %c0_i32 = arith.constant 0 : i32
    %c0_i32_0 = arith.constant 0 : i32
    %c0_i32_1 = arith.constant 0 : i32
    return %c0_i32, %c0_i32_0 : i32, i32
  }
  func.func @transform_6(%arg0: i32) -> (i32, i32) {
    %c0_i32 = arith.constant 0 : i32
    %c0_i32_0 = arith.constant 0 : i32
    %c0_i32_1 = arith.constant 0 : i32
    return %c0_i32, %c0_i32_0 : i32, i32
  }
  func.func @transform_7(%arg0: i32) -> (i32, i32) {
    %c0_i32 = arith.constant 0 : i32
    %c0_i32_0 = arith.constant 0 : i32
    return %arg0, %c0_i32 : i32, i32
  }
}

module attributes {stable_mosaic.version = 11 : i64} {
  func.func @_linear_kernel(%arg0: i32, %arg1: memref<8x128xbf16, #tpu.memory_space<vmem>>, %arg2: memref<128x128xbf16, #tpu.memory_space<vmem>>, %arg3: memref<1x128xf32, #tpu.memory_space<vmem>>, %arg4: memref<8x128xf32, #tpu.memory_space<vmem>>, %arg5: memref<1x128xf32, #tpu.memory_space<vmem>>, %arg6: memref<1x128xf32, #tpu.memory_space<vmem>>, %arg7: memref<8x128xf32, #tpu.memory_space<vmem>>) attributes {dimension_semantics = [#tpu.dimension_semantics<parallel>], iteration_bounds = array<i64: 1>, scalar_prefetch = 0 : i64, scratch_operands = 0 : i64, tpu.core_type = #tpu.core_type<tc>, window_params = [{transform_indices = @transform_0, window_bounds = array<i64: 8, 128>}, {pipeline_mode = #tpu.pipeline_mode<synchronous>, transform_indices = @transform_1, window_bounds = array<i64: 128, 128>}, {pipeline_mode = #tpu.pipeline_mode<synchronous>, transform_indices = @transform_2, window_bounds = array<i64: 1, 128>}, {transform_indices = @transform_3, window_bounds = array<i64: 8, 128>}, {pipeline_mode = #tpu.pipeline_mode<synchronous>, transform_indices = @transform_4, window_bounds = array<i64: 1, 128>}, {pipeline_mode = #tpu.pipeline_mode<synchronous>, transform_indices = @transform_5, window_bounds = array<i64: 1, 128>}, {transform_indices = @transform_6, window_bounds = array<i64: 8, 128>}]} {
    %c0 = arith.constant 0 : index
    %c0_0 = arith.constant 0 : index
    %0 = vector.load %arg1[%c0, %c0_0] : memref<8x128xbf16, #tpu.memory_space<vmem>>, vector<8x128xbf16>
    %c0_1 = arith.constant 0 : index
    %c0_2 = arith.constant 0 : index
    %1 = vector.load %arg2[%c0_1, %c0_2] : memref<128x128xbf16, #tpu.memory_space<vmem>>, vector<128x128xbf16>
    %cst = arith.constant dense<0.000000e+00> : vector<8x128xf32>
    %2 = tpu.matmul %0, %1, %cst {dimension_numbers = #tpu.dot_dimension_numbers<[1], [0], [0], [1], [0, 0, 1, 1], [], []>} : vector<8x128xbf16>, vector<128x128xbf16>, vector<8x128xf32> -> vector<8x128xf32>
    %c0_3 = arith.constant 0 : index
    %c0_4 = arith.constant 0 : index
    %3 = vector.load %arg3[%c0_3, %c0_4] : memref<1x128xf32, #tpu.memory_space<vmem>>, vector<1x128xf32>
    %4 = vector.broadcast %3 : vector<1x128xf32> to vector<8x128xf32>
    %5 = arith.addf %2, %4 : vector<8x128xf32>
    %c0_5 = arith.constant 0 : index
    %c0_6 = arith.constant 0 : index
    %6 = vector.load %arg4[%c0_5, %c0_6] : memref<8x128xf32, #tpu.memory_space<vmem>>, vector<8x128xf32>
    %7 = arith.addf %5, %6 : vector<8x128xf32>
    %c0_7 = arith.constant 0 : index
    %c0_8 = arith.constant 0 : index
    %8 = vector.load %arg5[%c0_7, %c0_8] : memref<1x128xf32, #tpu.memory_space<vmem>>, vector<1x128xf32>
    %c0_9 = arith.constant 0 : index
    %c0_10 = arith.constant 0 : index
    %9 = vector.load %arg6[%c0_9, %c0_10] : memref<1x128xf32, #tpu.memory_space<vmem>>, vector<1x128xf32>
    %cst_11 = arith.constant dense<0.000000e+00> : vector<8xf32>
    %10 = vector.multi_reduction <add>, %7, %cst_11 [1] : vector<8x128xf32> to vector<8xf32>
    %11 = vector.shape_cast %10 : vector<8xf32> to vector<8x1xf32>
    %cst_12 = arith.constant 1.280000e+02 : f32
    %12 = vector.broadcast %cst_12 : f32 to vector<8x1xf32>
    %13 = arith.divf %11, %12 : vector<8x1xf32>
    %14 = vector.broadcast %13 : vector<8x1xf32> to vector<8x128xf32>
    %15 = arith.subf %7, %14 : vector<8x128xf32>
    %16 = arith.mulf %15, %15 : vector<8x128xf32>
    %cst_13 = arith.constant dense<0.000000e+00> : vector<8xf32>
    %17 = vector.multi_reduction <add>, %16, %cst_13 [1] : vector<8x128xf32> to vector<8xf32>
    %18 = vector.shape_cast %17 : vector<8xf32> to vector<8x1xf32>
    %cst_14 = arith.constant 1.280000e+02 : f32
    %19 = vector.broadcast %cst_14 : f32 to vector<8x1xf32>
    %20 = arith.divf %18, %19 : vector<8x1xf32>
    %cst_15 = arith.constant 9.99999974E-6 : f32
    %21 = vector.broadcast %cst_15 : f32 to vector<8x1xf32>
    %22 = arith.addf %20, %21 : vector<8x1xf32>
    %23 = math.rsqrt %22 : vector<8x1xf32>
    %24 = vector.broadcast %23 : vector<8x1xf32> to vector<8x128xf32>
    %25 = arith.mulf %15, %24 : vector<8x128xf32>
    %26 = vector.broadcast %8 : vector<1x128xf32> to vector<8x128xf32>
    %27 = arith.mulf %25, %26 : vector<8x128xf32>
    %28 = vector.broadcast %9 : vector<1x128xf32> to vector<8x128xf32>
    %29 = arith.addf %27, %28 : vector<8x128xf32>
    %c0_16 = arith.constant 0 : index
    %c0_17 = arith.constant 0 : index
    %30 = vector.load %arg7[%c0_16, %c0_17] : memref<8x128xf32, #tpu.memory_space<vmem>>, vector<8x128xf32>
    tpu.vector_store %arg7[%c0_16, %c0_17], %29 {strides = array<i32>} : memref<8x128xf32, #tpu.memory_space<vmem>>, vector<8x128xf32>,
    return
  }
  func.func @transform_0(%arg0: i32) -> (i32, i32) {
    %c0_i32 = arith.constant 0 : i32
    %c0_i32_0 = arith.constant 0 : i32
    return %arg0, %c0_i32 : i32, i32
  }
  func.func @transform_1(%arg0: i32) -> (i32, i32) {
    %c0_i32 = arith.constant 0 : i32
    %c0_i32_0 = arith.constant 0 : i32
    %c0_i32_1 = arith.constant 0 : i32
    return %c0_i32, %c0_i32_0 : i32, i32
  }
  func.func @transform_2(%arg0: i32) -> (i32, i32) {
    %c0_i32 = arith.constant 0 : i32
    %c0_i32_0 = arith.constant 0 : i32
    %c0_i32_1 = arith.constant 0 : i32
    return %c0_i32, %c0_i32_0 : i32, i32
  }
  func.func @transform_3(%arg0: i32) -> (i32, i32) {
    %c0_i32 = arith.constant 0 : i32
    %c0_i32_0 = arith.constant 0 : i32
    return %arg0, %c0_i32 : i32, i32
  }
  func.func @transform_4(%arg0: i32) -> (i32, i32) {
    %c0_i32 = arith.constant 0 : i32
    %c0_i32_0 = arith.constant 0 : i32
    %c0_i32_1 = arith.constant 0 : i32
    return %c0_i32, %c0_i32_0 : i32, i32
  }
  func.func @transform_5(%arg0: i32) -> (i32, i32) {
    %c0_i32 = arith.constant 0 : i32
    %c0_i32_0 = arith.constant 0 : i32
    %c0_i32_1 = arith.constant 0 : i32
    return %c0_i32, %c0_i32_0 : i32, i32
  }
  func.func @transform_6(%arg0: i32) -> (i32, i32) {
    %c0_i32 = arith.constant 0 : i32
    %c0_i32_0 = arith.constant 0 : i32
    return %arg0, %c0_i32 : i32, i32
  }
}

module attributes {stable_mosaic.version = 11 : i64} {
  func.func @_linear_kernel(%arg0: i32, %arg1: memref<8x128xf32, #tpu.memory_space<vmem>>, %arg2: memref<128x128xbf16, #tpu.memory_space<vmem>>, %arg3: memref<1x128xf32, #tpu.memory_space<vmem>>, %arg4: memref<8x128xf32, #tpu.memory_space<vmem>>) attributes {dimension_semantics = [#tpu.dimension_semantics<parallel>], iteration_bounds = array<i64: 1>, scalar_prefetch = 0 : i64, scratch_operands = 0 : i64, tpu.core_type = #tpu.core_type<tc>, window_params = [{transform_indices = @transform_0, window_bounds = array<i64: 8, 128>}, {pipeline_mode = #tpu.pipeline_mode<synchronous>, transform_indices = @transform_1, window_bounds = array<i64: 128, 128>}, {pipeline_mode = #tpu.pipeline_mode<synchronous>, transform_indices = @transform_2, window_bounds = array<i64: 1, 128>}, {transform_indices = @transform_3, window_bounds = array<i64: 8, 128>}]} {
    %c0 = arith.constant 0 : index
    %c0_0 = arith.constant 0 : index
    %0 = vector.load %arg1[%c0, %c0_0] : memref<8x128xf32, #tpu.memory_space<vmem>>, vector<8x128xf32>
    %1 = arith.truncf %0 : vector<8x128xf32> to vector<8x128xbf16>
    %c0_1 = arith.constant 0 : index
    %c0_2 = arith.constant 0 : index
    %2 = vector.load %arg2[%c0_1, %c0_2] : memref<128x128xbf16, #tpu.memory_space<vmem>>, vector<128x128xbf16>
    %cst = arith.constant dense<0.000000e+00> : vector<8x128xf32>
    %3 = tpu.matmul %1, %2, %cst {dimension_numbers = #tpu.dot_dimension_numbers<[1], [0], [0], [1], [0, 0, 1, 1], [], []>} : vector<8x128xbf16>, vector<128x128xbf16>, vector<8x128xf32> -> vector<8x128xf32>
    %c0_3 = arith.constant 0 : index
    %c0_4 = arith.constant 0 : index
    %4 = vector.load %arg3[%c0_3, %c0_4] : memref<1x128xf32, #tpu.memory_space<vmem>>, vector<1x128xf32>
    %5 = vector.broadcast %4 : vector<1x128xf32> to vector<8x128xf32>
    %6 = arith.addf %3, %5 : vector<8x128xf32>
    %c0_5 = arith.constant 0 : index
    %c0_6 = arith.constant 0 : index
    %7 = vector.load %arg4[%c0_5, %c0_6] : memref<8x128xf32, #tpu.memory_space<vmem>>, vector<8x128xf32>
    tpu.vector_store %arg4[%c0_5, %c0_6], %6 {strides = array<i32>} : memref<8x128xf32, #tpu.memory_space<vmem>>, vector<8x128xf32>,
    return
  }
  func.func @transform_0(%arg0: i32) -> (i32, i32) {
    %c0_i32 = arith.constant 0 : i32
    %c0_i32_0 = arith.constant 0 : i32
    return %arg0, %c0_i32 : i32, i32
  }
  func.func @transform_1(%arg0: i32) -> (i32, i32) {
    %c0_i32 = arith.constant 0 : i32
    %c0_i32_0 = arith.constant 0 : i32
    %c0_i32_1 = arith.constant 0 : i32
    return %c0_i32, %c0_i32_0 : i32, i32
  }
  func.func @transform_2(%arg0: i32) -> (i32, i32) {
    %c0_i32 = arith.constant 0 : i32
    %c0_i32_0 = arith.constant 0 : i32
    %c0_i32_1 = arith.constant 0 : i32
    return %c0_i32, %c0_i32_0 : i32, i32
  }
  func.func @transform_3(%arg0: i32) -> (i32, i32) {
    %c0_i32 = arith.constant 0 : i32
    %c0_i32_0 = arith.constant 0 : i32
    return %arg0, %c0_i32 : i32, i32
  }
}

</mosaic_0001>

<bundles_post_ra>
// kernel: action_predictor_forward.15
= control target key start
LH: loop header
LB: loop body
LE: loop exit
PB: predicated region body
PF: predicated region fallthrough
CT: control target
= control target key end

     0   :  { %s467_s12 = smov 0   ;;  %s533_s0 = inlined_call_operand.vmem [shape: f32[32,192], index: 0, kind: input, shape index: {}]   ;;  %s534_s1 = inlined_call_operand.vmem [shape: bf16[192,128], index: 1, kind: input, shape index: {}]   ;;  %s535_s2 = inlined_call_operand.vmem [shape: f32[1,128], index: 2, kind: input, shape index: {}]   ;;  %s536_s3 = inlined_call_operand.vmem [shape: f32[32,128], index: 3, kind: output, shape index: {}]  }
   0x1 LB: > { %s390_s13 = sadd.s32 4294967295, %s444_s12   ;;  %p394_p0 = scmp.ge.s32.totalorder %s444_s12, 1  ;;  %s444_s12 = sphi %s467_s12, %s13_s12  }
   0x2   : > { %p139_p1 = scmp.lt.s32.totalorder %s444_s12, 3 }
   0x4   : > { %p140_p2 = pnand %p394_p0, %p139_p1 }
   0x5   : > { %s395_s16 = sshll.u32 (!%p140_p2), %s390_s13, 1 }
   0x6   : > { %143 = sbr.rel (%p140_p2) target bundleno = 260 (0x104), region = 32  ;;  %p165_p3 = scmp.lt.s32.totalorder (!%p140_p2), %s395_s16, 3 }
   0xb   : > { %v426_v0 = vld [vmem:[%s534_s1 + $0x38] sm:$0xff]   ;;  %v446_v1 = vmov 0   ;;  %v427_v2 = vld [vmem:[%s534_s1 + $0x30] sm:$0xff]   ;;  %s538_s16 = smov (!%p165_p3, %s395_s16), 3  ;;  %v428_v3 = vld [vmem:[%s534_s1 + $0x28] sm:$0xff]   ;;  %vm287_vm0 = vcmask 523264  }
   0xc   : > { %291 = vmatprep.subr.bf16.mxu0 %v446_v1  ;;  %s416_s21 = sshll.u32 %s538_s16, 4  ;;  %v429_v4 = vld [vmem:[%s534_s1 + $0x20] sm:$0xff]   ;;  %v430_v8 = vld [vmem:[%s534_s1 + $0x18] sm:$0xff]   ;;  %v431_v9 = vld [vmem:[%s534_s1 + $0x10] sm:$0xff]   ;;  %s399_s18 = sshll.u32 %s538_s16, 3 }
   0xd   : > { %292 = vmatpush1.bf16.msra.mxu0 %v426_v0  ;;  %s490_s24 = scalar_lea.vmem %s533_s0, %s416_s21  ;;  %v432_v10 = vld [vmem:[%s534_s1 + $0x8] sm:$0xff]   ;;  %v433_v11 = vld [vmem:[%s534_s1] sm:$0xff]   ;;  %v434_v12 = vld [vmem:[%s534_s1 + $0x58] sm:$0xff]   ;;  %s175_s23 = scalar_lea.vmem %s536_s3, %s399_s18 }
   0xe   : > { %293 = vmatprep.subr.bf16.mxu0 %v446_v1  ;;  %v179_v5 = vld [vmem:[%s490_s24 + $0x8] sm:$0xff]  ;;  %v181_v6 = vld [vmem:[%s490_s24 + $0x18] sm:$0xff]  ;;  %v435_v13 = vld [vmem:[%s534_s1 + $0x50] sm:$0xff]  }
   0xf   : > { %v183_v7 = vpack.c.bf16 %v181_v6, %v179_v5  ;;  %v436_v14 = vld [vmem:[%s534_s1 + $0x48] sm:$0xff]   ;;  %v437_v15 = vld [vmem:[%s534_s1 + $0x40] sm:$0xff]   ;;  %v180_v17 = vld [vmem:[%s490_s24 + $0x10] sm:$0xff] }
  0x10   : > { %v178_v16 = vld [vmem:[%s490_s24] sm:$0xff] }
  0x11   : > { %294 = vmatpush1.bf16.msra.mxu0 %v427_v2  ;;  %413 = vmatprep.mubr.msk.bf16.mxu0 %vm287_vm0, %v183_v7  ;;  %v182_v18 = vpack.c.bf16 %v180_v17, %v178_v16  ;;  %v400_v19 = vld [vmem:[%s535_s2] ss:$0 sm:$0xff] }
  0x12   : > { %295 = vmatprep.subr.bf16.mxu0 %v446_v1 }
  0x15   : > { %296 = vmatpush1.bf16.msra.mxu0 %v428_v3 }
  0x16   : > { %297 = vmatprep.subr.bf16.mxu0 %v446_v1 }
  0x19   : > { %298 = vmatpush1.bf16.msra.mxu0 %v429_v4 }
  0x1a   : > { %299 = vmatprep.subr.bf16.mxu0 %v446_v1 }
  0x1d   : > { %300 = vmatpush1.bf16.msra.mxu0 %v430_v8 }
  0x1e   : > { %301 = vmatprep.subr.bf16.mxu0 %v446_v1 }
  0x21   : > { %302 = vmatpush1.bf16.msra.mxu0 %v431_v9 }
  0x22   : > { %303 = vmatprep.subr.bf16.mxu0 %v446_v1 }
  0x25   : > { %304 = vmatpush1.bf16.msra.mxu0 %v432_v10 }
  0x26   : > { %305 = vmatprep.subr.bf16.mxu0 %v446_v1 }
  0x29   : > { %306 = vmatpush1.bf16.msra.mxu0 %v433_v11 }
  0x2a   : > { %315 = vmatprep.subr.bf16.mxu0 %v446_v1 }
  0x2d   : > { %316 = vmatpush2.bf16.msra.mxu0 %v434_v12 }
  0x2e   : > { %317 = vmatprep.subr.bf16.mxu0 %v446_v1 }
  0x31   : > { %318 = vmatpush2.bf16.msra.mxu0 %v435_v13 }
  0x32   : > { %319 = vmatprep.subr.bf16.mxu0 %v446_v1 }
  0x35   : > { %320 = vmatpush2.bf16.msra.mxu0 %v436_v14 }
  0x36   : > { %321 = vmatprep.subr.bf16.mxu0 %v446_v1 }
  0x39   : > { %322 = vmatpush2.bf16.msra.mxu0 %v437_v15 }
  0x3c   : > { %324 = vmatmul.mubr.bf16.vlgmr.msra.gmra.mxu0 %v182_v18 }
  0xfc   : > { %v325_v20 = vpop.f32.mrf.mxu0 }
  0xfd   : > { %v326_v21 = vadd.f32 %v400_v19, %v325_v20 }
  0xfe   : > { %v327_v22 = vpop.f32.mrf.mxu0 }
  0xff   : > { %332 = vst [vmem:[%s175_s23] sm:$0xff] %v326_v21 }
 0x100   : > { %v328_v23 = vpop.f32.mrf.mxu0 }
 0x101   : > { %v329_v24 = vadd.f32 %v400_v19, %v328_v23 }
 0x102   : > { %v330_v25 = vpop.f32.mrf.mxu0 }
 0x103   : > { %333 = vst [vmem:[%s175_s23 + $0x8] sm:$0xff] %v329_v24 }
 0x104 PF: > { %s13_s12 = sadd.s32 1, %s444_s12  }
 0x105   : > { %p10_p4 = scmp.ge.s32.totalorder %s13_s12, 4  }
 0x107   :  { %12 = sbr.rel (!%p10_p4) target bundleno = 1 (0x1), region = 62 }

// kernel: action_predictor_forward.16
= control target key start
LH: loop header
LB: loop body
LE: loop exit
PB: predicated region body
PF: predicated region fallthrough
CT: control target
= control target key end

     0   :  { %s827_s18 = smov 0   ;;  %s944_s0 = inlined_call_operand.vmem [shape: f32[48,128], index: 0, kind: input, shape index: {}]   ;;  %s945_s1 = inlined_call_operand.vmem [shape: f32[1,128], index: 1, kind: input, shape index: {}]   ;;  %s946_s2 = inlined_call_operand.vmem [shape: f32[1,128], index: 2, kind: input, shape index: {}]   ;;  %s947_s3 = inlined_call_operand.vmem [shape: bf16[128,384], index: 3, kind: input, shape index: {}]   ;;  %s948_s4 = inlined_call_operand.vmem [shape: f32[1,384], index: 4, kind: input, shape index: {}]   ;;  %s949_s5 = inlined_call_operand.vmem [shape: bf16[48,384], index: 5, kind: output, shape index: {}]  }
   0x1 LB: > { %s663_s19 = sadd.s32 4294967295, %s794_s18   ;;  %p667_p0 = scmp.ge.s32.totalorder %s794_s18, 1  ;;  %s794_s18 = sphi %s827_s18, %s15_s18  }
   0x2   : > { %p188_p1 = scmp.lt.s32.totalorder %s794_s18, 3 }
   0x4   : > { %p189_p2 = pnand %p667_p0, %p188_p1 }
   0x5   : > { %s217_s20 = smul.u32 (!%p189_p2), 3, %s663_s19 }
   0x6   : > { %192 = sbr.rel (%p189_p2) target bundleno = 536 (0x218), region = 40 }
   0x7   : > { %p218_p3 = scmp.lt.s32.totalorder (!%p189_p2), %s217_s20, 5 }
   0xb   : > { %s951_s20 = smov (!%p218_p3, %s217_s20), 5  ;;  %v750_v3 = vld [vmem:[%s947_s3 + $0xac] ss:$12 sps:$4 sm:$0xff]   ;;  %v752_v4 = vld [vmem:[%s947_s3 + $0xa8] ss:$12 sps:$4 sm:$0xff]   ;;  %v796_v32 = vmov 0  }
   0xc   : > { %s668_s21 = sshll.u32 %s951_s20, 3  ;;  %v753_v5 = vld [vmem:[%s947_s3 + $0xb0] ss:$12 sps:$4 sm:$0xff]   ;;  %467 = vmatprep.subr.bf16.mxu0 %v750_v3  ;;  %v754_v18 = vld [vmem:[%s947_s3 + $0x94] ss:$12 sps:$4 sm:$0xff]   ;;  %499 = vmatprep.mubr.bf16.mxu0 %v796_v32  ;;  %s740_s8 = smul.u32 12, %s951_s20 }
   0xd   : > { %s221_s24 = scalar_lea.vmem %s944_s0, %s668_s21  ;;  %720 = vmatprep.subr.bf16.mxu1 %v753_v5  ;;  %468 = vmatpush1.bf16.msra.mxu0 %v752_v4  ;;  %v756_v19 = vld [vmem:[%s947_s3 + $0x90] ss:$12 sps:$4 sm:$0xff]   ;;  %v757_v20 = vld [vmem:[%s947_s3 + $0x98] ss:$12 sps:$4 sm:$0xff]   ;;  %v761_v23 = vld [vmem:[%s947_s3 + $0x80] ss:$12 sps:$4 sm:$0xff]  }
   0xe   : > { %v231_v0 = vld [vmem:[%s221_s24] sm:$0xff]  ;;  %v233_v1 = vld [vmem:[%s221_s24 + $0x10] sm:$0xff]  ;;  %v232_v2 = vld [vmem:[%s221_s24 + $0x8] sm:$0xff]  ;;  %721 = vmatpush3.bf16.msra.mxu1 %v753_v5  ;;  %469 = vmatprep.subr.bf16.mxu0 %v754_v18  ;;  %s228_s11 = scalar_lea.vmem %s949_s5, %s740_s8 }
   0xf   : > { %236 = vadd.xlane.f32.xlu0 %v231_v0  ;;  %240 = vadd.xlane.f32.xlu1 %v233_v1  ;;  %v758_v21 = vld [vmem:[%s947_s3 + $0x7c] ss:$12 sps:$4 sm:$0xff]   ;;  %v760_v22 = vld [vmem:[%s947_s3 + $0x78] ss:$12 sps:$4 sm:$0xff]   ;;  %v764_v25 = vld [vmem:[%s947_s3 + $0x60] ss:$12 sps:$4 sm:$0xff]  }
  0x10   : > { %722 = vmatprep.subr.bf16.mxu1 %v757_v20  ;;  %v762_v24 = vld [vmem:[%s947_s3 + $0x64] ss:$12 sps:$4 sm:$0xff]   ;;  %v765_v26 = vld [vmem:[%s947_s3 + $0x68] ss:$12 sps:$4 sm:$0xff]   ;;  %v766_v27 = vld [vmem:[%s947_s3 + $0x4c] ss:$12 sps:$4 sm:$0xff]  }
  0x11   : > { %470 = vmatpush1.bf16.msra.mxu0 %v756_v19  ;;  %v769_v28 = vld [vmem:[%s947_s3 + $0x50] ss:$12 sps:$4 sm:$0xff]   ;;  %v768_v29 = vld [vmem:[%s947_s3 + $0x48] ss:$12 sps:$4 sm:$0xff]   ;;  %v773_v31 = vld [vmem:[%s947_s3 + $0x38] ss:$12 sps:$4 sm:$0xff]  }
  0x12   : > { %723 = vmatpush3.bf16.msra.mxu1 %v757_v20  ;;  %471 = vmatprep.subr.bf16.mxu0 %v758_v21  ;;  %v770_v30 = vld [vmem:[%s947_s3 + $0x34] ss:$12 sps:$4 sm:$0xff]   ;;  %v772_v33 = vld [vmem:[%s947_s3 + $0x30] ss:$12 sps:$4 sm:$0xff]   ;;  %v776_v36 = vld [vmem:[%s947_s3 + $0x18] ss:$12 sps:$4 sm:$0xff]  }
  0x13   : > { %238 = vadd.xlane.f32.xlu0 %v232_v2  ;;  %724 = vmatprep.subr.bf16.mxu1 %v761_v23  ;;  %v774_v34 = vld [vmem:[%s947_s3 + $0x1c] ss:$12 sps:$4 sm:$0xff]   ;;  %v777_v35 = vld [vmem:[%s947_s3 + $0x20] ss:$12 sps:$4 sm:$0xff]   ;;  %v778_v37 = vld [vmem:[%s947_s3 + $0x4] ss:$12 sps:$4 sm:$0xff]  }
  0x14   : > { %v781_v38 = vld [vmem:[%s947_s3 + $0x8] ss:$12 sps:$4 sm:$0xff]   ;;  %v780_v39 = vld [vmem:[%s947_s3] ss:$12 sps:$4 sm:$0xff]  }
  0x15   : > { %472 = vmatpush1.bf16.msra.mxu0 %v760_v22  ;;  %v670_v51 = vld [vmem:[%s945_s1] ss:$0 sm:$0xff] }
  0x16   : > { %725 = vmatpush3.bf16.msra.mxu1 %v761_v23  ;;  %473 = vmatprep.subr.bf16.mxu0 %v762_v24  ;;  %v671_v57 = vld [vmem:[%s946_s2] ss:$0 sm:$0xff] }
  0x17   : > { %726 = vmatprep.subr.bf16.mxu1 %v765_v26  ;;  %v322_v4 = vld [vmem:[%s948_s4] sm:$0x7] }
  0x19   : > { %474 = vmatpush1.bf16.msra.mxu0 %v764_v25 }
  0x1a   : > { %727 = vmatpush3.bf16.msra.mxu1 %v765_v26  ;;  %475 = vmatprep.subr.bf16.mxu0 %v766_v27 }
  0x1b   : > { %728 = vmatprep.subr.bf16.mxu1 %v769_v28 }
  0x1d   : > { %476 = vmatpush1.bf16.msra.mxu0 %v768_v29 }
  0x1e   : > { %729 = vmatpush3.bf16.msra.mxu1 %v769_v28  ;;  %477 = vmatprep.subr.bf16.mxu0 %v770_v30 }
  0x1f   : > { %730 = vmatprep.subr.bf16.mxu1 %v773_v31 }
  0x21   : > { %478 = vmatpush1.bf16.msra.mxu0 %v772_v33 }
  0x22   : > { %731 = vmatpush3.bf16.msra.mxu1 %v773_v31  ;;  %479 = vmatprep.subr.bf16.mxu0 %v774_v34 }
  0x23   : > { %732 = vmatprep.subr.bf16.mxu1 %v777_v35 }
  0x25   : > { %480 = vmatpush1.bf16.msra.mxu0 %v776_v36 }
  0x26   : > { %733 = vmatpush3.bf16.msra.mxu1 %v777_v35  ;;  %481 = vmatprep.subr.bf16.mxu0 %v778_v37 }
  0x27   : > { %734 = vmatprep.subr.bf16.mxu1 %v781_v38 }
  0x29   : > { %482 = vmatpush1.bf16.msra.mxu0 %v780_v39 }
  0x2a   : > { %735 = vmatpush3.bf16.msra.mxu1 %v781_v38 }
  0x98   : > { %v237_v6 = vpop.xlane.xlu0 %236  ;;  %v241_v7 = vpop.xlane.xlu1 %240 }
  0x99   : > { %v243_v8 = vmul.f32 0.0078125, %v237_v6  ;;  %v245_v9 = vmul.f32 0.0078125, %v241_v7 }
  0x9b   : > { %v850_v10 = vsub.f32 %v231_v0, %v243_v8  ;;  %v852_v11 = vsub.f32 %v233_v1, %v245_v9  ;;  %v324_v1 = vlaneseq }
  0x9c   : > { %v239_v12 = vpop.xlane.xlu0 %238 }
  0x9d   : > { %v244_v13 = vmul.f32 0.0078125, %v239_v12  ;;  %v249_v14 = vmul.f32 %v850_v10, %v850_v10  ;;  %v251_v16 = vmul.f32 %v852_v11, %v852_v11 }
  0x9f   : > { %v856_v15 = vsub.f32 %v232_v2, %v244_v13  ;;  %252 = vadd.xlane.f32.xlu1 %v249_v14  ;;  %v325_v2 = vshrl.u32 %v324_v1, 7 }
  0xa1   : > { %v250_v17 = vmul.f32 %v856_v15, %v856_v15  ;;  %v334_v3 = vsub.s32 2, %v325_v2  ;;  %v326_v5 = vsub.s32 0, %v325_v2  ;;  %v330_v6 = vsub.s32 1, %v325_v2 }
  0xa3   : > { %256 = vadd.xlane.f32.xlu1 %v251_v16  ;;  %254 = vadd.xlane.f32.xlu0 %v250_v17  ;;  %v335_v7 = vrot.slane %v322_v4, %v334_v3  ;;  %v327_v8 = vrot.slane %v322_v4, %v326_v5  ;;  %v331_v9 = vrot.slane %v322_v4, %v330_v6 }
 0x128   : > { %v253_v40 = vpop.xlane.xlu1 %252 }
 0x129   : > { %v258_v41 = vmul.f32 0.0078125, %v253_v40 }
 0x12b   : > { %v261_v42 = vadd.f32 1e-12, %v258_v41 }
 0x12c   : > { %v257_v43 = vpop.xlane.xlu1 %256  ;;  %v255_v44 = vpop.xlane.xlu0 %254 }
 0x12d   : > { %782 = vrsqrt.f32 %v261_v42  ;;  %v260_v45 = vmul.f32 0.0078125, %v257_v43  ;;  %v259_v46 = vmul.f32 0.0078125, %v255_v44 }
 0x12f   : > { %v263_v47 = vadd.f32 1e-12, %v260_v45  ;;  %v262_v48 = vadd.f32 1e-12, %v259_v46 }
 0x131   : > { %784 = vrsqrt.f32 %v263_v47 }
 0x132   : > { %786 = vrsqrt.f32 %v262_v48 }
 0x13a   : > { %v783_v49 = vpop.eup %782 }
 0x13b   : > { %v267_v50 = vmul.f32 %v783_v49, %v850_v10 }
 0x13d   : > { %v276_v56 = vmul.f32 %v670_v51, %v267_v50 }
 0x13e   : > { %v785_v52 = vpop.eup %784 }
 0x13f   : > { %v787_v53 = vpop.eup %786  ;;  %v269_v54 = vmul.f32 %v785_v52, %v852_v11  ;;  %v285_v61 = vadd.f32 %v671_v57, %v276_v56 }
 0x140   : > { %v268_v55 = vmul.f32 %v787_v53, %v856_v15 }
 0x141   : > { %v278_v58 = vmul.f32 %v670_v51, %v269_v54 }
 0x142   : > { %v277_v59 = vmul.f32 %v670_v51, %v268_v55 }
 0x143   : > { %v287_v60 = vadd.f32 %v671_v57, %v278_v58 }
 0x144   : > { %v286_v62 = vadd.f32 %v671_v57, %v277_v59 }
 0x145   : > { %v289_v63 = vpack.c.bf16 %v287_v60, %v287_v60 }
 0x146   : > { %v288_v0 = vpack.c.bf16 %v286_v62, %v285_v61 }
 0x148   : > { %500 = vmatmul.mubr.bf16.vlgmr.msra.gmra.mxu0 %v288_v0  ;;  %736 = vmatprep.mubr.bf16.mxu1 %v288_v0 }
 0x149   : > { %737 = vmatmul.mubr.bf16.vlgmr.msra.gmra.mxu1 %v289_v63  ;;  %509 = vmatprep.mubr.bf16.mxu0 %v796_v32 }
 0x150   : > { %510 = vmatmul.mubr.bf16.gmra.mxu0 %v289_v63 }
 0x208   : > { %v501_v10 = vpop.f32.mrf.mxu0 }
 0x209   : > { %v738_v11 = vpop.f32.mrf.mxu1  ;;  %v502_v14 = vadd.f32 %v501_v10, %v327_v8 }
 0x20a   : > { %v561_v12 = vadd.f32 %v738_v11, %v335_v7  ;;  %v503_v13 = vpop.f32.mrf.mxu0 }
 0x20b   : > { %v504_v15 = vadd.f32 %v503_v13, %v331_v9  ;;  %v552_v16 = vpop.f32.mrf.mxu1 }
 0x20c   : > { %v709_v17 = vpack.c.bf16 %v561_v12, %v561_v12  ;;  %v553_v18 = vadd.f32 %v552_v16, %v335_v7  ;;  %v505_v19 = vpop.f32.mrf.mxu0 }
 0x20d   : > { %v704_v20 = vpack.c.bf16 %v504_v15, %v502_v14  ;;  %v739_v21 = vpop.f32.mrf.mxu1  ;;  %v506_v24 = vadd.f32 %v505_v19, %v327_v8 }
 0x20e   : > { %604 = vst [vmem:[%s228_s11 + $0x20] sm:$0xf] %v709_v17  ;;  %v705_v22 = vpack.c.bf16 %v553_v18, %v553_v18  ;;  %v507_v23 = vpop.f32.mrf.mxu0 }
 0x20f   : > { %599 = vst [vmem:[%s228_s11] sm:$0xff] %v704_v20  ;;  %v508_v25 = vadd.f32 %v507_v23, %v331_v9  ;;  %v555_v26 = vpop.f32.mrf.mxu1 }
 0x210   : > { %600 = vst [vmem:[%s228_s11 + $0x8] sm:$0xf] %v705_v22  ;;  %v556_v27 = vadd.f32 %v555_v26, %v335_v7  ;;  %v511_v28 = vpop.f32.mrf.mxu0 }
 0x211   : > { %v706_v29 = vpack.c.bf16 %v508_v25, %v506_v24  ;;  %v512_v32 = vadd.f32 %v511_v28, %v327_v8 }
 0x212   : > { %v707_v30 = vpack.c.bf16 %v556_v27, %v556_v27  ;;  %v513_v31 = vpop.f32.mrf.mxu0 }
 0x213   : > { %601 = vst [vmem:[%s228_s11 + $0xc] sm:$0xff] %v706_v29  ;;  %v514_v33 = vadd.f32 %v513_v31, %v331_v9 }
 0x214   : > { %602 = vst [vmem:[%s228_s11 + $0x14] sm:$0xf] %v707_v30  ;;  %v515_v34 = vpop.f32.mrf.mxu0 }
 0x215   : > { %v708_v35 = vpack.c.bf16 %v514_v33, %v512_v32 }
 0x216   : > { %v516_v36 = vpop.f32.mrf.mxu0 }
 0x217   : > { %603 = vst [vmem:[%s228_s11 + $0x18] sm:$0xff] %v708_v35 }
 0x218 PF: > { %s15_s18 = sadd.s32 1, %s794_s18  }
 0x219   : > { %p12_p4 = scmp.ge.s32.totalorder %s15_s18, 4  }
 0x21b   :  { %14 = sbr.rel (!%p12_p4) target bundleno = 1 (0x1), region = 70 }

// kernel: action_predictor_forward.18
= control target key start
LH: loop header
LB: loop body
LE: loop exit
PB: predicated region body
PF: predicated region fallthrough
CT: control target
= control target key end

     0   :  { %s535_s15 = smov 0   ;;  %s586_s0 = inlined_call_operand.vmem [shape: bf16[48,128], index: 0, kind: input, shape index: {}]   ;;  %s587_s1 = inlined_call_operand.vmem [shape: bf16[128,128], index: 1, kind: input, shape index: {}]   ;;  %s588_s2 = inlined_call_operand.vmem [shape: f32[1,128], index: 2, kind: input, shape index: {}]   ;;  %s589_s3 = inlined_call_operand.vmem [shape: f32[48,128], index: 3, kind: input, shape index: {}]   ;;  %s590_s4 = inlined_call_operand.vmem [shape: f32[48,128], index: 4, kind: output, shape index: {}]  }
   0x1 LB: > { %s433_s16 = sadd.s32 4294967295, %s508_s15   ;;  %p437_p0 = scmp.ge.s32.totalorder %s508_s15, 1  ;;  %s508_s15 = sphi %s535_s15, %s14_s15  }
   0x2   : > { %p174_p1 = scmp.lt.s32.totalorder %s508_s15, 3 }
   0x4   : > { %p175_p2 = pnand %p437_p0, %p174_p1 }
   0x5   : > { %s205_s19 = smul.u32 (!%p175_p2), 3, %s433_s16 }
   0x6   : > { %178 = sbr.rel (%p175_p2) target bundleno = 248 (0xf8), region = 36 }
   0x7   : > { %p206_p3 = scmp.lt.s32.totalorder (!%p175_p2), %s205_s19, 5 }
   0xb   : > { %v492_v0 = vld [vmem:[%s587_s1 + $0x38] sm:$0xff]   ;;  %v493_v1 = vld [vmem:[%s587_s1 + $0x30] sm:$0xff]   ;;  %v494_v2 = vld [vmem:[%s587_s1 + $0x28] sm:$0xff]   ;;  %s592_s19 = smov (!%p206_p3, %s205_s19), 5 }
   0xc   : > { %464 = vmatprep.subr.bf16.mxu0 %v492_v0  ;;  %s438_s24 = sshll.u32 %s592_s19, 2  ;;  %v495_v3 = vld [vmem:[%s587_s1 + $0x20] sm:$0xff]   ;;  %v496_v5 = vld [vmem:[%s587_s1 + $0x18] sm:$0xff]   ;;  %v497_v6 = vld [vmem:[%s587_s1 + $0x10] sm:$0xff]   ;;  %s439_s12 = sshll.u32 %s592_s19, 3 }
   0xd   : > { %465 = vmatpush3.bf16.msra.mxu0 %v492_v0  ;;  %s209_s29 = scalar_lea.vmem %s586_s0, %s438_s24  ;;  %v498_v7 = vld [vmem:[%s587_s1 + $0x8] sm:$0xff]   ;;  %v499_v8 = vld [vmem:[%s587_s1] sm:$0xff]   ;;  %s215_s16 = scalar_lea.vmem %s589_s3, %s439_s12 }
   0xe   : > { %466 = vmatprep.subr.bf16.mxu0 %v493_v1  ;;  %v500_v4 = vld [vmem:[%s209_s29] sm:$0xff]   ;;  %v501_v9 = vld [vmem:[%s209_s29 + $0x8] ss:$0 sps:$4 sm:$0xff]   ;;  %v358_v12 = vld [vmem:[%s215_s16 + $0x10] sm:$0xff]  ;;  %s221_s22 = scalar_lea.vmem %s590_s4, %s439_s12 }
   0xf   : > { %480 = vmatprep.mubr.bf16.mxu0 %v500_v4  ;;  %v441_v10 = vld [vmem:[%s588_s2] ss:$0 sm:$0xff]  ;;  %v357_v21 = vld [vmem:[%s215_s16 + $0x8] sm:$0xff] }
  0x10   : > { %v356_v15 = vld [vmem:[%s215_s16] sm:$0xff] }
  0x11   : > { %467 = vmatpush3.bf16.msra.mxu0 %v493_v1 }
  0x12   : > { %468 = vmatprep.subr.bf16.mxu0 %v494_v2 }
  0x15   : > { %469 = vmatpush3.bf16.msra.mxu0 %v494_v2 }
  0x16   : > { %470 = vmatprep.subr.bf16.mxu0 %v495_v3 }
  0x19   : > { %471 = vmatpush3.bf16.msra.mxu0 %v495_v3 }
  0x1a   : > { %472 = vmatprep.subr.bf16.mxu0 %v496_v5 }
  0x1d   : > { %473 = vmatpush3.bf16.msra.mxu0 %v496_v5 }
  0x1e   : > { %474 = vmatprep.subr.bf16.mxu0 %v497_v6 }
  0x21   : > { %475 = vmatpush3.bf16.msra.mxu0 %v497_v6 }
  0x22   : > { %476 = vmatprep.subr.bf16.mxu0 %v498_v7 }
  0x25   : > { %477 = vmatpush3.bf16.msra.mxu0 %v498_v7 }
  0x26   : > { %478 = vmatprep.subr.bf16.mxu0 %v499_v8 }
  0x29   : > { %479 = vmatpush3.bf16.msra.mxu0 %v499_v8 }
  0x2c   : > { %481 = vmatmul.mubr.bf16.vlgmr.msra.gmra.mxu0 %v501_v9 }
  0xec   : > { %v482_v11 = vpop.f32.mrf.mxu0 }
  0xed   : > { %v351_v13 = vadd.f32 %v482_v11, %v441_v10 }
  0xee   : > { %v342_v14 = vpop.f32.mrf.mxu0 }
  0xef   : > { %v361_v16 = vadd.f32 %v358_v12, %v351_v13  ;;  %v343_v17 = vadd.f32 %v441_v10, %v342_v14 }
  0xf0   : > { %v483_v18 = vpop.f32.mrf.mxu0 }
  0xf1   : > { %364 = vst [vmem:[%s221_s22 + $0x10] sm:$0xff] %v361_v16  ;;  %v359_v19 = vadd.f32 %v356_v15, %v343_v17 }
  0xf2   : > { %v345_v20 = vpop.f32.mrf.mxu0 }
  0xf3   : > { %362 = vst [vmem:[%s221_s22] sm:$0xff] %v359_v19  ;;  %v346_v22 = vadd.f32 %v441_v10, %v345_v20 }
  0xf5   : > { %v360_v23 = vadd.f32 %v357_v21, %v346_v22 }
  0xf7   : > { %363 = vst [vmem:[%s221_s22 + $0x8] sm:$0xff] %v360_v23 }
  0xf8 PF: > { %s14_s15 = sadd.s32 1, %s508_s15  }
  0xf9   : > { %p11_p4 = scmp.ge.s32.totalorder %s14_s15, 4  }
  0xfb   :  { %13 = sbr.rel (!%p11_p4) target bundleno = 1 (0x1), region = 69 }

// kernel: action_predictor_forward.19
= control target key start
LH: loop header
LB: loop body
LE: loop exit
PB: predicated region body
PF: predicated region fallthrough
CT: control target
= control target key end

     0   :  { %s992_s24 = smov 0   ;;  %s1146_s0 = inlined_call_operand.vmem [shape: f32[48,128], index: 0, kind: input, shape index: {}]   ;;  %s1147_s1 = inlined_call_operand.vmem [shape: f32[1,128], index: 1, kind: input, shape index: {}]   ;;  %s1148_s2 = inlined_call_operand.vmem [shape: f32[1,128], index: 2, kind: input, shape index: {}]   ;;  %s1149_s3 = inlined_call_operand.vmem [shape: bf16[128,256], index: 3, kind: input, shape index: {}]   ;;  %s1150_s4 = inlined_call_operand.vmem [shape: f32[1,256], index: 4, kind: input, shape index: {}]   ;;  %s1151_s5 = inlined_call_operand.vmem [shape: bf16[256,128], index: 5, kind: input, shape index: {}]   ;;  %s1152_s6 = inlined_call_operand.vmem [shape: f32[1,128], index: 6, kind: input, shape index: {}]   ;;  %s1153_s7 = inlined_call_operand.vmem [shape: f32[48,128], index: 7, kind: output, shape index: {}]  }
   0x1 LB: > { %s804_s25 = sadd.s32 4294967295, %s949_s24   ;;  %p808_p0 = scmp.ge.s32.totalorder %s949_s24, 1  ;;  %s949_s24 = sphi %s992_s24, %s17_s24  }
   0x2   : > { %p238_p1 = scmp.lt.s32.totalorder %s949_s24, 3 }
   0x4   : > { %p239_p2 = pnand %p808_p0, %p238_p1 }
   0x5   : > { %s270_s26 = smul.u32 (!%p239_p2), 3, %s804_s25 }
   0x6   : > { %242 = sbr.rel (%p239_p2) target bundleno = 772 (0x304), region = 48 }
   0x7   : > { %p271_p3 = scmp.lt.s32.totalorder (!%p239_p2), %s270_s26, 5 }
   0xb   : > { %s1155_s26 = smov (!%p271_p3, %s270_s26), 5  ;;  %v885_v3 = vld [vmem:[%s1149_s3 + $0x74] ss:$8 sps:$4 sm:$0xff]   ;;  %v887_v4 = vld [vmem:[%s1149_s3 + $0x70] ss:$8 sps:$4 sm:$0xff]   ;;  %v951_v26 = vmov 0  }
   0xc   : > { %s809_s27 = sshll.u32 %s1155_s26, 3  ;;  %450 = vmatprep.subr.bf16.mxu0 %v885_v3  ;;  %v888_v17 = vld [vmem:[%s1149_s3 + $0x64] ss:$8 sps:$4 sm:$0xff]   ;;  %v890_v18 = vld [vmem:[%s1149_s3 + $0x60] ss:$8 sps:$4 sm:$0xff]   ;;  %482 = vmatprep.mubr.bf16.mxu0 %v951_v26  ;;  %v909_v57 = vld [vmem:[%s1151_s5 + $0x78] sm:$0xff]  }
   0xd   : > { %s274_s30 = scalar_lea.vmem %s1146_s0, %s809_s27  ;;  %451 = vmatpush1.bf16.msra.mxu0 %v887_v4  ;;  %v891_v19 = vld [vmem:[%s1149_s3 + $0x54] ss:$8 sps:$4 sm:$0xff]   ;;  %v893_v20 = vld [vmem:[%s1149_s3 + $0x50] ss:$8 sps:$4 sm:$0xff]   ;;  %v894_v21 = vld [vmem:[%s1149_s3 + $0x44] ss:$8 sps:$4 sm:$0xff]   ;;  %848 = vmatprep.subr.bf16.mxu1 %v909_v57  ;;  %s280_s22 = scalar_lea.vmem %s1153_s7, %s809_s27 }
   0xe   : > { %v1008_v0 = vld [vmem:[%s274_s30] sm:$0xff]  ;;  %v1010_v1 = vld [vmem:[%s274_s30 + $0x10] sm:$0xff]  ;;  %v1012_v2 = vld [vmem:[%s274_s30 + $0x8] sm:$0xff]  ;;  %452 = vmatprep.subr.bf16.mxu0 %v888_v17 }
   0xf   : > { %288 = vadd.xlane.f32.xlu0 %v1008_v0  ;;  %292 = vadd.xlane.f32.xlu1 %v1010_v1  ;;  %v896_v22 = vld [vmem:[%s1149_s3 + $0x40] ss:$8 sps:$4 sm:$0xff]   ;;  %v897_v23 = vld [vmem:[%s1149_s3 + $0x34] ss:$8 sps:$4 sm:$0xff]   ;;  %v899_v24 = vld [vmem:[%s1149_s3 + $0x30] ss:$8 sps:$4 sm:$0xff]  }
  0x10   : > { %v900_v25 = vld [vmem:[%s1149_s3 + $0x24] ss:$8 sps:$4 sm:$0xff]   ;;  %v902_v27 = vld [vmem:[%s1149_s3 + $0x20] ss:$8 sps:$4 sm:$0xff]   ;;  %v903_v28 = vld [vmem:[%s1149_s3 + $0x14] ss:$8 sps:$4 sm:$0xff]  }
  0x11   : > { %453 = vmatpush1.bf16.msra.mxu0 %v890_v18  ;;  %v905_v29 = vld [vmem:[%s1149_s3 + $0x10] ss:$8 sps:$4 sm:$0xff]   ;;  %v906_v30 = vld [vmem:[%s1149_s3 + $0x4] ss:$8 sps:$4 sm:$0xff]   ;;  %v908_v31 = vld [vmem:[%s1149_s3] ss:$8 sps:$4 sm:$0xff]  }
  0x12   : > { %454 = vmatprep.subr.bf16.mxu0 %v891_v19  ;;  %v811_v43 = vld [vmem:[%s1147_s1] ss:$0 sm:$0xff]  ;;  %v910_v58 = vld [vmem:[%s1151_s5 + $0x38] sm:$0xff]   ;;  %v911_v59 = vld [vmem:[%s1151_s5 + $0x70] sm:$0xff]  }
  0x13   : > { %290 = vadd.xlane.f32.xlu0 %v1012_v2  ;;  %v812_v48 = vld [vmem:[%s1148_s2] ss:$0 sm:$0xff]  ;;  %849 = vmatpush3.bf16.msra.mxu1 %v910_v58  ;;  %v912_v60 = vld [vmem:[%s1151_s5 + $0x30] sm:$0xff]   ;;  %v913_v61 = vld [vmem:[%s1151_s5 + $0x68] sm:$0xff]  }
  0x14   : > { %850 = vmatprep.subr.bf16.mxu1 %v911_v59  ;;  %v914_v62 = vld [vmem:[%s1151_s5 + $0x28] sm:$0xff]   ;;  %v915_v63 = vld [vmem:[%s1151_s5 + $0x60] sm:$0xff]   ;;  %v917_v4 = vld [vmem:[%s1151_s5 + $0x58] sm:$0xff]  }
  0x15   : > { %455 = vmatpush1.bf16.msra.mxu0 %v893_v20  ;;  %v916_v3 = vld [vmem:[%s1151_s5 + $0x20] sm:$0xff]  }
  0x16   : > { %456 = vmatprep.subr.bf16.mxu0 %v894_v21 }
  0x17   : > { %851 = vmatpush3.bf16.msra.mxu1 %v912_v60 }
  0x18   : > { %852 = vmatprep.subr.bf16.mxu1 %v913_v61 }
  0x19   : > { %457 = vmatpush1.bf16.msra.mxu0 %v896_v22 }
  0x1a   : > { %458 = vmatprep.subr.bf16.mxu0 %v897_v23 }
  0x1b   : > { %853 = vmatpush3.bf16.msra.mxu1 %v914_v62 }
  0x1c   : > { %854 = vmatprep.subr.bf16.mxu1 %v915_v63 }
  0x1d   : > { %459 = vmatpush1.bf16.msra.mxu0 %v899_v24 }
  0x1e   : > { %460 = vmatprep.subr.bf16.mxu0 %v900_v25 }
  0x1f   : > { %855 = vmatpush3.bf16.msra.mxu1 %v916_v3 }
  0x20   : > { %856 = vmatprep.subr.bf16.mxu1 %v917_v4 }
  0x21   : > { %461 = vmatpush1.bf16.msra.mxu0 %v902_v27 }
  0x22   : > { %462 = vmatprep.subr.bf16.mxu0 %v903_v28 }
  0x25   : > { %463 = vmatpush1.bf16.msra.mxu0 %v905_v29 }
  0x26   : > { %464 = vmatprep.subr.bf16.mxu0 %v906_v30 }
  0x29   : > { %465 = vmatpush1.bf16.msra.mxu0 %v908_v31 }
  0x98   : > { %v289_v5 = vpop.xlane.xlu0 %288  ;;  %v293_v6 = vpop.xlane.xlu1 %292 }
  0x99   : > { %v295_v7 = vmul.f32 0.0078125, %v289_v5  ;;  %v297_v8 = vmul.f32 0.0078125, %v293_v6  ;;  %v918_v5 = vld [vmem:[%s1151_s5 + $0x18] sm:$0xff]   ;;  %v919_v6 = vld [vmem:[%s1151_s5 + $0x50] sm:$0xff]  }
  0x9a   : > { %857 = vmatpush3.bf16.msra.mxu1 %v918_v5 }
  0x9b   : > { %v298_v9 = vsub.f32 %v1008_v0, %v295_v7  ;;  %v300_v10 = vsub.f32 %v1010_v1, %v297_v8  ;;  %v920_v7 = vld [vmem:[%s1151_s5 + $0x10] sm:$0xff]   ;;  %858 = vmatprep.subr.bf16.mxu1 %v919_v6  ;;  %v921_v8 = vld [vmem:[%s1151_s5 + $0x48] sm:$0xff]  }
  0x9c   : > { %v291_v11 = vpop.xlane.xlu0 %290 }
  0x9d   : > { %v296_v12 = vmul.f32 0.0078125, %v291_v11  ;;  %v301_v13 = vmul.f32 %v298_v9, %v298_v9  ;;  %v303_v15 = vmul.f32 %v300_v10, %v300_v10  ;;  %v924_v11 = vld [vmem:[%s1151_s5] sm:$0xff]  }
  0x9e   : > { %859 = vmatpush3.bf16.msra.mxu1 %v920_v7 }
  0x9f   : > { %v299_v14 = vsub.f32 %v1012_v2, %v296_v12  ;;  %304 = vadd.xlane.f32.xlu1 %v301_v13  ;;  %860 = vmatprep.subr.bf16.mxu1 %v921_v8  ;;  %v360_v12 = vlaneseq }
  0xa1   : > { %v302_v16 = vmul.f32 %v299_v14, %v299_v14  ;;  %v361_v13 = vshrl.u32 %v360_v12, 7 }
  0xa3   : > { %308 = vadd.xlane.f32.xlu1 %v303_v15  ;;  %306 = vadd.xlane.f32.xlu0 %v302_v16  ;;  %v358_v15 = vld [vmem:[%s1150_s4] sm:$0x3]  ;;  %v366_v16 = vsub.s32 1, %v361_v13 }
  0xa5   : > { %v367_v18 = vrot.slane %v358_v15, %v366_v16 }
 0x128   : > { %v305_v32 = vpop.xlane.xlu1 %304 }
 0x129   : > { %v310_v33 = vmul.f32 0.0078125, %v305_v32 }
 0x12b   : > { %v313_v34 = vadd.f32 1e-12, %v310_v33 }
 0x12c   : > { %v309_v35 = vpop.xlane.xlu1 %308  ;;  %v307_v36 = vpop.xlane.xlu0 %306 }
 0x12d   : > { %925 = vrsqrt.f32 %v313_v34  ;;  %v312_v37 = vmul.f32 0.0078125, %v309_v35  ;;  %v311_v38 = vmul.f32 0.0078125, %v307_v36 }
 0x12f   : > { %v315_v39 = vadd.f32 1e-12, %v312_v37  ;;  %v314_v40 = vadd.f32 1e-12, %v311_v38 }
 0x131   : > { %927 = vrsqrt.f32 %v315_v39 }
 0x132   : > { %929 = vrsqrt.f32 %v314_v40 }
 0x13a   : > { %v926_v41 = vpop.eup %925 }
 0x13b   : > { %v319_v42 = vmul.f32 %v926_v41, %v298_v9  ;;  %v922_v9 = vld [vmem:[%s1151_s5 + $0x8] sm:$0xff]  }
 0x13c   : > { %861 = vmatpush3.bf16.msra.mxu1 %v922_v9 }
 0x13d   : > { %v328_v47 = vmul.f32 %v811_v43, %v319_v42 }
 0x13e   : > { %v928_v44 = vpop.eup %927 }
 0x13f   : > { %v930_v45 = vpop.eup %929  ;;  %v321_v50 = vmul.f32 %v928_v44, %v300_v10  ;;  %v337_v51 = vadd.f32 %v812_v48, %v328_v47  ;;  %v923_v10 = vld [vmem:[%s1151_s5 + $0x40] sm:$0xff]  }
 0x140   : > { %v320_v46 = vmul.f32 %v930_v45, %v299_v14  ;;  %862 = vmatprep.subr.bf16.mxu1 %v923_v10  ;;  %v362_v14 = vsub.s32 0, %v361_v13 }
 0x141   : > { %v330_v54 = vmul.f32 %v811_v43, %v321_v50  ;;  %863 = vmatpush3.bf16.msra.mxu1 %v924_v11 }
 0x142   : > { %v329_v49 = vmul.f32 %v811_v43, %v320_v46  ;;  %v363_v17 = vrot.slane %v358_v15, %v362_v14 }
 0x143   : > { %v339_v55 = vadd.f32 %v812_v48, %v330_v54 }
 0x144   : > { %v338_v52 = vadd.f32 %v812_v48, %v329_v49 }
 0x145   : > { %v341_v56 = vpack.c.bf16 %v339_v55, %v339_v55 }
 0x146   : > { %v340_v53 = vpack.c.bf16 %v338_v52, %v337_v51 }
 0x148   : > { %483 = vmatmul.mubr.bf16.vlgmr.msra.gmra.mxu0 %v340_v53 }
 0x149   : > { %492 = vmatprep.mubr.bf16.mxu0 %v951_v26 }
 0x150   : > { %493 = vmatmul.mubr.bf16.gmra.mxu0 %v341_v56 }
 0x208   : > { %v484_v19 = vpop.f32.mrf.mxu0 }
 0x209   : > { %v1125_v20 = vadd.f32 %v484_v19, %v363_v17 }
 0x20a   : > { %v486_v21 = vpop.f32.mrf.mxu0 }
 0x20b   : > { %v501_v22 = vmul.f32 %v1125_v20, %v1125_v20  ;;  %v487_v23 = vadd.f32 %v486_v21, %v367_v18 }
 0x20c   : > { %v488_v24 = vpop.f32.mrf.mxu0 }
 0x20d   : > { %v507_v25 = vmul.f32 %v501_v22, %v1125_v20  ;;  %v502_v26 = vmul.f32 %v487_v23, %v487_v23  ;;  %v489_v27 = vadd.f32 %v488_v24, %v363_v17 }
 0x20e   : > { %v490_v28 = vpop.f32.mrf.mxu0 }
 0x20f   : > { %v513_v29 = vmul.f32 0.044715, %v507_v25  ;;  %v508_v30 = vmul.f32 %v502_v26, %v487_v23  ;;  %v503_v31 = vmul.f32 %v489_v27, %v489_v27  ;;  %v491_v32 = vadd.f32 %v490_v28, %v367_v18 }
 0x210   : > { %v494_v33 = vpop.f32.mrf.mxu0 }
 0x211   : > { %v519_v34 = vadd.f32 %v513_v29, %v1125_v20  ;;  %v514_v35 = vmul.f32 0.044715, %v508_v30  ;;  %v509_v36 = vmul.f32 %v503_v31, %v489_v27  ;;  %v504_v37 = vmul.f32 %v491_v32, %v491_v32 }
 0x212   : > { %v495_v38 = vadd.f32 %v494_v33, %v363_v17  ;;  %v496_v39 = vpop.f32.mrf.mxu0 }
 0x213   : > { %v525_v40 = vmul.f32 0.7978846, %v519_v34  ;;  %v520_v41 = vadd.f32 %v514_v35, %v487_v23  ;;  %v515_v42 = vmul.f32 0.044715, %v509_v36  ;;  %v510_v43 = vmul.f32 %v504_v37, %v491_v32 }
 0x214   : > { %v505_v44 = vmul.f32 %v495_v38, %v495_v38  ;;  %v497_v45 = vadd.f32 %v496_v39, %v367_v18  ;;  %v498_v46 = vpop.f32.mrf.mxu0 }
 0x215   : > { %v521_v47 = vadd.f32 %v515_v42, %v489_v27  ;;  %v516_v48 = vmul.f32 0.044715, %v510_v43  ;;  %v526_v49 = vmul.f32 0.7978846, %v520_v41  ;;  %931 = vtanh.f32 %v525_v40 }
 0x216   : > { %v511_v50 = vmul.f32 %v505_v44, %v495_v38  ;;  %v506_v51 = vmul.f32 %v497_v45, %v497_v45  ;;  %v499_v52 = vpop.f32.mrf.mxu0 }
 0x217   : > { %v527_v53 = vmul.f32 0.7978846, %v521_v47  ;;  %v522_v54 = vadd.f32 %v516_v48, %v491_v32  ;;  %933 = vtanh.f32 %v526_v49 }
 0x218   : > { %v517_v55 = vmul.f32 0.044715, %v511_v50  ;;  %v512_v56 = vmul.f32 %v506_v51, %v497_v45 }
 0x219   : > { %935 = vtanh.f32 %v527_v53  ;;  %v528_v57 = vmul.f32 0.7978846, %v522_v54 }
 0x21a   : > { %v523_v58 = vadd.f32 %v517_v55, %v495_v38  ;;  %v518_v59 = vmul.f32 0.044715, %v512_v56 }
 0x21b   : > { %937 = vtanh.f32 %v528_v57 }
 0x21c   : > { %v529_v60 = vmul.f32 0.7978846, %v523_v58  ;;  %v524_v61 = vadd.f32 %v518_v59, %v497_v45 }
 0x21e   : > { %939 = vtanh.f32 %v529_v60  ;;  %v530_v62 = vmul.f32 0.7978846, %v524_v61 }
 0x220   : > { %941 = vtanh.f32 %v530_v62 }
 0x222   : > { %v932_v63 = vpop.eup %931 }
 0x223   : > { %v537_v6 = vadd.f32 1.0, %v932_v63 }
 0x224   : > { %v934_v3 = vpop.eup %933 }
 0x225   : > { %v538_v4 = vadd.f32 1.0, %v934_v3  ;;  %v543_v12 = vmul.f32 0.5, %v537_v6 }
 0x226   : > { %v936_v5 = vpop.eup %935 }
 0x227   : > { %v539_v7 = vadd.f32 1.0, %v936_v5  ;;  %v544_v10 = vmul.f32 0.5, %v538_v4  ;;  %v549_v21 = vmul.f32 %v543_v12, %v1125_v20 }
 0x228   : > { %v938_v8 = vpop.eup %937 }
 0x229   : > { %v540_v9 = vadd.f32 1.0, %v938_v8  ;;  %v545_v11 = vmul.f32 0.5, %v539_v7  ;;  %v550_v18 = vmul.f32 %v544_v10, %v487_v23  ;;  %v829_v23 = vld [vmem:[%s1152_s6] ss:$0 sm:$0xff] }
 0x22b   : > { %v940_v13 = vpop.eup %939  ;;  %v546_v14 = vmul.f32 0.5, %v540_v9  ;;  %v551_v15 = vmul.f32 %v545_v11, %v489_v27 }
 0x22c   : > { %v541_v16 = vadd.f32 1.0, %v940_v13 }
 0x22d   : > { %v942_v17 = vpop.eup %941  ;;  %v552_v19 = vmul.f32 %v546_v14, %v491_v32  ;;  %v555_v25 = vpack.c.bf16 %v551_v15, %v549_v21 }
 0x22e   : > { %v542_v22 = vadd.f32 1.0, %v942_v17  ;;  %v547_v28 = vmul.f32 0.5, %v541_v16 }
 0x22f   : > { %v556_v24 = vpack.c.bf16 %v552_v19, %v550_v18 }
 0x230   : > { %v548_v26 = vmul.f32 0.5, %v542_v22  ;;  %v553_v31 = vmul.f32 %v547_v28, %v495_v38 }
 0x231   : > { %726 = vmatprep.mubr.bf16.mxu1 %v556_v24 }
 0x232   : > { %727 = vmatmul.mubr.bf16.vlgmr.msra.gmra.mxu1 %v555_v25  ;;  %v554_v29 = vmul.f32 %v548_v26, %v497_v45  ;;  %v557_v33 = vpack.c.bf16 %v553_v31, %v553_v31 }
 0x234   : > { %v558_v30 = vpack.c.bf16 %v554_v29, %v554_v29 }
 0x236   : > { %734 = vmatprep.mubr.bf16.mxu1 %v558_v30 }
 0x23a   : > { %735 = vmatmul.mubr.bf16.gmra.mxu1 %v557_v33 }
 0x2f2   : > { %v864_v27 = vpop.f32.mrf.mxu1 }
 0x2f4   : > { %v865_v20 = vpop.f32.mrf.mxu1 }
 0x2f5   : > { %v866_v32 = vadd.f32 %v865_v20, %v864_v27 }
 0x2f6   : > { %v867_v34 = vpop.f32.mrf.mxu1 }
 0x2f7   : > { %v729_v35 = vadd.f32 %v866_v32, %v829_v23 }
 0x2f8   : > { %v868_v36 = vpop.f32.mrf.mxu1 }
 0x2f9   : > { %v742_v37 = vadd.f32 %v729_v35, %v1008_v0  ;;  %v869_v38 = vadd.f32 %v868_v36, %v867_v34 }
 0x2fa   : > { %v870_v39 = vpop.f32.mrf.mxu1 }
 0x2fb   : > { %745 = vst [vmem:[%s280_s22] sm:$0xff] %v742_v37  ;;  %v732_v40 = vadd.f32 %v869_v38, %v829_v23 }
 0x2fc   : > { %v871_v41 = vpop.f32.mrf.mxu1 }
 0x2fd   : > { %v743_v42 = vadd.f32 %v732_v40, %v1012_v2  ;;  %v872_v43 = vadd.f32 %v871_v41, %v870_v39 }
 0x2fe   : > { %v873_v44 = vpop.f32.mrf.mxu1 }
 0x2ff   : > { %746 = vst [vmem:[%s280_s22 + $0x8] sm:$0xff] %v743_v42  ;;  %v737_v45 = vadd.f32 %v872_v43, %v829_v23 }
 0x300   : > { %v874_v46 = vpop.f32.mrf.mxu1 }
 0x301   : > { %v744_v47 = vadd.f32 %v737_v45, %v1010_v1 }
 0x303   : > { %747 = vst [vmem:[%s280_s22 + $0x10] sm:$0xff] %v744_v47 }
 0x304 PF: > { %s17_s24 = sadd.s32 1, %s949_s24  }
 0x305   : > { %p14_p4 = scmp.ge.s32.totalorder %s17_s24, 4  }
 0x307   :  { %16 = sbr.rel (!%p14_p4) target bundleno = 1 (0x1), region = 78 }

// kernel: action_predictor_forward.17
= control target key start
LH: loop header
LB: loop body
LE: loop exit
PB: predicated region body
PF: predicated region fallthrough
CT: control target
= control target key end

     0   :  { %s1346_s6 = smov 0   ;;  %s1524_s0 = inlined_call_operand.vmem [shape: bf16[8,5,384], index: 0, kind: input, shape index: {}]   ;;  %s1525_s1 = inlined_call_operand.vmem [shape: bf16[8,5,128], index: 1, kind: output, shape index: {}]  }
   0x1 LB: > { %s1108_s7 = sadd.s32 4294967295, %s1324_s6   ;;  %p1112_p0 = scmp.ge.s32.totalorder %s1324_s6, 1  ;;  %s1324_s6 = sphi %s1346_s6, %s11_s6  }
   0x2   : > { %p87_p1 = scmp.lt.s32.totalorder %s1324_s6, 9 }
   0x4   : > { %p88_p2 = pnand %p1112_p0, %p87_p1 }
   0x5   : > { %p106_p3 = scmp.lt.s32.totalorder (!%p88_p2), %s1108_s7, 7  ;;  %s1328_s12 = smov (!%p88_p2), 112  }
   0x6   : > { %91 = sbr.rel (%p88_p2) target bundleno = 1446 (0x5a6), region = 24  ;;  %s1329_s13 = smov (!%p88_p2), 96  }
   0x7   : > { %s1330_s14 = smov (!%p88_p2), 80   ;;  %s1331_s15 = smov (!%p88_p2), 64  }
   0x8   : > { %s1332_s16 = smov (!%p88_p2), 48   ;;  %s1333_s17 = smov (!%p88_p2), 32  }
   0x9   : > { %s1334_s18 = smov (!%p88_p2), 16  }
   0xb   : > { %v1326_v0 = vmov 0.0   ;;  %vm1327_vm0 = vmmov 0   ;;  %s1527_s7 = smov (!%p106_p3, %s1108_s7), 7  ;;  %vm121_vm1 = vcmask 130048   ;;  %vm168_vm2 = vcmask 36864  }
   0xc   : > { %1168 = vmatprep.subr.bf16.mxu0 %v1326_v0  ;;  %1170 = vmatprep.mubr.msk.bf16.mxu0 %vm1327_vm0, %v1326_v0  ;;  %s1264_s8 = smul.u32 12, %s1527_s7  ;;  %vm185_vm3 = vcmask 1041408   ;;  %vm186_vm4 = vcmask 1042432   ;;  %v1335_v16 = vmov 65535   ;;  %vm181_vm5 = vcmask 39936   ;;  %s1114_s19 = sshll.u32 %s1527_s7, 2 }
   0xd   : > { %1174 = vmatprep.subr.bf16.mxu1 %v1326_v0  ;;  %1176 = vmatprep.mubr.msk.bf16.mxu1 %vm1327_vm0, %v1326_v0  ;;  %v187_v17 = vsel %vm185_vm3, 4294967295, %v1335_v16  ;;  %vm1036_vm6 = vcmask 261120   ;;  %vm1038_vm7 = vcmask 392192   ;;  %vm1040_vm8 = vcmask 523264   ;;  %s114_s22 = scalar_lea.vmem %s1525_s1, %s1114_s19 }
   0xe   : > { %s1366_s11 = scalar_lea.vmem %s1524_s0, %s1264_s8  ;;  %v1390_v18 = vsel %vm186_vm4, %v187_v17, 0  ;;  %vm1042_vm9 = vcmask 654336   ;;  %vm1044_vm10 = vcmask 785408   ;;  %vm1046_vm11 = vcmask 916480  }
   0xf   : > { %v116_v1 = vld [vmem:[%s1366_s11] sm:$0x77]  ;;  %v1387_v15 = vld [vmem:[%s1366_s11 + $0x8] sm:$0x7]  ;;  %vm1050_vm12 = vsmask.f32 2304 }
  0x10   : > { %v1115_v2 = vcombine.high %v116_v1, %v116_v1  ;;  %v1118_v9 = vcombine.low %v116_v1, %v116_v1  ;;  %v190_v19 = vand.u32 %v1390_v18, %v1387_v15  ;;  %vm1051_vm13 = vmand %vm186_vm4, %vm1050_vm12 }
  0x12   : > { %v126_v3 = vsel %vm121_vm1, %v1115_v2, 0  ;;  %236 = vrot.lane.b32.xlu1 %v1115_v2, %s1328_s12  ;;  %1175 = vmatpush3.bf16.msra.mxu1 %v190_v19 }
  0x13   : > { %1169 = vmatpush3.bf16.xpose.msra.mxu0 %v126_v3  ;;  %1180 = vmatprep.subr.bf16.mxu1 %v1326_v0 }
  0x14   : > { %1186 = vmatprep.subr.bf16.mxu0 %v1326_v0 }
  0x16   : > { %234 = vrot.lane.b32.xlu1 %v1118_v9, %s1328_s12 }
  0x1a   : > { %1171 = vmatmul.mubr.msk.bf16.vlgmr.msra.gmra.mxu0 %vm121_vm1, %v116_v1  ;;  %347 = vrot.lane.b32.xlu1 %v1118_v9, %s1329_s13 }
  0x1b   : > { %1188 = vmatprep.mubr.msk.bf16.mxu0 %vm1327_vm0, %v1326_v0 }
  0x1e   : > { %459 = vrot.lane.b32.xlu1 %v1115_v2, %s1330_s14 }
  0x22   : > { %457 = vrot.lane.b32.xlu1 %v1118_v9, %s1330_s14 }
  0x26   : > { %569 = vrot.lane.b32.xlu1 %v1115_v2, %s1331_s15 }
  0x2a   : > { %567 = vrot.lane.b32.xlu1 %v1118_v9, %s1331_s15 }
  0x2e   : > { %679 = vrot.lane.b32.xlu1 %v1115_v2, %s1332_s16 }
  0x32   : > { %789 = vrot.lane.b32.xlu1 %v1115_v2, %s1333_s17 }
  0x36   : > { %899 = vrot.lane.b32.xlu1 %v1115_v2, %s1334_s18 }
  0x84   : > { %v237_v21 = vpop.permute.xlu1 %236 }
  0x85   : > { %v242_v26 = vsel %vm121_vm1, %v237_v21, 0 }
  0x88   : > { %v235_v22 = vpop.permute.xlu1 %234 }
  0x8c   : > { %v348_v25 = vpop.permute.xlu1 %347 }
  0x90   : > { %v460_v29 = vpop.permute.xlu1 %459 }
  0x91   : > { %v465_v32 = vsel %vm121_vm1, %v460_v29, 0 }
  0x94   : > { %v458_v31 = vpop.permute.xlu1 %457 }
  0x98   : > { %v570_v33 = vpop.permute.xlu1 %569 }
  0x99   : > { %v575_v35 = vsel %vm121_vm1, %v570_v33, 0 }
  0x9c   : > { %v568_v34 = vpop.permute.xlu1 %567 }
  0xa0   : > { %v680_v36 = vpop.permute.xlu1 %679 }
  0xa1   : > { %v685_v37 = vsel %vm121_vm1, %v680_v36, 0 }
  0xa4   : > { %v790_v38 = vpop.permute.xlu1 %789 }
  0xa5   : > { %v795_v40 = vsel %vm121_vm1, %v790_v38, 0 }
  0xa8   : > { %v900_v41 = vpop.permute.xlu1 %899 }
  0xa9   : > { %v905_v43 = vsel %vm121_vm1, %v900_v41, 0 }
  0xda   : > { %v162_v4 = vpop.f32.mrf.mxu0 }
  0xdb   : > { %v169_v5 = vsel %vm168_vm2, %v162_v4, -inf }
  0xdc   : > { %170 = vmax.xlane.f32.xlu0 %v169_v5  ;;  %v1172_v6 = vpop.f32.mrf.mxu0 }
  0xde   : > { %v165_v7 = vpop.f32.mrf.mxu0 }
  0xe0   : > { %v1173_v8 = vpop.f32.mrf.mxu0 }
 0x165   : > { %v171_v10 = vpop.xlane.xlu0 %170 }
 0x166   : > { %v172_v11 = vsub.f32 %v162_v4, %v171_v10 }
 0x168   : > { %v173_v12 = vmul.f32 1.442695, %v172_v11 }
 0x16a   : > { %1286 = vpow2.f32 %v173_v12 }
 0x177   : > { %v1287_v13 = vpop.eup %1286 }
 0x178   : > { %v175_v14 = vsel %vm168_vm2, %v1287_v13, 0.0 }
 0x179   : > { %176 = vadd.xlane.f32.xlu0 %v175_v14 }
 0x18f   : > { %349 = vrot.lane.b32.xlu0 %v1115_v2, %s1329_s13 }
 0x193   : > { %677 = vrot.lane.b32.xlu0 %v1118_v9, %s1332_s16 }
 0x197   : > { %787 = vrot.lane.b32.xlu0 %v1118_v9, %s1333_s17 }
 0x19b   : > { %897 = vrot.lane.b32.xlu0 %v1118_v9, %s1334_s18 }
 0x202   : > { %v177_v20 = vpop.xlane.xlu0 %176 }
 0x203   : > { %1288 = vrcp.f32 %v177_v20 }
 0x206   : > { %v350_v28 = vpop.permute.xlu0 %349 }
 0x207   : > { %v355_v30 = vsel %vm121_vm1, %v350_v28, 0 }
 0x20a   : > { %v678_v39 = vpop.permute.xlu0 %677 }
 0x20e   : > { %v788_v42 = vpop.permute.xlu0 %787 }
 0x210   : > { %v1289_v23 = vpop.eup %1288 }
 0x211   : > { %v179_v24 = vmul.f32 %v1289_v23, %v1287_v13  ;;  %v1120_v23 = vcombine.low %v1387_v15, %v1387_v15 }
 0x212   : > { %v898_v44 = vpop.permute.xlu0 %897 }
 0x213   : > { %v180_v27 = vpack.c.bf16 %v179_v24, %v179_v24 }
 0x215   : > { %1177 = vmatmul.mubr.msk.bf16.vlgmr.msra.gmra.mxu1 %vm181_vm5, %v180_v27 }
 0x216   : > { %1181 = vmatpush3.bf16.xpose.msra.mxu1 %v242_v26  ;;  %1182 = vmatprep.mubr.msk.bf16.mxu1 %vm1327_vm0, %v1326_v0 }
 0x217   : > { %1192 = vmatprep.subr.bf16.mxu1 %v1326_v0 }
 0x21d   : > { %1183 = vmatmul.mubr.msk.bf16.vlgmr.msra.gmra.mxu1 %vm121_vm1, %v235_v22 }
 0x21e   : > { %1193 = vmatpush3.bf16.xpose.msra.mxu1 %v355_v30  ;;  %1194 = vmatprep.mubr.msk.bf16.mxu1 %vm1327_vm0, %v1326_v0 }
 0x21f   : > { %1204 = vmatprep.subr.bf16.mxu1 %v1326_v0 }
 0x225   : > { %1195 = vmatmul.mubr.msk.bf16.vlgmr.msra.gmra.mxu1 %vm121_vm1, %v348_v25 }
 0x226   : > { %1205 = vmatpush3.bf16.xpose.msra.mxu1 %v465_v32  ;;  %1206 = vmatprep.mubr.msk.bf16.mxu1 %vm1327_vm0, %v1326_v0 }
 0x227   : > { %1216 = vmatprep.subr.bf16.mxu1 %v1326_v0 }
 0x22d   : > { %1207 = vmatmul.mubr.msk.bf16.vlgmr.msra.gmra.mxu1 %vm121_vm1, %v458_v31 }
 0x22e   : > { %1217 = vmatpush3.bf16.xpose.msra.mxu1 %v575_v35  ;;  %1218 = vmatprep.mubr.msk.bf16.mxu1 %vm1327_vm0, %v1326_v0 }
 0x22f   : > { %1228 = vmatprep.subr.bf16.mxu1 %v1326_v0 }
 0x235   : > { %1219 = vmatmul.mubr.msk.bf16.vlgmr.msra.gmra.mxu1 %vm121_vm1, %v568_v34 }
 0x236   : > { %1229 = vmatpush3.bf16.xpose.msra.mxu1 %v685_v37  ;;  %1230 = vmatprep.mubr.msk.bf16.mxu1 %vm1327_vm0, %v1326_v0 }
 0x237   : > { %1240 = vmatprep.subr.bf16.mxu1 %v1326_v0 }
 0x23d   : > { %1231 = vmatmul.mubr.msk.bf16.vlgmr.msra.gmra.mxu1 %vm121_vm1, %v678_v39 }
 0x23e   : > { %1241 = vmatpush3.bf16.xpose.msra.mxu1 %v795_v40  ;;  %1242 = vmatprep.mubr.msk.bf16.mxu1 %vm1327_vm0, %v1326_v0 }
 0x23f   : > { %1252 = vmatprep.subr.bf16.mxu1 %v1326_v0 }
 0x245   : > { %1243 = vmatmul.mubr.msk.bf16.vlgmr.msra.gmra.mxu1 %vm121_vm1, %v788_v42 }
 0x246   : > { %1253 = vmatpush3.bf16.xpose.msra.mxu1 %v905_v43  ;;  %1254 = vmatprep.mubr.msk.bf16.mxu1 %vm1327_vm0, %v1326_v0 }
 0x24d   : > { %1255 = vmatmul.mubr.msk.bf16.vlgmr.msra.gmra.mxu1 %vm121_vm1, %v898_v44 }
 0x2d5   : > { %v1434_v45 = vpop.f32.mrf.mxu1 }
 0x2d7   : > { %v1178_v46 = vpop.f32.mrf.mxu1 }
 0x2d9   : > { %v229_v47 = vpop.f32.mrf.mxu1 }
 0x2db   : > { %v1179_v48 = vpop.f32.mrf.mxu1 }
 0x2dd   : > { %v278_v49 = vpop.f32.mrf.mxu1 }
 0x2de   : > { %v284_v50 = vsel %vm168_vm2, %v278_v49, -inf }
 0x2df   : > { %285 = vmax.xlane.f32.xlu1 %v284_v50  ;;  %v1184_v51 = vpop.f32.mrf.mxu1 }
 0x2e1   : > { %v281_v52 = vpop.f32.mrf.mxu1 }
 0x2e3   : > { %v1185_v53 = vpop.f32.mrf.mxu1 }
 0x2e5   : > { %v391_v54 = vpop.f32.mrf.mxu1 }
 0x2e6   : > { %v397_v55 = vsel %vm168_vm2, %v391_v54, -inf }
 0x2e7   : > { %398 = vmax.xlane.f32.xlu0 %v397_v55  ;;  %v1196_v56 = vpop.f32.mrf.mxu1 }
 0x2e9   : > { %v394_v57 = vpop.f32.mrf.mxu1 }
 0x2eb   : > { %v1197_v58 = vpop.f32.mrf.mxu1 }
 0x2ed   : > { %v501_v59 = vpop.f32.mrf.mxu1 }
 0x2ee   : > { %v507_v60 = vsel %vm168_vm2, %v501_v59, -inf }
 0x2ef   : > { %508 = vmax.xlane.f32.xlu0 %v507_v60  ;;  %v1208_v61 = vpop.f32.mrf.mxu1 }
 0x2f1   : > { %v504_v62 = vpop.f32.mrf.mxu1 }
 0x2f3   : > { %v1209_v63 = vpop.f32.mrf.mxu1 }
 0x2f5   : > { %v611_v1 = vpop.f32.mrf.mxu1 }
 0x2f6   : > { %v617_v2 = vsel %vm168_vm2, %v611_v1, -inf }
 0x2f7   : > { %618 = vmax.xlane.f32.xlu1 %v617_v2  ;;  %v1220_v3 = vpop.f32.mrf.mxu1 }
 0x2f9   : > { %v614_v4 = vpop.f32.mrf.mxu1 }
 0x2fb   : > { %v1221_v5 = vpop.f32.mrf.mxu1 }
 0x2fd   : > { %v721_v6 = vpop.f32.mrf.mxu1 }
 0x2fe   : > { %v727_v7 = vsel %vm168_vm2, %v721_v6, -inf }
 0x2ff   : > { %728 = vmax.xlane.f32.xlu0 %v727_v7  ;;  %v1232_v8 = vpop.f32.mrf.mxu1 }
 0x301   : > { %v724_v9 = vpop.f32.mrf.mxu1 }
 0x303   : > { %v1233_v10 = vpop.f32.mrf.mxu1 }
 0x305   : > { %v831_v11 = vpop.f32.mrf.mxu1 }
 0x306   : > { %v837_v12 = vsel %vm168_vm2, %v831_v11, -inf }
 0x307   : > { %838 = vmax.xlane.f32.xlu1 %v837_v12  ;;  %v1244_v13 = vpop.f32.mrf.mxu1 }
 0x309   : > { %v834_v14 = vpop.f32.mrf.mxu1 }
 0x30b   : > { %v1245_v16 = vpop.f32.mrf.mxu1 }
 0x30d   : > { %v941_v17 = vpop.f32.mrf.mxu1 }
 0x30e   : > { %v947_v19 = vsel %vm168_vm2, %v941_v17, -inf }
 0x30f   : > { %948 = vmax.xlane.f32.xlu0 %v947_v19  ;;  %v1256_v20 = vpop.f32.mrf.mxu1 }
 0x311   : > { %v944_v21 = vpop.f32.mrf.mxu1 }
 0x313   : > { %v1257_v22 = vpop.f32.mrf.mxu1 }
 0x318   : > { %299 = vrot.lane.b32.xlu1 %v1120_v23, %s1328_s12 }
 0x325   : > { %409 = vrot.lane.b32.xlu0 %v1120_v23, %s1329_s13 }
 0x368   : > { %v286_v24 = vpop.xlane.xlu1 %285 }
 0x369   : > { %v287_v25 = vsub.f32 %v278_v49, %v286_v24 }
 0x36b   : > { %v288_v26 = vmul.f32 1.442695, %v287_v25 }
 0x36d   : > { %1290 = vpow2.f32 %v288_v26 }
 0x370   : > { %v399_v27 = vpop.xlane.xlu0 %398 }
 0x371   : > { %v400_v28 = vsub.f32 %v391_v54, %v399_v27 }
 0x373   : > { %v401_v29 = vmul.f32 1.442695, %v400_v28 }
 0x375   : > { %1292 = vpow2.f32 %v401_v29 }
 0x378   : > { %v509_v30 = vpop.xlane.xlu0 %508 }
 0x379   : > { %v510_v31 = vsub.f32 %v501_v59, %v509_v30 }
 0x37a   : > { %v1291_v32 = vpop.eup %1290 }
 0x37b   : > { %v511_v33 = vmul.f32 1.442695, %v510_v31  ;;  %v290_v34 = vsel %vm168_vm2, %v1291_v32, 0.0 }
 0x37c   : > { %291 = vadd.xlane.f32.xlu1 %v290_v34 }
 0x37d   : > { %1294 = vpow2.f32 %v511_v33 }
 0x380   : > { %v619_v38 = vpop.xlane.xlu1 %618 }
 0x381   : > { %v620_v42 = vsub.f32 %v611_v1, %v619_v38 }
 0x382   : > { %v1293_v15 = vpop.eup %1292 }
 0x383   : > { %v403_v35 = vsel %vm168_vm2, %v1293_v15, 0.0  ;;  %v621_v44 = vmul.f32 1.442695, %v620_v42 }
 0x384   : > { %404 = vadd.xlane.f32.xlu0 %v403_v35 }
 0x385   : > { %1296 = vpow2.f32 %v621_v44 }
 0x388   : > { %v729_v43 = vpop.xlane.xlu0 %728 }
 0x389   : > { %v730_v46 = vsub.f32 %v721_v6, %v729_v43 }
 0x38a   : > { %v1449_v36 = vpop.eup %1294 }
 0x38b   : > { %v513_v37 = vsel %vm168_vm2, %v1449_v36, 0.0  ;;  %v731_v49 = vmul.f32 1.442695, %v730_v46 }
 0x38c   : > { %514 = vadd.xlane.f32.xlu1 %v513_v37 }
 0x38d   : > { %1298 = vpow2.f32 %v731_v49 }
 0x390   : > { %v839_v39 = vpop.xlane.xlu1 %838 }
 0x391   : > { %v840_v48 = vsub.f32 %v831_v11, %v839_v39 }
 0x392   : > { %v1297_v53 = vpop.eup %1296 }
 0x393   : > { %v841_v51 = vmul.f32 1.442695, %v840_v48  ;;  %v623_v54 = vsel %vm168_vm2, %v1297_v53, 0.0 }
 0x394   : > { %v300_v40 = vpop.permute.xlu1 %299 }
 0x395   : > { %v305_v41 = vand.u32 %v300_v40, %v1390_v18  ;;  %1300 = vpow2.f32 %v841_v51 }
 0x397   : > { %1187 = vmatpush3.bf16.msra.mxu0 %v305_v41 }
 0x398   : > { %1198 = vmatprep.subr.bf16.mxu0 %v1326_v0  ;;  %v949_v47 = vpop.xlane.xlu0 %948 }
 0x399   : > { %v950_v50 = vsub.f32 %v941_v17, %v949_v47 }
 0x39a   : > { %519 = vrot.lane.b32.xlu0 %v1120_v23, %s1330_s14  ;;  %v1458_v55 = vpop.eup %1298 }
 0x39b   : > { %v951_v52 = vmul.f32 1.442695, %v950_v50  ;;  %v733_v57 = vsel %vm168_vm2, %v1458_v55, 0.0 }
 0x39c   : > { %v410_v62 = vpop.permute.xlu0 %409 }
 0x39d   : > { %629 = vrot.lane.b32.xlu1 %v1120_v23, %s1331_s15  ;;  %1302 = vpow2.f32 %v951_v52  ;;  %v415_v5 = vand.u32 %v410_v62, %v1390_v18 }
 0x3a2   : > { %v1460_v56 = vpop.eup %1300 }
 0x3a3   : > { %v843_v59 = vsel %vm168_vm2, %v1460_v56, 0.0 }
 0x3aa   : > { %v1464_v58 = vpop.eup %1302 }
 0x3ab   : > { %v953_v60 = vsel %vm168_vm2, %v1464_v58, 0.0 }
 0x3b9   : > { %624 = vadd.xlane.f32.xlu0 %v623_v54 }
 0x3bd   : > { %734 = vadd.xlane.f32.xlu0 %v733_v57 }
 0x3c1   : > { %844 = vadd.xlane.f32.xlu1 %v843_v59  ;;  %954 = vadd.xlane.f32.xlu0 %v953_v60 }
 0x3d2   : > { %849 = vrot.lane.b32.xlu1 %v1120_v23, %s1333_s17 }
 0x3d6   : > { %959 = vrot.lane.b32.xlu1 %v1120_v23, %s1334_s18 }
 0x3d7   : > { %739 = vrot.lane.b32.xlu0 %v1120_v23, %s1332_s16 }
 0x405   : > { %v292_v61 = vpop.xlane.xlu1 %291 }
 0x406   : > { %1304 = vrcp.f32 %v292_v61 }
 0x40d   : > { %v405_v63 = vpop.xlane.xlu0 %404 }
 0x40e   : > { %1306 = vrcp.f32 %v405_v63 }
 0x411   : > { %v520_v7 = vpop.permute.xlu0 %519 }
 0x412   : > { %v525_v10 = vand.u32 %v520_v7, %v1390_v18 }
 0x413   : > { %v1305_v1 = vpop.eup %1304 }
 0x414   : > { %v294_v2 = vmul.f32 %v1305_v1, %v1291_v32 }
 0x415   : > { %v515_v3 = vpop.xlane.xlu1 %514 }
 0x416   : > { %1308 = vrcp.f32 %v515_v3  ;;  %v295_v4 = vpack.c.bf16 %v294_v2, %v294_v2 }
 0x418   : > { %1189 = vmatmul.mubr.msk.bf16.vlgmr.msra.gmra.mxu0 %vm181_vm5, %v295_v4 }
 0x419   : > { %1199 = vmatpush3.bf16.msra.mxu0 %v415_v5  ;;  %1200 = vmatprep.mubr.msk.bf16.mxu0 %vm1327_vm0, %v1326_v0  ;;  %v630_v12 = vpop.permute.xlu1 %629 }
 0x41a   : > { %1210 = vmatprep.subr.bf16.mxu0 %v1326_v0  ;;  %v635_v16 = vand.u32 %v630_v12, %v1390_v18 }
 0x41b   : > { %v1307_v6 = vpop.eup %1306 }
 0x41c   : > { %v407_v8 = vmul.f32 %v1307_v6, %v1293_v15 }
 0x41e   : > { %v408_v9 = vpack.c.bf16 %v407_v8, %v407_v8 }
 0x420   : > { %1201 = vmatmul.mubr.msk.bf16.vlgmr.msra.gmra.mxu0 %vm181_vm5, %v408_v9 }
 0x421   : > { %1211 = vmatpush3.bf16.msra.mxu0 %v525_v10  ;;  %1212 = vmatprep.mubr.msk.bf16.mxu0 %vm1327_vm0, %v1326_v0 }
 0x422   : > { %1222 = vmatprep.subr.bf16.mxu0 %v1326_v0 }
 0x423   : > { %v1309_v11 = vpop.eup %1308 }
 0x424   : > { %v517_v13 = vmul.f32 %v1309_v11, %v1449_v36 }
 0x426   : > { %v518_v14 = vpack.c.bf16 %v517_v13, %v517_v13 }
 0x428   : > { %1213 = vmatmul.mubr.msk.bf16.vlgmr.msra.gmra.mxu0 %vm181_vm5, %v518_v14 }
 0x429   : > { %1223 = vmatpush3.bf16.msra.mxu0 %v635_v16  ;;  %1224 = vmatprep.mubr.msk.bf16.mxu0 %vm1327_vm0, %v1326_v0 }
 0x42a   : > { %1234 = vmatprep.subr.bf16.mxu0 %v1326_v0 }
 0x442   : > { %v625_v17 = vpop.xlane.xlu0 %624 }
 0x443   : > { %1310 = vrcp.f32 %v625_v17 }
 0x446   : > { %v735_v19 = vpop.xlane.xlu0 %734 }
 0x447   : > { %1312 = vrcp.f32 %v735_v19 }
 0x44a   : > { %v955_v20 = vpop.xlane.xlu0 %954  ;;  %v845_v21 = vpop.xlane.xlu1 %844 }
 0x44b   : > { %1314 = vrcp.f32 %v845_v21 }
 0x44c   : > { %1316 = vrcp.f32 %v955_v20 }
 0x44e   : > { %v740_v22 = vpop.permute.xlu0 %739  ;;  %v850_v28 = vpop.permute.xlu1 %849 }
 0x44f   : > { %v745_v25 = vand.u32 %v740_v22, %v1390_v18  ;;  %v855_v30 = vand.u32 %v850_v28, %v1390_v18 }
 0x450   : > { %v1311_v23 = vpop.eup %1310 }
 0x451   : > { %v627_v24 = vmul.f32 %v1311_v23, %v1297_v53 }
 0x452   : > { %v960_v33 = vpop.permute.xlu1 %959 }
 0x453   : > { %v628_v26 = vpack.c.bf16 %v627_v24, %v627_v24  ;;  %v965_v15 = vand.u32 %v960_v33, %v1390_v18 }
 0x454   : > { %v1313_v27 = vpop.eup %1312 }
 0x455   : > { %1225 = vmatmul.mubr.msk.bf16.vlgmr.msra.gmra.mxu0 %vm181_vm5, %v628_v26  ;;  %v737_v29 = vmul.f32 %v1313_v27, %v1458_v55 }
 0x456   : > { %1235 = vmatpush3.bf16.msra.mxu0 %v745_v25  ;;  %1236 = vmatprep.mubr.msk.bf16.mxu0 %vm1327_vm0, %v1326_v0 }
 0x457   : > { %1246 = vmatprep.subr.bf16.mxu0 %v1326_v0  ;;  %v738_v31 = vpack.c.bf16 %v737_v29, %v737_v29 }
 0x458   : > { %v1315_v32 = vpop.eup %1314 }
 0x459   : > { %v847_v34 = vmul.f32 %v1315_v32, %v1460_v56  ;;  %v1317_v36 = vpop.eup %1316 }
 0x45a   : > { %v957_v37 = vmul.f32 %v1317_v36, %v1464_v58 }
 0x45b   : > { %v848_v35 = vpack.c.bf16 %v847_v34, %v847_v34 }
 0x45c   : > { %v958_v38 = vpack.c.bf16 %v957_v37, %v957_v37 }
 0x45d   : > { %1237 = vmatmul.mubr.msk.bf16.vlgmr.msra.gmra.mxu0 %vm181_vm5, %v738_v31 }
 0x45e   : > { %1247 = vmatpush3.bf16.msra.mxu0 %v855_v30  ;;  %1248 = vmatprep.mubr.msk.bf16.mxu0 %vm1327_vm0, %v1326_v0 }
 0x45f   : > { %1258 = vmatprep.subr.bf16.mxu0 %v1326_v0 }
 0x465   : > { %1249 = vmatmul.mubr.msk.bf16.vlgmr.msra.gmra.mxu0 %vm181_vm5, %v848_v35 }
 0x466   : > { %1259 = vmatpush3.bf16.msra.mxu0 %v965_v15  ;;  %1260 = vmatprep.mubr.msk.bf16.mxu0 %vm1327_vm0, %v1326_v0 }
 0x46d   : > { %1261 = vmatmul.mubr.msk.bf16.vlgmr.msra.gmra.mxu0 %vm181_vm5, %v958_v38 }
 0x4d8   : > { %v341_v39 = vpop.f32.mrf.mxu0 }
 0x4d9   : > { %1008 = vrot.lane.b32.xlu1 %v341_v39, %s1334_s18 }
 0x4da   : > { %v1190_v40 = vpop.f32.mrf.mxu0 }
 0x4dc   : > { %v344_v41 = vpop.f32.mrf.mxu0 }
 0x4de   : > { %v1191_v42 = vpop.f32.mrf.mxu0 }
 0x4e0   : > { %v451_v18 = vpop.f32.mrf.mxu0 }
 0x4e1   : > { %1012 = vrot.lane.b32.xlu1 %v451_v18, %s1333_s17 }
 0x4e2   : > { %v1202_v43 = vpop.f32.mrf.mxu0 }
 0x4e4   : > { %v454_v44 = vpop.f32.mrf.mxu0 }
 0x4e6   : > { %v1203_v46 = vpop.f32.mrf.mxu0 }
 0x4e8   : > { %v561_v47 = vpop.f32.mrf.mxu0 }
 0x4e9   : > { %1016 = vrot.lane.b32.xlu0 %v561_v47, %s1332_s16 }
 0x4ea   : > { %v1214_v0 = vpop.f32.mrf.mxu0 }
 0x4ec   : > { %v564_v48 = vpop.f32.mrf.mxu0 }
 0x4ee   : > { %v1215_v49 = vpop.f32.mrf.mxu0 }
 0x515   : > { %v671_v50 = vpop.f32.mrf.mxu0 }
 0x516   : > { %1020 = vrot.lane.b32.xlu1 %v671_v50, %s1331_s15 }
 0x517   : > { %v1226_v51 = vpop.f32.mrf.mxu0 }
 0x519   : > { %v674_v52 = vpop.f32.mrf.mxu0 }
 0x51b   : > { %v1227_v53 = vpop.f32.mrf.mxu0 }
 0x51d   : > { %v781_v54 = vpop.f32.mrf.mxu0 }
 0x51e   : > { %1024 = vrot.lane.b32.xlu0 %v781_v54, %s1330_s14 }
 0x51f   : > { %v1238_v55 = vpop.f32.mrf.mxu0 }
 0x521   : > { %v784_v56 = vpop.f32.mrf.mxu0 }
 0x523   : > { %v1239_v57 = vpop.f32.mrf.mxu0 }
 0x525   : > { %v891_v58 = vpop.f32.mrf.mxu0 }
 0x526   : > { %1028 = vrot.lane.b32.xlu1 %v891_v58, %s1329_s13 }
 0x527   : > { %v1250_v59 = vpop.f32.mrf.mxu0 }
 0x529   : > { %v894_v60 = vpop.f32.mrf.mxu0 }
 0x52b   : > { %v1251_v61 = vpop.f32.mrf.mxu0 }
 0x52d   : > { %v1001_v62 = vpop.f32.mrf.mxu0 }
 0x52e   : > { %1032 = vrot.lane.b32.xlu0 %v1001_v62, %s1328_s12 }
 0x52f   : > { %v1262_v63 = vpop.f32.mrf.mxu0 }
 0x531   : > { %v1004_v1 = vpop.f32.mrf.mxu0 }
 0x533   : > { %v1263_v2 = vpop.f32.mrf.mxu0 }
 0x54b   : > { %v1009_v3 = vpop.permute.xlu1 %1008 }
 0x54c   : > { %v1035_v7 = vsel %vm121_vm1, %v1434_v45, %v1009_v3  ;;  %v1052_v45 = vld [vmem:[%s114_s22] sm:$0x7] }
 0x553   : > { %v1013_v4 = vpop.permute.xlu1 %1012 }
 0x554   : > { %v1037_v8 = vsel %vm1036_vm6, %v1035_v7, %v1013_v4 }
 0x55b   : > { %v1017_v5 = vpop.permute.xlu0 %1016 }
 0x55c   : > { %v1039_v10 = vsel %vm1038_vm7, %v1037_v8, %v1017_v5 }
 0x588   : > { %v1021_v6 = vpop.permute.xlu1 %1020 }
 0x589   : > { %v1041_v12 = vsel %vm1040_vm8, %v1039_v10, %v1021_v6 }
 0x590   : > { %v1025_v9 = vpop.permute.xlu0 %1024 }
 0x591   : > { %v1043_v13 = vsel %vm1042_vm9, %v1041_v12, %v1025_v9 }
 0x598   : > { %v1029_v11 = vpop.permute.xlu1 %1028 }
 0x599   : > { %v1045_v14 = vsel %vm1044_vm10, %v1043_v13, %v1029_v11 }
 0x5a0   : > { %v1033_v16 = vpop.permute.xlu0 %1032 }
 0x5a1   : > { %v1047_v17 = vsel %vm1046_vm11, %v1045_v14, %v1033_v16 }
 0x5a2   : > { %v1048_v19 = vpack.c.bf16 %v1047_v17, %v1047_v17 }
 0x5a4   : > { %v1053_v20 = vsel %vm1051_vm13, %v1048_v19, %v1052_v45 }
 0x5a5   : > { %1054 = vst [vmem:[%s114_s22] sm:$0x7] %v1053_v20 }
 0x5a6 PF: > { %s11_s6 = sadd.s32 1, %s1324_s6  }
 0x5a7   : > { %p8_p4 = scmp.ge.s32.totalorder %s11_s6, 10  }
 0x5a9   :  { %10 = sbr.rel (!%p8_p4) target bundleno = 1 (0x1), region = 54 }

// kernel: action_predictor_forward.24
= control target key start
LH: loop header
LB: loop body
LE: loop exit
PB: predicated region body
PF: predicated region fallthrough
CT: control target
= control target key end

     0   :  { %s84_s0 = inlined_call_operand.vmem [shape: f32[8,128], index: 0, kind: input, shape index: {}]   ;;  %s85_s1 = inlined_call_operand.vmem [shape: f32[1,128], index: 1, kind: input, shape index: {}]   ;;  %s86_s2 = inlined_call_operand.vmem [shape: f32[1,128], index: 2, kind: input, shape index: {}]   ;;  %s87_s3 = inlined_call_operand.vmem [shape: f32[8,128], index: 3, kind: output, shape index: {}]  }
   0x1   :  { %v14_v0 = vld [vmem:[%s84_s0] sm:$0xff] }
   0x2   :  { %17 = vadd.xlane.f32.xlu0 %v14_v0  ;;  %v48_v9 = vld [vmem:[%s85_s1] ss:$0 sm:$0xff] }
   0x3   :  { %v49_v11 = vld [vmem:[%s86_s2] ss:$0 sm:$0xff] }
  0x8b   :  { %v18_v1 = vpop.xlane.xlu0 %17 }
  0x8c   :  { %v20_v2 = vmul.f32 0.0078125, %v18_v1 }
  0x8e   :  { %v21_v3 = vsub.f32 %v14_v0, %v20_v2 }
  0x90   :  { %v22_v4 = vmul.f32 %v21_v3, %v21_v3 }
  0x92   :  { %23 = vadd.xlane.f32.xlu0 %v22_v4 }
 0x11b   :  { %v24_v5 = vpop.xlane.xlu0 %23 }
 0x11c   :  { %v25_v6 = vmul.f32 0.0078125, %v24_v5 }
 0x11e   :  { %v26_v7 = vadd.f32 1e-12, %v25_v6 }
 0x120   :  { %50 = vrsqrt.f32 %v26_v7 }
 0x12d   :  { %v51_v8 = vpop.eup %50 }
 0x12e   :  { %v28_v10 = vmul.f32 %v51_v8, %v21_v3 }
 0x130   :  { %v35_v12 = vmul.f32 %v48_v9, %v28_v10 }
 0x132   :  { %v42_v13 = vadd.f32 %v49_v11, %v35_v12 }
 0x134   :  { %43 = vst [vmem:[%s87_s3] sm:$0xff] %v42_v13 }

// kernel: action_predictor_forward.25
= control target key start
LH: loop header
LB: loop body
LE: loop exit
PB: predicated region body
PF: predicated region fallthrough
CT: control target
= control target key end

     0   :  { %v386_v0 = vmov 0.0   ;;  %vm387_vm0 = vmmov 0   ;;  %v388_v3 = vmov 0   ;;  %v51_v28 = vlaneseq  ;;  %s493_s1 = inlined_call_operand.vmem [shape: bf16[128,384], index: 1, kind: input, shape index: {}]   ;;  %s494_s0 = inlined_call_operand.vmem [shape: f32[8,128], index: 0, kind: input, shape index: {}]   ;;  %s495_s2 = inlined_call_operand.vmem [shape: f32[1,384], index: 2, kind: input, shape index: {}]   ;;  %s496_s3 = inlined_call_operand.vmem [shape: bf16[8,384], index: 3, kind: output, shape index: {}]  }
   0x1   :  { %331 = vmatprep.subr.bf16.mxu1 %v386_v0  ;;  %v354_v1 = vld [vmem:[%s493_s1 + $0xac] ss:$12 sps:$4 sm:$0xff]   ;;  %347 = vmatprep.mubr.msk.bf16.mxu1 %vm387_vm0, %v386_v0  ;;  %v356_v2 = vld [vmem:[%s493_s1 + $0xb0] ss:$12 sps:$4 sm:$0xff]   ;;  %v357_v4 = vld [vmem:[%s493_s1 + $0xa8] ss:$12 sps:$4 sm:$0xff]  }
   0x2   :  { %226 = vmatprep.mubr.bf16.mxu0 %v388_v3  ;;  %194 = vmatprep.subr.bf16.mxu0 %v354_v1  ;;  %v358_v5 = vld [vmem:[%s493_s1 + $0x94] ss:$12 sps:$4 sm:$0xff]   ;;  %v360_v6 = vld [vmem:[%s493_s1 + $0x98] ss:$12 sps:$4 sm:$0xff]   ;;  %v361_v7 = vld [vmem:[%s493_s1 + $0x90] ss:$12 sps:$4 sm:$0xff]  }
   0x3   :  { %332 = vmatpush3.bf16.msra.mxu1 %v356_v2  ;;  %195 = vmatpush1.bf16.msra.mxu0 %v357_v4  ;;  %v362_v8 = vld [vmem:[%s493_s1 + $0x7c] ss:$12 sps:$4 sm:$0xff]   ;;  %v364_v9 = vld [vmem:[%s493_s1 + $0x80] ss:$12 sps:$4 sm:$0xff]   ;;  %v365_v10 = vld [vmem:[%s493_s1 + $0x78] ss:$12 sps:$4 sm:$0xff]  }
   0x4   :  { %333 = vmatprep.subr.bf16.mxu1 %v386_v0  ;;  %196 = vmatprep.subr.bf16.mxu0 %v358_v5  ;;  %v366_v11 = vld [vmem:[%s493_s1 + $0x64] ss:$12 sps:$4 sm:$0xff]   ;;  %v368_v12 = vld [vmem:[%s493_s1 + $0x68] ss:$12 sps:$4 sm:$0xff]   ;;  %v369_v13 = vld [vmem:[%s493_s1 + $0x60] ss:$12 sps:$4 sm:$0xff]  }
   0x5   :  { %v370_v14 = vld [vmem:[%s493_s1 + $0x4c] ss:$12 sps:$4 sm:$0xff]   ;;  %v372_v15 = vld [vmem:[%s493_s1 + $0x50] ss:$12 sps:$4 sm:$0xff]   ;;  %v373_v16 = vld [vmem:[%s493_s1 + $0x48] ss:$12 sps:$4 sm:$0xff]  }
   0x6   :  { %v374_v17 = vld [vmem:[%s493_s1 + $0x34] ss:$12 sps:$4 sm:$0xff]   ;;  %v376_v18 = vld [vmem:[%s493_s1 + $0x38] ss:$12 sps:$4 sm:$0xff]   ;;  %v377_v19 = vld [vmem:[%s493_s1 + $0x30] ss:$12 sps:$4 sm:$0xff]  }
   0x7   :  { %334 = vmatpush3.bf16.msra.mxu1 %v360_v6  ;;  %197 = vmatpush1.bf16.msra.mxu0 %v361_v7  ;;  %v378_v20 = vld [vmem:[%s493_s1 + $0x1c] ss:$12 sps:$4 sm:$0xff]   ;;  %v380_v21 = vld [vmem:[%s493_s1 + $0x20] ss:$12 sps:$4 sm:$0xff]   ;;  %v381_v22 = vld [vmem:[%s493_s1 + $0x18] ss:$12 sps:$4 sm:$0xff]  }
   0x8   :  { %335 = vmatprep.subr.bf16.mxu1 %v386_v0  ;;  %198 = vmatprep.subr.bf16.mxu0 %v362_v8  ;;  %v382_v23 = vld [vmem:[%s493_s1 + $0x4] ss:$12 sps:$4 sm:$0xff]   ;;  %v384_v24 = vld [vmem:[%s493_s1 + $0x8] ss:$12 sps:$4 sm:$0xff]   ;;  %v385_v26 = vld [vmem:[%s493_s1] ss:$12 sps:$4 sm:$0xff]  }
   0x9   :  { %v15_v25 = vld [vmem:[%s494_s0] sm:$0xff]  ;;  %v52_v29 = vshrl.u32 %v51_v28, 7 }
   0xa   :  { %v16_v27 = vpack.c.bf16 %v15_v25, %v15_v25  ;;  %v49_v31 = vld [vmem:[%s495_s2] sm:$0x7] }
   0xb   :  { %336 = vmatpush3.bf16.msra.mxu1 %v364_v9  ;;  %199 = vmatpush1.bf16.msra.mxu0 %v365_v10  ;;  %v61_v30 = vsub.s32 2, %v52_v29  ;;  %v53_v32 = vsub.s32 0, %v52_v29  ;;  %v57_v33 = vsub.s32 1, %v52_v29 }
   0xc   :  { %337 = vmatprep.subr.bf16.mxu1 %v386_v0  ;;  %200 = vmatprep.subr.bf16.mxu0 %v366_v11 }
   0xd   :  { %v62_v34 = vrot.slane %v49_v31, %v61_v30  ;;  %v54_v36 = vrot.slane %v49_v31, %v53_v32  ;;  %v58_v37 = vrot.slane %v49_v31, %v57_v33 }
   0xf   :  { %338 = vmatpush3.bf16.msra.mxu1 %v368_v12  ;;  %201 = vmatpush1.bf16.msra.mxu0 %v369_v13 }
  0x10   :  { %339 = vmatprep.subr.bf16.mxu1 %v386_v0  ;;  %202 = vmatprep.subr.bf16.mxu0 %v370_v14 }
  0x13   :  { %340 = vmatpush3.bf16.msra.mxu1 %v372_v15  ;;  %203 = vmatpush1.bf16.msra.mxu0 %v373_v16 }
  0x14   :  { %341 = vmatprep.subr.bf16.mxu1 %v386_v0  ;;  %204 = vmatprep.subr.bf16.mxu0 %v374_v17 }
  0x17   :  { %342 = vmatpush3.bf16.msra.mxu1 %v376_v18  ;;  %205 = vmatpush1.bf16.msra.mxu0 %v377_v19 }
  0x18   :  { %343 = vmatprep.subr.bf16.mxu1 %v386_v0  ;;  %206 = vmatprep.subr.bf16.mxu0 %v378_v20 }
  0x1b   :  { %344 = vmatpush3.bf16.msra.mxu1 %v380_v21  ;;  %207 = vmatpush1.bf16.msra.mxu0 %v381_v22 }
  0x1c   :  { %345 = vmatprep.subr.bf16.mxu1 %v386_v0  ;;  %208 = vmatprep.subr.bf16.mxu0 %v382_v23 }
  0x1f   :  { %346 = vmatpush3.bf16.msra.mxu1 %v384_v24  ;;  %209 = vmatpush1.bf16.msra.mxu0 %v385_v26 }
  0x22   :  { %348 = vmatmul.mubr.bf16.vlgmr.msra.gmra.mxu1 %v16_v27  ;;  %227 = vmatmul.mubr.bf16.vlgmr.msra.gmra.mxu0 %v16_v27 }
  0xe2   :  { %v269_v35 = vpop.f32.mrf.mxu1  ;;  %v228_v39 = vpop.f32.mrf.mxu0 }
  0xe3   :  { %v270_v38 = vadd.f32 %v269_v35, %v62_v34  ;;  %v229_v43 = vadd.f32 %v228_v39, %v54_v36 }
  0xe4   :  { %v349_v40 = vpop.f32.mrf.mxu1  ;;  %v230_v42 = vpop.f32.mrf.mxu0 }
  0xe5   :  { %v321_v41 = vpack.c.bf16 %v270_v38, %v270_v38  ;;  %v231_v44 = vadd.f32 %v230_v42, %v58_v37 }
  0xe6   :  { %v272_v45 = vpop.f32.mrf.mxu1  ;;  %v232_v46 = vpop.f32.mrf.mxu0 }
  0xe7   :  { %289 = vst [vmem:[%s496_s3 + $0x8] sm:$0xf] %v321_v41  ;;  %v320_v47 = vpack.c.bf16 %v231_v44, %v229_v43 }
  0xe8   :  { %v350_v48 = vpop.f32.mrf.mxu1  ;;  %v233_v49 = vpop.f32.mrf.mxu0 }
  0xe9   :  { %288 = vst [vmem:[%s496_s3] sm:$0xff] %v320_v47 }

// kernel: action_predictor_forward.29
= control target key start
LH: loop header
LB: loop body
LE: loop exit
PB: predicated region body
PF: predicated region fallthrough
CT: control target
= control target key end

     0   :  { %v215_v1 = vmov 0.0   ;;  %vm216_vm0 = vmmov 0   ;;  %s271_s0 = inlined_call_operand.vmem [shape: f32[8,128], index: 0, kind: input, shape index: {}]   ;;  %s272_s1 = inlined_call_operand.vmem [shape: bf16[128,128], index: 1, kind: input, shape index: {}]   ;;  %s273_s2 = inlined_call_operand.vmem [shape: f32[1,128], index: 2, kind: input, shape index: {}]   ;;  %s274_s3 = inlined_call_operand.hbm [shape: f32[8,128], index: 3, kind: output, shape index: {}]  }
   0x1   :  { %v185_v0 = vld [vmem:[%s272_s1 + $0x38] sm:$0xff]   ;;  %162 = vmatprep.subr.bf16.mxu0 %v215_v1  ;;  %v186_v2 = vld [vmem:[%s272_s1 + $0x30] sm:$0xff]   ;;  %178 = vmatprep.mubr.msk.bf16.mxu0 %vm216_vm0, %v215_v1  ;;  %v187_v3 = vld [vmem:[%s272_s1 + $0x28] sm:$0xff]  }
   0x2   :  { %163 = vmatpush3.bf16.msra.mxu0 %v185_v0 }
   0x3   :  { %164 = vmatprep.subr.bf16.mxu0 %v215_v1 }
   0x6   :  { %165 = vmatpush3.bf16.msra.mxu0 %v186_v2 }
   0x7   :  { %166 = vmatprep.subr.bf16.mxu0 %v215_v1 }
   0x8   :  { %8 = vsyncpa [#allocation3], 0  ;;  %v188_v4 = vld [vmem:[%s272_s1 + $0x20] sm:$0xff]   ;;  %v189_v5 = vld [vmem:[%s272_s1 + $0x18] sm:$0xff]   ;;  %s217_s5 = smov [#allocation2]  }
   0x9   :  { %v190_v6 = vld [vmem:[%s272_s1 + $0x10] sm:$0xff]   ;;  %v191_v7 = vld [vmem:[%s272_s1 + $0x8] sm:$0xff]   ;;  %v192_v8 = vld [vmem:[%s272_s1] sm:$0xff]   ;;  %s136_s6 = sshll.u32 %s217_s5, 4  ;;  %s137_s6 = int_to_ptr.vmem [resolvable:$true] %s136_s6 }
   0xa   :  { %167 = vmatpush3.bf16.msra.mxu0 %v187_v3  ;;  %v16_v9 = vld [vmem:[%s271_s0] sm:$0xff]  ;;  %s193_s1 = scalar_lea.vmem %s137_s6, 128  ;;  %p198_p1 = scmp.lt.s32.totalorder %s137_s6, %s137_s6 }
   0xb   :  { %168 = vmatprep.subr.bf16.mxu0 %v215_v1  ;;  %v17_v10 = vpack.c.bf16 %v16_v9, %v16_v9  ;;  %v144_v11 = vld [vmem:[%s273_s2] ss:$0 sm:$0xff]  ;;  %p194_p0 = scmp.ne.s32.totalorder %s137_s6, %s193_s1  ;;  %p199_p2 = scmp.lt.s32.totalorder %s193_s1, %s193_s1 }
   0xd   :  { %p200_p3 = por %p199_p2, %p198_p1 }
   0xe   :  { %169 = vmatpush3.bf16.msra.mxu0 %v188_v4 }
   0xf   :  { %170 = vmatprep.subr.bf16.mxu0 %v215_v1  ;;  %p201_p4 = pnand %p200_p3, %p194_p0 }
  0x12   :  { %171 = vmatpush3.bf16.msra.mxu0 %v189_v5 }
  0x13   :  { %172 = vmatprep.subr.bf16.mxu0 %v215_v1 }
  0x16   :  { %173 = vmatpush3.bf16.msra.mxu0 %v190_v6 }
  0x17   :  { %174 = vmatprep.subr.bf16.mxu0 %v215_v1 }
  0x1a   :  { %175 = vmatpush3.bf16.msra.mxu0 %v191_v7 }
  0x1b   :  { %176 = vmatprep.subr.bf16.mxu0 %v215_v1 }
  0x1e   :  { %177 = vmatpush3.bf16.msra.mxu0 %v192_v8 }
  0x21   :  { %179 = vmatmul.mubr.bf16.vlgmr.msra.gmra.mxu0 %v17_v10 }
  0xe1   :  { %v123_v12 = vpop.f32.mrf.mxu0 }
  0xe2   :  { %v124_v13 = vadd.f32 %v144_v11, %v123_v12 }
  0xe3   :  { %v180_v14 = vpop.f32.mrf.mxu0 }
  0xe4   :  { %129 = vst [vmem:[#allocation2] sm:$0xff] %v124_v13 }
  0xe5   :  { %v126_v15 = vpop.f32.mrf.mxu0 }
  0xe6   :  { %204 = shalt.err (!%p201_p4)
}
  0xe7   :  { %139 = dma.vmem_to_hbm [thread:$0]  %s137_s6, 128, %s274_s3, [#allocation3]   ;;  %v181_v16 = vpop.f32.mrf.mxu0 }
  0xe8   :  { %213 = dma.done.wait [#allocation3], 128  }
  0xe9   :  { %214 = vsyncadd [#allocation3], 4294967168 }
  0xea   :  { %143 = vsyncpa [#allocation3], 1 }

// kernel: action_predictor_forward.27
= control target key start
LH: loop header
LB: loop body
LE: loop exit
PB: predicated region body
PF: predicated region fallthrough
CT: control target
= control target key end

     0   :  { %v223_v0 = vmov 0.0   ;;  %vm224_vm0 = vmmov 0   ;;  %s302_s1 = inlined_call_operand.vmem [shape: bf16[128,128], index: 1, kind: input, shape index: {}]   ;;  %s303_s0 = inlined_call_operand.vmem [shape: bf16[8,128], index: 0, kind: input, shape index: {}]   ;;  %s304_s2 = inlined_call_operand.vmem [shape: f32[1,128], index: 2, kind: input, shape index: {}]   ;;  %s305_s3 = inlined_call_operand.vmem [shape: f32[8,128], index: 3, kind: input, shape index: {}]   ;;  %s306_s4 = inlined_call_operand.vmem [shape: f32[1,128], index: 4, kind: input, shape index: {}]   ;;  %s307_s5 = inlined_call_operand.vmem [shape: f32[1,128], index: 5, kind: input, shape index: {}]   ;;  %s308_s6 = inlined_call_operand.vmem [shape: f32[8,128], index: 6, kind: output, shape index: {}]  }
   0x1   :  { %191 = vmatprep.subr.bf16.mxu0 %v223_v0  ;;  %v213_v1 = vld [vmem:[%s302_s1 + $0x38] sm:$0xff]   ;;  %207 = vmatprep.mubr.msk.bf16.mxu0 %vm224_vm0, %v223_v0  ;;  %v214_v2 = vld [vmem:[%s302_s1 + $0x30] sm:$0xff]   ;;  %v215_v3 = vld [vmem:[%s302_s1 + $0x28] sm:$0xff]  }
   0x2   :  { %192 = vmatpush3.bf16.msra.mxu0 %v213_v1  ;;  %v216_v4 = vld [vmem:[%s302_s1 + $0x20] sm:$0xff]   ;;  %v217_v5 = vld [vmem:[%s302_s1 + $0x18] sm:$0xff]   ;;  %v218_v6 = vld [vmem:[%s302_s1 + $0x10] sm:$0xff]  }
   0x3   :  { %193 = vmatprep.subr.bf16.mxu0 %v223_v0  ;;  %v219_v7 = vld [vmem:[%s302_s1 + $0x8] sm:$0xff]   ;;  %v220_v8 = vld [vmem:[%s302_s1] sm:$0xff]  }
   0x4   :  { %v24_v9 = vld [vmem:[%s303_s0] sm:$0xf] }
   0x5   :  { %v171_v10 = vld [vmem:[%s304_s2] ss:$0 sm:$0xff] }
   0x6   :  { %194 = vmatpush3.bf16.msra.mxu0 %v214_v2  ;;  %v136_v12 = vld [vmem:[%s305_s3] sm:$0xff] }
   0x7   :  { %195 = vmatprep.subr.bf16.mxu0 %v223_v0  ;;  %v180_v26 = vld [vmem:[%s306_s4] ss:$0 sm:$0xff] }
   0x8   :  { %v181_v28 = vld [vmem:[%s307_s5] ss:$0 sm:$0xff] }
   0xa   :  { %196 = vmatpush3.bf16.msra.mxu0 %v215_v3 }
   0xb   :  { %197 = vmatprep.subr.bf16.mxu0 %v223_v0 }
   0xe   :  { %198 = vmatpush3.bf16.msra.mxu0 %v216_v4 }
   0xf   :  { %199 = vmatprep.subr.bf16.mxu0 %v223_v0 }
  0x12   :  { %200 = vmatpush3.bf16.msra.mxu0 %v217_v5 }
  0x13   :  { %201 = vmatprep.subr.bf16.mxu0 %v223_v0 }
  0x16   :  { %202 = vmatpush3.bf16.msra.mxu0 %v218_v6 }
  0x17   :  { %203 = vmatprep.subr.bf16.mxu0 %v223_v0 }
  0x1a   :  { %204 = vmatpush3.bf16.msra.mxu0 %v219_v7 }
  0x1b   :  { %205 = vmatprep.subr.bf16.mxu0 %v223_v0 }
  0x1e   :  { %206 = vmatpush3.bf16.msra.mxu0 %v220_v8 }
  0x21   :  { %208 = vmatmul.mubr.bf16.vlgmr.msra.gmra.mxu0 %v24_v9 }
  0xe1   :  { %v130_v11 = vpop.f32.mrf.mxu0 }
  0xe2   :  { %v131_v13 = vadd.f32 %v171_v10, %v130_v11 }
  0xe3   :  { %v209_v14 = vpop.f32.mrf.mxu0 }
  0xe4   :  { %v137_v15 = vadd.f32 %v136_v12, %v131_v13 }
  0xe5   :  { %v133_v16 = vpop.f32.mrf.mxu0 }
  0xe6   :  { %140 = vadd.xlane.f32.xlu0 %v137_v15 }
  0xe7   :  { %v210_v17 = vpop.f32.mrf.mxu0 }
 0x16f   :  { %v141_v18 = vpop.xlane.xlu0 %140 }
 0x170   :  { %v143_v19 = vmul.f32 0.0078125, %v141_v18 }
 0x172   :  { %v144_v20 = vsub.f32 %v137_v15, %v143_v19 }
 0x174   :  { %v145_v21 = vmul.f32 %v144_v20, %v144_v20 }
 0x176   :  { %146 = vadd.xlane.f32.xlu0 %v145_v21 }
 0x1ff   :  { %v147_v22 = vpop.xlane.xlu0 %146 }
 0x200   :  { %v148_v23 = vmul.f32 0.0078125, %v147_v22 }
 0x202   :  { %v149_v24 = vadd.f32 1e-05, %v148_v23 }
 0x204   :  { %221 = vrsqrt.f32 %v149_v24 }
 0x211   :  { %v222_v25 = vpop.eup %221 }
 0x212   :  { %v151_v27 = vmul.f32 %v222_v25, %v144_v20 }
 0x214   :  { %v158_v29 = vmul.f32 %v180_v26, %v151_v27 }
 0x216   :  { %v165_v30 = vadd.f32 %v181_v28, %v158_v29 }
 0x218   :  { %166 = vst [vmem:[%s308_s6] sm:$0xff] %v165_v30 }

// kernel: action_predictor_forward.28
= control target key start
LH: loop header
LB: loop body
LE: loop exit
PB: predicated region body
PF: predicated region fallthrough
CT: control target
= control target key end

     0   :  { %v491_v1 = vmov 0   ;;  %v47_v35 = vlaneseq  ;;  %s646_s1 = inlined_call_operand.vmem [shape: bf16[128,256], index: 1, kind: input, shape index: {}]   ;;  %s647_s3 = inlined_call_operand.vmem [shape: bf16[256,128], index: 3, kind: input, shape index: {}]   ;;  %s648_s0 = inlined_call_operand.vmem [shape: f32[8,128], index: 0, kind: input, shape index: {}]   ;;  %s649_s2 = inlined_call_operand.vmem [shape: f32[1,256], index: 2, kind: input, shape index: {}]   ;;  %s650_s4 = inlined_call_operand.vmem [shape: f32[1,128], index: 4, kind: input, shape index: {}]   ;;  %s651_s5 = inlined_call_operand.vmem [shape: f32[1,128], index: 5, kind: input, shape index: {}]   ;;  %s652_s6 = inlined_call_operand.vmem [shape: f32[1,128], index: 6, kind: input, shape index: {}]   ;;  %s653_s7 = inlined_call_operand.vmem [shape: f32[8,128], index: 7, kind: output, shape index: {}]  }
   0x1   :  { %v449_v0 = vld [vmem:[%s646_s1 + $0x74] ss:$8 sps:$4 sm:$0xff]   ;;  %169 = vmatprep.mubr.bf16.mxu0 %v491_v1  ;;  %v451_v2 = vld [vmem:[%s646_s1 + $0x70] ss:$8 sps:$4 sm:$0xff]   ;;  %v452_v3 = vld [vmem:[%s646_s1 + $0x64] ss:$8 sps:$4 sm:$0xff]  }
   0x2   :  { %137 = vmatprep.subr.bf16.mxu0 %v449_v0  ;;  %v454_v4 = vld [vmem:[%s646_s1 + $0x60] ss:$8 sps:$4 sm:$0xff]   ;;  %v455_v5 = vld [vmem:[%s646_s1 + $0x54] ss:$8 sps:$4 sm:$0xff]   ;;  %v457_v6 = vld [vmem:[%s646_s1 + $0x50] ss:$8 sps:$4 sm:$0xff]  }
   0x3   :  { %138 = vmatpush1.bf16.msra.mxu0 %v451_v2  ;;  %v458_v7 = vld [vmem:[%s646_s1 + $0x44] ss:$8 sps:$4 sm:$0xff]   ;;  %v460_v8 = vld [vmem:[%s646_s1 + $0x40] ss:$8 sps:$4 sm:$0xff]   ;;  %v461_v9 = vld [vmem:[%s646_s1 + $0x34] ss:$8 sps:$4 sm:$0xff]  }
   0x4   :  { %139 = vmatprep.subr.bf16.mxu0 %v452_v3  ;;  %v473_v10 = vld [vmem:[%s647_s3 + $0x78] sm:$0xff]   ;;  %v475_v13 = vld [vmem:[%s647_s3 + $0x70] sm:$0xff]   ;;  %v477_v15 = vld [vmem:[%s647_s3 + $0x68] sm:$0xff]   ;;  %v48_v36 = vshrl.u32 %v47_v35, 7 }
   0x5   :  { %v474_v11 = vld [vmem:[%s647_s3 + $0x38] sm:$0xff]   ;;  %426 = vmatprep.subr.bf16.mxu1 %v473_v10  ;;  %v476_v14 = vld [vmem:[%s647_s3 + $0x30] sm:$0xff]   ;;  %v464_v16 = vld [vmem:[%s646_s1 + $0x24] ss:$8 sps:$4 sm:$0xff]  }
   0x6   :  { %v463_v12 = vld [vmem:[%s646_s1 + $0x30] ss:$8 sps:$4 sm:$0xff]   ;;  %427 = vmatpush3.bf16.msra.mxu1 %v474_v11  ;;  %v466_v17 = vld [vmem:[%s646_s1 + $0x20] ss:$8 sps:$4 sm:$0xff]   ;;  %v467_v20 = vld [vmem:[%s646_s1 + $0x14] ss:$8 sps:$4 sm:$0xff]  }
   0x7   :  { %140 = vmatpush1.bf16.msra.mxu0 %v454_v4  ;;  %428 = vmatprep.subr.bf16.mxu1 %v475_v13  ;;  %v478_v18 = vld [vmem:[%s647_s3 + $0x28] sm:$0xff]   ;;  %v479_v19 = vld [vmem:[%s647_s3 + $0x60] sm:$0xff]   ;;  %v469_v21 = vld [vmem:[%s646_s1 + $0x10] ss:$8 sps:$4 sm:$0xff]   ;;  %v49_v37 = vsub.s32 0, %v48_v36  ;;  %v53_v39 = vsub.s32 1, %v48_v36 }
   0x8   :  { %141 = vmatprep.subr.bf16.mxu0 %v455_v5  ;;  %v470_v22 = vld [vmem:[%s646_s1 + $0x4] ss:$8 sps:$4 sm:$0xff]   ;;  %v481_v24 = vld [vmem:[%s647_s3 + $0x58] sm:$0xff]   ;;  %v472_v26 = vld [vmem:[%s646_s1] ss:$8 sps:$4 sm:$0xff]  }
   0x9   :  { %v480_v23 = vld [vmem:[%s647_s3 + $0x20] sm:$0xff]   ;;  %v482_v25 = vld [vmem:[%s647_s3 + $0x18] sm:$0xff]   ;;  %v483_v28 = vld [vmem:[%s647_s3 + $0x50] sm:$0xff]  }
   0xa   :  { %429 = vmatpush3.bf16.msra.mxu1 %v476_v14  ;;  %v27_v27 = vld [vmem:[%s648_s0] sm:$0xff]  ;;  %v484_v30 = vld [vmem:[%s647_s3 + $0x10] sm:$0xff]   ;;  %v485_v31 = vld [vmem:[%s647_s3 + $0x48] sm:$0xff]  }
   0xb   :  { %142 = vmatpush1.bf16.msra.mxu0 %v457_v6  ;;  %430 = vmatprep.subr.bf16.mxu1 %v477_v15  ;;  %v28_v29 = vpack.c.bf16 %v27_v27, %v27_v27  ;;  %v486_v32 = vld [vmem:[%s647_s3 + $0x8] sm:$0xff]   ;;  %v487_v33 = vld [vmem:[%s647_s3 + $0x40] sm:$0xff]  }
   0xc   :  { %143 = vmatprep.subr.bf16.mxu0 %v458_v7  ;;  %v488_v34 = vld [vmem:[%s647_s3] sm:$0xff]  }
   0xd   :  { %v45_v38 = vld [vmem:[%s649_s2] sm:$0x3] }
   0xe   :  { %431 = vmatpush3.bf16.msra.mxu1 %v478_v18  ;;  %v50_v40 = vrot.slane %v45_v38, %v49_v37  ;;  %v54_v41 = vrot.slane %v45_v38, %v53_v39  ;;  %v407_v53 = vld [vmem:[%s650_s4] ss:$0 sm:$0xff] }
   0xf   :  { %144 = vmatpush1.bf16.msra.mxu0 %v460_v8  ;;  %432 = vmatprep.subr.bf16.mxu1 %v479_v19  ;;  %v424_v4 = vld [vmem:[%s651_s5] ss:$0 sm:$0xff] }
  0x10   :  { %145 = vmatprep.subr.bf16.mxu0 %v461_v9  ;;  %v425_v6 = vld [vmem:[%s652_s6] ss:$0 sm:$0xff] }
  0x12   :  { %433 = vmatpush3.bf16.msra.mxu1 %v480_v23 }
  0x13   :  { %146 = vmatpush1.bf16.msra.mxu0 %v463_v12  ;;  %434 = vmatprep.subr.bf16.mxu1 %v481_v24 }
  0x14   :  { %147 = vmatprep.subr.bf16.mxu0 %v464_v16 }
  0x16   :  { %435 = vmatpush3.bf16.msra.mxu1 %v482_v25 }
  0x17   :  { %148 = vmatpush1.bf16.msra.mxu0 %v466_v17  ;;  %436 = vmatprep.subr.bf16.mxu1 %v483_v28 }
  0x18   :  { %149 = vmatprep.subr.bf16.mxu0 %v467_v20 }
  0x1a   :  { %437 = vmatpush3.bf16.msra.mxu1 %v484_v30 }
  0x1b   :  { %150 = vmatpush1.bf16.msra.mxu0 %v469_v21  ;;  %438 = vmatprep.subr.bf16.mxu1 %v485_v31 }
  0x1c   :  { %151 = vmatprep.subr.bf16.mxu0 %v470_v22 }
  0x1e   :  { %439 = vmatpush3.bf16.msra.mxu1 %v486_v32 }
  0x1f   :  { %152 = vmatpush1.bf16.msra.mxu0 %v472_v26  ;;  %440 = vmatprep.subr.bf16.mxu1 %v487_v33 }
  0x22   :  { %170 = vmatmul.mubr.bf16.vlgmr.msra.gmra.mxu0 %v28_v29  ;;  %441 = vmatpush3.bf16.msra.mxu1 %v488_v34 }
  0xe2   :  { %v171_v42 = vpop.f32.mrf.mxu0 }
  0xe3   :  { %v172_v43 = vadd.f32 %v171_v42, %v50_v40 }
  0xe4   :  { %v173_v44 = vpop.f32.mrf.mxu0 }
  0xe5   :  { %v174_v45 = vadd.f32 %v173_v44, %v54_v41  ;;  %v178_v46 = vmax.f32 %v172_v43, 0.0 }
  0xe6   :  { %v175_v47 = vpop.f32.mrf.mxu0 }
  0xe7   :  { %v179_v48 = vmax.f32 %v174_v45, 0.0  ;;  %v180_v51 = vpack.c.bf16 %v178_v46, %v178_v46 }
  0xe8   :  { %v176_v49 = vpop.f32.mrf.mxu0 }
  0xe9   :  { %v181_v50 = vpack.c.bf16 %v179_v48, %v179_v48 }
  0xeb   :  { %349 = vmatprep.mubr.bf16.mxu1 %v181_v50 }
  0xec   :  { %350 = vmatmul.mubr.bf16.vlgmr.msra.gmra.mxu1 %v180_v51 }
 0x1ac   :  { %v442_v52 = vpop.f32.mrf.mxu1 }
 0x1ae   :  { %v443_v54 = vpop.f32.mrf.mxu1 }
 0x1af   :  { %v444_v55 = vadd.f32 %v443_v54, %v442_v52 }
 0x1b0   :  { %v445_v56 = vpop.f32.mrf.mxu1 }
 0x1b1   :  { %v352_v57 = vadd.f32 %v444_v55, %v407_v53 }
 0x1b2   :  { %v446_v58 = vpop.f32.mrf.mxu1 }
 0x1b3   :  { %v357_v59 = vadd.f32 %v352_v57, %v27_v27 }
 0x1b5   :  { %360 = vadd.xlane.f32.xlu0 %v357_v59 }
 0x23e   :  { %v361_v60 = vpop.xlane.xlu0 %360 }
 0x23f   :  { %v363_v61 = vmul.f32 0.0078125, %v361_v60 }
 0x241   :  { %v364_v62 = vsub.f32 %v357_v59, %v363_v61 }
 0x243   :  { %v365_v63 = vmul.f32 %v364_v62, %v364_v62 }
 0x245   :  { %366 = vadd.xlane.f32.xlu0 %v365_v63 }
 0x2ce   :  { %v367_v0 = vpop.xlane.xlu0 %366 }
 0x2cf   :  { %v368_v1 = vmul.f32 0.0078125, %v367_v0 }
 0x2d1   :  { %v369_v2 = vadd.f32 1e-05, %v368_v1 }
 0x2d3   :  { %489 = vrsqrt.f32 %v369_v2 }
 0x2e0   :  { %v490_v3 = vpop.eup %489 }
 0x2e1   :  { %v371_v5 = vmul.f32 %v490_v3, %v364_v62 }
 0x2e3   :  { %v378_v7 = vmul.f32 %v424_v4, %v371_v5 }
 0x2e5   :  { %v385_v8 = vadd.f32 %v425_v6, %v378_v7 }
 0x2e7   :  { %386 = vst [vmem:[%s653_s7] sm:$0xff] %v385_v8 }

// kernel: action_predictor_forward.26
= control target key start
LH: loop header
LB: loop body
LE: loop exit
PB: predicated region body
PF: predicated region fallthrough
CT: control target
= control target key end

     0   :  { %s1334_s6 = smov 0   ;;  %s1509_s0 = inlined_call_operand.vmem [shape: bf16[4,2,384], index: 0, kind: input, shape index: {}]   ;;  %s1510_s1 = inlined_call_operand.vmem [shape: bf16[4,2,128], index: 1, kind: output, shape index: {}]  }
   0x1 LB: > { %s1104_s7 = sadd.s32 4294967295, %s1312_s6   ;;  %p1108_p0 = scmp.ge.s32.totalorder %s1312_s6, 1  ;;  %s1312_s6 = sphi %s1334_s6, %s11_s6  }
   0x2   : > { %p86_p1 = scmp.lt.s32.totalorder %s1312_s6, 5 }
   0x4   : > { %p87_p2 = pnand %p1108_p0, %p86_p1 }
   0x5   : > { %p103_p3 = scmp.lt.s32.totalorder (!%p87_p2), %s1104_s7, 3  ;;  %s1317_s12 = smov (!%p87_p2), 112  }
   0x6   : > { %90 = sbr.rel (%p87_p2) target bundleno = 1451 (0x5ab), region = 24  ;;  %s1318_s13 = smov (!%p87_p2), 96  }
   0x7   : > { %s1319_s14 = smov (!%p87_p2), 80   ;;  %s1320_s15 = smov (!%p87_p2), 64  }
   0x8   : > { %s1321_s16 = smov (!%p87_p2), 48   ;;  %s1322_s17 = smov (!%p87_p2), 32  }
   0x9   : > { %s1323_s18 = smov (!%p87_p2), 16  }
   0xb   : > { %v116_v0 = vlaneseq  ;;  %v1314_v1 = vmov 0.0   ;;  %v1315_v2 = vmov 1966171168   ;;  %s1512_s7 = smov (!%p103_p3, %s1104_s7), 3  ;;  %vm1316_vm0 = vmmov 0  }
   0xc   : > { %1159 = vmatprep.subr.bf16.mxu0 %v1314_v1  ;;  %v114_v3 = vunpack.c.l.s4 %v1315_v2  ;;  %1165 = vmatprep.subr.bf16.mxu1 %v1314_v1  ;;  %s1255_s8 = smul.u32 3, %s1512_s7  ;;  %vm135_vm1 = vcmask 130048   ;;  %vm182_vm2 = vcmask 9216   ;;  %vm200_vm3 = vcmask 1040384   ;;  %s109_s21 = scalar_lea.vmem %s1510_s1, %s1512_s7 }
   0xd   : > { %v117_v4 = vshrl.u32 %v116_v0, 7  ;;  %1161 = vmatprep.mubr.msk.bf16.mxu0 %vm1316_vm0, %v1314_v1  ;;  %1167 = vmatprep.mubr.msk.bf16.mxu1 %vm1316_vm0, %v1314_v1  ;;  %vm196_vm4 = vcmask 15360   ;;  %vm1043_vm5 = vcmask 261120   ;;  %vm1045_vm6 = vcmask 392192  }
   0xe   : > { %v115_v5 = vunpack.c.0.s8 %v114_v3  ;;  %s106_s11 = scalar_lea.vmem %s1509_s0, %s1255_s8  ;;  %vm1047_vm7 = vcmask 523264   ;;  %vm1049_vm8 = vcmask 654336   ;;  %vm1051_vm9 = vcmask 785408  }
   0xf   : > { %v111_v7 = vld [vmem:[%s106_s11] sm:$0x7]  ;;  %vm1053_vm10 = vcmask 916480  }
  0x10   : > { %v118_v6 = vsub.s32 %v115_v5, %v117_v4 }
  0x12   : > { %v119_v8 = vrot.slane %v111_v7, %v118_v6 }
  0x14   : > { %v120_v9 = vcombine.high %v119_v8, %v119_v8  ;;  %v127_v17 = vrot.slane %v119_v8, %v118_v6 }
  0x16   : > { %v134_v10 = vrot.slane %v120_v9, %v118_v6  ;;  %v1371_v23 = vcombine.high %v127_v17, %v127_v17 }
  0x18   : > { %v140_v11 = vsel %vm135_vm1, %v134_v10, 0  ;;  %246 = vrot.lane.b32.xlu1 %v134_v10, %s1317_s12  ;;  %v202_v24 = vsel %vm200_vm3, %v1371_v23, 0 }
  0x19   : > { %1160 = vmatpush3.bf16.xpose.msra.mxu0 %v140_v11  ;;  %1166 = vmatpush3.bf16.msra.mxu1 %v202_v24 }
  0x1a   : > { %1177 = vmatprep.subr.bf16.mxu0 %v1314_v1  ;;  %1171 = vmatprep.subr.bf16.mxu1 %v1314_v1 }
  0x1c   : > { %244 = vrot.lane.b32.xlu1 %v127_v17, %s1317_s12 }
  0x20   : > { %1162 = vmatmul.mubr.msk.bf16.vlgmr.msra.gmra.mxu0 %vm135_vm1, %v111_v7  ;;  %354 = vrot.lane.b32.xlu1 %v127_v17, %s1318_s13 }
  0x21   : > { %1179 = vmatprep.mubr.msk.bf16.mxu0 %vm1316_vm0, %v1314_v1 }
  0x24   : > { %466 = vrot.lane.b32.xlu1 %v134_v10, %s1319_s14 }
  0x28   : > { %464 = vrot.lane.b32.xlu1 %v127_v17, %s1319_s14 }
  0x2c   : > { %576 = vrot.lane.b32.xlu1 %v134_v10, %s1320_s15 }
  0x30   : > { %574 = vrot.lane.b32.xlu1 %v127_v17, %s1320_s15 }
  0x34   : > { %686 = vrot.lane.b32.xlu1 %v134_v10, %s1321_s16 }
  0x38   : > { %796 = vrot.lane.b32.xlu1 %v134_v10, %s1322_s17 }
  0x3c   : > { %906 = vrot.lane.b32.xlu1 %v134_v10, %s1323_s18 }
  0x8a   : > { %v247_v26 = vpop.permute.xlu1 %246 }
  0x8b   : > { %v252_v31 = vsel %vm135_vm1, %v247_v26, 0 }
  0x8e   : > { %v245_v27 = vpop.permute.xlu1 %244 }
  0x92   : > { %v355_v30 = vpop.permute.xlu1 %354 }
  0x96   : > { %v467_v34 = vpop.permute.xlu1 %466 }
  0x97   : > { %v472_v37 = vsel %vm135_vm1, %v467_v34, 0 }
  0x9a   : > { %v465_v36 = vpop.permute.xlu1 %464 }
  0x9e   : > { %v577_v38 = vpop.permute.xlu1 %576 }
  0x9f   : > { %v582_v40 = vsel %vm135_vm1, %v577_v38, 0 }
  0xa2   : > { %v575_v39 = vpop.permute.xlu1 %574 }
  0xa6   : > { %v687_v41 = vpop.permute.xlu1 %686 }
  0xa7   : > { %v692_v42 = vsel %vm135_vm1, %v687_v41, 0 }
  0xaa   : > { %v797_v43 = vpop.permute.xlu1 %796 }
  0xab   : > { %v802_v45 = vsel %vm135_vm1, %v797_v43, 0 }
  0xae   : > { %v907_v46 = vpop.permute.xlu1 %906 }
  0xaf   : > { %v912_v48 = vsel %vm135_vm1, %v907_v46, 0 }
  0xe0   : > { %v176_v12 = vpop.f32.mrf.mxu0 }
  0xe1   : > { %v183_v13 = vsel %vm182_vm2, %v176_v12, -inf }
  0xe2   : > { %184 = vmax.xlane.f32.xlu0 %v183_v13  ;;  %v1163_v14 = vpop.f32.mrf.mxu0 }
  0xe4   : > { %v179_v15 = vpop.f32.mrf.mxu0 }
  0xe6   : > { %v1164_v16 = vpop.f32.mrf.mxu0 }
 0x16b   : > { %v185_v18 = vpop.xlane.xlu0 %184 }
 0x16c   : > { %v186_v19 = vsub.f32 %v176_v12, %v185_v18 }
 0x16e   : > { %v187_v20 = vmul.f32 1.442695, %v186_v19 }
 0x170   : > { %1274 = vpow2.f32 %v187_v20 }
 0x17d   : > { %v1275_v21 = vpop.eup %1274 }
 0x17e   : > { %v189_v22 = vsel %vm182_vm2, %v1275_v21, 0.0 }
 0x17f   : > { %190 = vadd.xlane.f32.xlu0 %v189_v22 }
 0x195   : > { %356 = vrot.lane.b32.xlu0 %v134_v10, %s1318_s13 }
 0x199   : > { %684 = vrot.lane.b32.xlu0 %v127_v17, %s1321_s16 }
 0x19d   : > { %794 = vrot.lane.b32.xlu0 %v127_v17, %s1322_s17 }
 0x1a1   : > { %904 = vrot.lane.b32.xlu0 %v127_v17, %s1323_s18 }
 0x208   : > { %v191_v25 = vpop.xlane.xlu0 %190 }
 0x209   : > { %1276 = vrcp.f32 %v191_v25 }
 0x20c   : > { %v357_v33 = vpop.permute.xlu0 %356 }
 0x20d   : > { %v362_v35 = vsel %vm135_vm1, %v357_v33, 0 }
 0x210   : > { %v685_v44 = vpop.permute.xlu0 %684 }
 0x214   : > { %v795_v47 = vpop.permute.xlu0 %794 }
 0x216   : > { %v1277_v28 = vpop.eup %1276 }
 0x217   : > { %v193_v29 = vmul.f32 %v1277_v28, %v1275_v21 }
 0x218   : > { %v905_v49 = vpop.permute.xlu0 %904 }
 0x219   : > { %v194_v32 = vpack.c.bf16 %v193_v29, %v193_v29 }
 0x21b   : > { %1168 = vmatmul.mubr.msk.bf16.vlgmr.msra.gmra.mxu1 %vm196_vm4, %v194_v32 }
 0x21c   : > { %1172 = vmatpush3.bf16.xpose.msra.mxu1 %v252_v31  ;;  %1173 = vmatprep.mubr.msk.bf16.mxu1 %vm1316_vm0, %v1314_v1 }
 0x21d   : > { %1183 = vmatprep.subr.bf16.mxu1 %v1314_v1 }
 0x223   : > { %1174 = vmatmul.mubr.msk.bf16.vlgmr.msra.gmra.mxu1 %vm135_vm1, %v245_v27 }
 0x224   : > { %1184 = vmatpush3.bf16.xpose.msra.mxu1 %v362_v35  ;;  %1185 = vmatprep.mubr.msk.bf16.mxu1 %vm1316_vm0, %v1314_v1 }
 0x225   : > { %1195 = vmatprep.subr.bf16.mxu1 %v1314_v1 }
 0x22b   : > { %1186 = vmatmul.mubr.msk.bf16.vlgmr.msra.gmra.mxu1 %vm135_vm1, %v355_v30 }
 0x22c   : > { %1196 = vmatpush3.bf16.xpose.msra.mxu1 %v472_v37  ;;  %1197 = vmatprep.mubr.msk.bf16.mxu1 %vm1316_vm0, %v1314_v1 }
 0x22d   : > { %1207 = vmatprep.subr.bf16.mxu1 %v1314_v1 }
 0x233   : > { %1198 = vmatmul.mubr.msk.bf16.vlgmr.msra.gmra.mxu1 %vm135_vm1, %v465_v36 }
 0x234   : > { %1208 = vmatpush3.bf16.xpose.msra.mxu1 %v582_v40  ;;  %1209 = vmatprep.mubr.msk.bf16.mxu1 %vm1316_vm0, %v1314_v1 }
 0x235   : > { %1219 = vmatprep.subr.bf16.mxu1 %v1314_v1 }
 0x23b   : > { %1210 = vmatmul.mubr.msk.bf16.vlgmr.msra.gmra.mxu1 %vm135_vm1, %v575_v39 }
 0x23c   : > { %1220 = vmatpush3.bf16.xpose.msra.mxu1 %v692_v42  ;;  %1221 = vmatprep.mubr.msk.bf16.mxu1 %vm1316_vm0, %v1314_v1 }
 0x23d   : > { %1231 = vmatprep.subr.bf16.mxu1 %v1314_v1 }
 0x243   : > { %1222 = vmatmul.mubr.msk.bf16.vlgmr.msra.gmra.mxu1 %vm135_vm1, %v685_v44 }
 0x244   : > { %1232 = vmatpush3.bf16.xpose.msra.mxu1 %v802_v45  ;;  %1233 = vmatprep.mubr.msk.bf16.mxu1 %vm1316_vm0, %v1314_v1 }
 0x245   : > { %1243 = vmatprep.subr.bf16.mxu1 %v1314_v1 }
 0x24b   : > { %1234 = vmatmul.mubr.msk.bf16.vlgmr.msra.gmra.mxu1 %vm135_vm1, %v795_v47 }
 0x24c   : > { %1244 = vmatpush3.bf16.xpose.msra.mxu1 %v912_v48  ;;  %1245 = vmatprep.mubr.msk.bf16.mxu1 %vm1316_vm0, %v1314_v1 }
 0x253   : > { %1246 = vmatmul.mubr.msk.bf16.vlgmr.msra.gmra.mxu1 %vm135_vm1, %v905_v49 }
 0x2db   : > { %v1415_v50 = vpop.f32.mrf.mxu1 }
 0x2dd   : > { %v1169_v51 = vpop.f32.mrf.mxu1 }
 0x2df   : > { %v241_v52 = vpop.f32.mrf.mxu1 }
 0x2e1   : > { %v1170_v53 = vpop.f32.mrf.mxu1 }
 0x2e3   : > { %v288_v54 = vpop.f32.mrf.mxu1 }
 0x2e4   : > { %v294_v55 = vsel %vm182_vm2, %v288_v54, -inf }
 0x2e5   : > { %295 = vmax.xlane.f32.xlu1 %v294_v55  ;;  %v1175_v56 = vpop.f32.mrf.mxu1 }
 0x2e7   : > { %v291_v57 = vpop.f32.mrf.mxu1 }
 0x2e9   : > { %v1176_v58 = vpop.f32.mrf.mxu1 }
 0x2eb   : > { %v398_v59 = vpop.f32.mrf.mxu1 }
 0x2ec   : > { %v404_v60 = vsel %vm182_vm2, %v398_v59, -inf }
 0x2ed   : > { %405 = vmax.xlane.f32.xlu0 %v404_v60  ;;  %v1187_v61 = vpop.f32.mrf.mxu1 }
 0x2ef   : > { %v401_v62 = vpop.f32.mrf.mxu1 }
 0x2f1   : > { %v1188_v63 = vpop.f32.mrf.mxu1 }
 0x2f3   : > { %v508_v0 = vpop.f32.mrf.mxu1 }
 0x2f4   : > { %v514_v2 = vsel %vm182_vm2, %v508_v0, -inf }
 0x2f5   : > { %515 = vmax.xlane.f32.xlu0 %v514_v2  ;;  %v1199_v3 = vpop.f32.mrf.mxu1 }
 0x2f7   : > { %v511_v4 = vpop.f32.mrf.mxu1 }
 0x2f9   : > { %v1200_v5 = vpop.f32.mrf.mxu1 }
 0x2fb   : > { %v618_v6 = vpop.f32.mrf.mxu1 }
 0x2fc   : > { %v624_v7 = vsel %vm182_vm2, %v618_v6, -inf }
 0x2fd   : > { %625 = vmax.xlane.f32.xlu1 %v624_v7  ;;  %v1211_v8 = vpop.f32.mrf.mxu1 }
 0x2ff   : > { %v621_v9 = vpop.f32.mrf.mxu1 }
 0x301   : > { %v1212_v10 = vpop.f32.mrf.mxu1 }
 0x303   : > { %v728_v11 = vpop.f32.mrf.mxu1 }
 0x304   : > { %v734_v12 = vsel %vm182_vm2, %v728_v11, -inf }
 0x305   : > { %735 = vmax.xlane.f32.xlu0 %v734_v12  ;;  %v1223_v13 = vpop.f32.mrf.mxu1 }
 0x307   : > { %v731_v14 = vpop.f32.mrf.mxu1 }
 0x309   : > { %v1224_v15 = vpop.f32.mrf.mxu1 }
 0x30b   : > { %v838_v16 = vpop.f32.mrf.mxu1 }
 0x30c   : > { %v844_v17 = vsel %vm182_vm2, %v838_v16, -inf }
 0x30d   : > { %845 = vmax.xlane.f32.xlu1 %v844_v17  ;;  %v1235_v18 = vpop.f32.mrf.mxu1 }
 0x30f   : > { %v841_v19 = vpop.f32.mrf.mxu1 }
 0x311   : > { %v1236_v20 = vpop.f32.mrf.mxu1 }
 0x313   : > { %v948_v21 = vpop.f32.mrf.mxu1 }
 0x314   : > { %v954_v22 = vsel %vm182_vm2, %v948_v21, -inf }
 0x315   : > { %955 = vmax.xlane.f32.xlu0 %v954_v22  ;;  %v1247_v24 = vpop.f32.mrf.mxu1 }
 0x317   : > { %v951_v25 = vpop.f32.mrf.mxu1 }
 0x319   : > { %v1248_v26 = vpop.f32.mrf.mxu1 }
 0x31e   : > { %306 = vrot.lane.b32.xlu1 %v1371_v23, %s1317_s12 }
 0x32b   : > { %416 = vrot.lane.b32.xlu0 %v1371_v23, %s1318_s13 }
 0x36e   : > { %v296_v27 = vpop.xlane.xlu1 %295 }
 0x36f   : > { %v297_v28 = vsub.f32 %v288_v54, %v296_v27 }
 0x371   : > { %v298_v29 = vmul.f32 1.442695, %v297_v28 }
 0x373   : > { %1278 = vpow2.f32 %v298_v29 }
 0x376   : > { %v406_v30 = vpop.xlane.xlu0 %405 }
 0x377   : > { %v407_v31 = vsub.f32 %v398_v59, %v406_v30 }
 0x379   : > { %v408_v32 = vmul.f32 1.442695, %v407_v31 }
 0x37b   : > { %1280 = vpow2.f32 %v408_v32 }
 0x37e   : > { %v516_v33 = vpop.xlane.xlu0 %515 }
 0x37f   : > { %v517_v34 = vsub.f32 %v508_v0, %v516_v33 }
 0x380   : > { %v1279_v35 = vpop.eup %1278 }
 0x381   : > { %v518_v36 = vmul.f32 1.442695, %v517_v34  ;;  %v300_v37 = vsel %vm182_vm2, %v1279_v35, 0.0 }
 0x382   : > { %301 = vadd.xlane.f32.xlu1 %v300_v37 }
 0x383   : > { %1282 = vpow2.f32 %v518_v36 }
 0x386   : > { %v626_v42 = vpop.xlane.xlu1 %625 }
 0x387   : > { %v627_v46 = vsub.f32 %v618_v6, %v626_v42 }
 0x388   : > { %v1281_v38 = vpop.eup %1280 }
 0x389   : > { %v410_v39 = vsel %vm182_vm2, %v1281_v38, 0.0  ;;  %v628_v48 = vmul.f32 1.442695, %v627_v46 }
 0x38a   : > { %411 = vadd.xlane.f32.xlu0 %v410_v39 }
 0x38b   : > { %1284 = vpow2.f32 %v628_v48 }
 0x38e   : > { %v736_v47 = vpop.xlane.xlu0 %735 }
 0x38f   : > { %v737_v49 = vsub.f32 %v728_v11, %v736_v47 }
 0x390   : > { %v1430_v40 = vpop.eup %1282 }
 0x391   : > { %v520_v41 = vsel %vm182_vm2, %v1430_v40, 0.0  ;;  %v738_v53 = vmul.f32 1.442695, %v737_v49 }
 0x392   : > { %521 = vadd.xlane.f32.xlu1 %v520_v41 }
 0x393   : > { %1286 = vpow2.f32 %v738_v53 }
 0x396   : > { %v846_v43 = vpop.xlane.xlu1 %845 }
 0x397   : > { %v847_v52 = vsub.f32 %v838_v16, %v846_v43 }
 0x398   : > { %v1285_v57 = vpop.eup %1284 }
 0x399   : > { %v848_v55 = vmul.f32 1.442695, %v847_v52  ;;  %v630_v58 = vsel %vm182_vm2, %v1285_v57, 0.0 }
 0x39a   : > { %v307_v44 = vpop.permute.xlu1 %306 }
 0x39b   : > { %v312_v45 = vsel %vm200_vm3, %v307_v44, 0  ;;  %1288 = vpow2.f32 %v848_v55 }
 0x39c   : > { %1178 = vmatpush3.bf16.msra.mxu0 %v312_v45 }
 0x39d   : > { %1189 = vmatprep.subr.bf16.mxu0 %v1314_v1 }
 0x39e   : > { %v956_v51 = vpop.xlane.xlu0 %955 }
 0x39f   : > { %v957_v54 = vsub.f32 %v948_v21, %v956_v51 }
 0x3a0   : > { %526 = vrot.lane.b32.xlu0 %v1371_v23, %s1319_s14  ;;  %v1441_v59 = vpop.eup %1286 }
 0x3a1   : > { %v958_v56 = vmul.f32 1.442695, %v957_v54  ;;  %v740_v61 = vsel %vm182_vm2, %v1441_v59, 0.0 }
 0x3a2   : > { %v417_v3 = vpop.permute.xlu0 %416 }
 0x3a3   : > { %636 = vrot.lane.b32.xlu1 %v1371_v23, %s1320_s15  ;;  %1290 = vpow2.f32 %v958_v56  ;;  %v422_v9 = vsel %vm200_vm3, %v417_v3, 0 }
 0x3a8   : > { %v1443_v60 = vpop.eup %1288 }
 0x3a9   : > { %v850_v63 = vsel %vm182_vm2, %v1443_v60, 0.0 }
 0x3b0   : > { %v1447_v62 = vpop.eup %1290 }
 0x3b1   : > { %v960_v0 = vsel %vm182_vm2, %v1447_v62, 0.0 }
 0x3bf   : > { %631 = vadd.xlane.f32.xlu0 %v630_v58 }
 0x3c3   : > { %741 = vadd.xlane.f32.xlu0 %v740_v61 }
 0x3c7   : > { %851 = vadd.xlane.f32.xlu1 %v850_v63  ;;  %961 = vadd.xlane.f32.xlu0 %v960_v0 }
 0x3d8   : > { %856 = vrot.lane.b32.xlu1 %v1371_v23, %s1322_s17 }
 0x3dc   : > { %966 = vrot.lane.b32.xlu1 %v1371_v23, %s1323_s18 }
 0x3dd   : > { %746 = vrot.lane.b32.xlu0 %v1371_v23, %s1321_s16 }
 0x40b   : > { %v302_v2 = vpop.xlane.xlu1 %301 }
 0x40c   : > { %1292 = vrcp.f32 %v302_v2 }
 0x413   : > { %v412_v4 = vpop.xlane.xlu0 %411 }
 0x414   : > { %1294 = vrcp.f32 %v412_v4 }
 0x417   : > { %v527_v11 = vpop.permute.xlu0 %526 }
 0x418   : > { %v532_v13 = vsel %vm200_vm3, %v527_v11, 0 }
 0x419   : > { %v1293_v5 = vpop.eup %1292 }
 0x41a   : > { %v304_v6 = vmul.f32 %v1293_v5, %v1279_v35 }
 0x41b   : > { %v522_v7 = vpop.xlane.xlu1 %521 }
 0x41c   : > { %1296 = vrcp.f32 %v522_v7  ;;  %v305_v8 = vpack.c.bf16 %v304_v6, %v304_v6 }
 0x41e   : > { %1180 = vmatmul.mubr.msk.bf16.vlgmr.msra.gmra.mxu0 %vm196_vm4, %v305_v8 }
 0x41f   : > { %1190 = vmatpush3.bf16.msra.mxu0 %v422_v9  ;;  %1191 = vmatprep.mubr.msk.bf16.mxu0 %vm1316_vm0, %v1314_v1  ;;  %v637_v16 = vpop.permute.xlu1 %636 }
 0x420   : > { %1201 = vmatprep.subr.bf16.mxu0 %v1314_v1  ;;  %v642_v18 = vsel %vm200_vm3, %v637_v16, 0 }
 0x421   : > { %v1295_v23 = vpop.eup %1294 }
 0x422   : > { %v414_v10 = vmul.f32 %v1295_v23, %v1281_v38 }
 0x424   : > { %v415_v12 = vpack.c.bf16 %v414_v10, %v414_v10 }
 0x426   : > { %1192 = vmatmul.mubr.msk.bf16.vlgmr.msra.gmra.mxu0 %vm196_vm4, %v415_v12 }
 0x427   : > { %1202 = vmatpush3.bf16.msra.mxu0 %v532_v13  ;;  %1203 = vmatprep.mubr.msk.bf16.mxu0 %vm1316_vm0, %v1314_v1 }
 0x428   : > { %1213 = vmatprep.subr.bf16.mxu0 %v1314_v1 }
 0x429   : > { %v1297_v14 = vpop.eup %1296 }
 0x42a   : > { %v524_v15 = vmul.f32 %v1297_v14, %v1430_v40 }
 0x42c   : > { %v525_v17 = vpack.c.bf16 %v524_v15, %v524_v15 }
 0x42e   : > { %1204 = vmatmul.mubr.msk.bf16.vlgmr.msra.gmra.mxu0 %vm196_vm4, %v525_v17 }
 0x42f   : > { %1214 = vmatpush3.bf16.msra.mxu0 %v642_v18  ;;  %1215 = vmatprep.mubr.msk.bf16.mxu0 %vm1316_vm0, %v1314_v1 }
 0x430   : > { %1225 = vmatprep.subr.bf16.mxu0 %v1314_v1 }
 0x448   : > { %v632_v19 = vpop.xlane.xlu0 %631 }
 0x449   : > { %1298 = vrcp.f32 %v632_v19 }
 0x44c   : > { %v742_v20 = vpop.xlane.xlu0 %741 }
 0x44d   : > { %1300 = vrcp.f32 %v742_v20 }
 0x450   : > { %v852_v21 = vpop.xlane.xlu1 %851  ;;  %v962_v22 = vpop.xlane.xlu0 %961 }
 0x451   : > { %1302 = vrcp.f32 %v852_v21 }
 0x452   : > { %1304 = vrcp.f32 %v962_v22 }
 0x454   : > { %v747_v25 = vpop.permute.xlu0 %746  ;;  %v857_v31 = vpop.permute.xlu1 %856 }
 0x455   : > { %v752_v27 = vsel %vm200_vm3, %v747_v25, 0  ;;  %v862_v32 = vsel %vm200_vm3, %v857_v31, 0 }
 0x456   : > { %v1299_v24 = vpop.eup %1298 }
 0x457   : > { %v634_v26 = vmul.f32 %v1299_v24, %v1285_v57 }
 0x458   : > { %v967_v36 = vpop.permute.xlu1 %966 }
 0x459   : > { %v635_v28 = vpack.c.bf16 %v634_v26, %v634_v26  ;;  %v972_v37 = vsel %vm200_vm3, %v967_v36, 0 }
 0x45a   : > { %v1301_v29 = vpop.eup %1300 }
 0x45b   : > { %1216 = vmatmul.mubr.msk.bf16.vlgmr.msra.gmra.mxu0 %vm196_vm4, %v635_v28  ;;  %v744_v30 = vmul.f32 %v1301_v29, %v1441_v59 }
 0x45c   : > { %1226 = vmatpush3.bf16.msra.mxu0 %v752_v27  ;;  %1227 = vmatprep.mubr.msk.bf16.mxu0 %vm1316_vm0, %v1314_v1 }
 0x45d   : > { %1237 = vmatprep.subr.bf16.mxu0 %v1314_v1  ;;  %v745_v33 = vpack.c.bf16 %v744_v30, %v744_v30 }
 0x45e   : > { %v1303_v34 = vpop.eup %1302 }
 0x45f   : > { %v854_v35 = vmul.f32 %v1303_v34, %v1443_v60  ;;  %v1305_v39 = vpop.eup %1304 }
 0x460   : > { %v964_v40 = vmul.f32 %v1305_v39, %v1447_v62 }
 0x461   : > { %v855_v38 = vpack.c.bf16 %v854_v35, %v854_v35 }
 0x462   : > { %v965_v41 = vpack.c.bf16 %v964_v40, %v964_v40 }
 0x463   : > { %1228 = vmatmul.mubr.msk.bf16.vlgmr.msra.gmra.mxu0 %vm196_vm4, %v745_v33 }
 0x464   : > { %1238 = vmatpush3.bf16.msra.mxu0 %v862_v32  ;;  %1239 = vmatprep.mubr.msk.bf16.mxu0 %vm1316_vm0, %v1314_v1 }
 0x465   : > { %1249 = vmatprep.subr.bf16.mxu0 %v1314_v1 }
 0x46b   : > { %1240 = vmatmul.mubr.msk.bf16.vlgmr.msra.gmra.mxu0 %vm196_vm4, %v855_v38 }
 0x46c   : > { %1250 = vmatpush3.bf16.msra.mxu0 %v972_v37  ;;  %1251 = vmatprep.mubr.msk.bf16.mxu0 %vm1316_vm0, %v1314_v1 }
 0x473   : > { %1252 = vmatmul.mubr.msk.bf16.vlgmr.msra.gmra.mxu0 %vm196_vm4, %v965_v41 }
 0x4de   : > { %v348_v42 = vpop.f32.mrf.mxu0 }
 0x4df   : > { %1015 = vrot.lane.b32.xlu1 %v348_v42, %s1323_s18 }
 0x4e0   : > { %v1181_v43 = vpop.f32.mrf.mxu0 }
 0x4e2   : > { %v351_v44 = vpop.f32.mrf.mxu0 }
 0x4e4   : > { %v1182_v45 = vpop.f32.mrf.mxu0 }
 0x4e6   : > { %v458_v46 = vpop.f32.mrf.mxu0 }
 0x4e7   : > { %1019 = vrot.lane.b32.xlu1 %v458_v46, %s1322_s17 }
 0x4e8   : > { %v1193_v47 = vpop.f32.mrf.mxu0 }
 0x4ea   : > { %v461_v48 = vpop.f32.mrf.mxu0 }
 0x4ec   : > { %v1194_v49 = vpop.f32.mrf.mxu0 }
 0x4ee   : > { %v568_v51 = vpop.f32.mrf.mxu0 }
 0x4ef   : > { %1023 = vrot.lane.b32.xlu0 %v568_v51, %s1321_s16 }
 0x4f0   : > { %v1205_v1 = vpop.f32.mrf.mxu0 }
 0x4f2   : > { %v571_v52 = vpop.f32.mrf.mxu0 }
 0x4f4   : > { %v1206_v53 = vpop.f32.mrf.mxu0 }
 0x51b   : > { %v678_v54 = vpop.f32.mrf.mxu0 }
 0x51c   : > { %1027 = vrot.lane.b32.xlu1 %v678_v54, %s1320_s15 }
 0x51d   : > { %v1217_v55 = vpop.f32.mrf.mxu0 }
 0x51f   : > { %v681_v56 = vpop.f32.mrf.mxu0 }
 0x521   : > { %v1218_v57 = vpop.f32.mrf.mxu0 }
 0x523   : > { %v788_v58 = vpop.f32.mrf.mxu0 }
 0x524   : > { %1031 = vrot.lane.b32.xlu0 %v788_v58, %s1319_s14 }
 0x525   : > { %v1229_v59 = vpop.f32.mrf.mxu0 }
 0x527   : > { %v791_v60 = vpop.f32.mrf.mxu0 }
 0x529   : > { %v1230_v61 = vpop.f32.mrf.mxu0 }
 0x52b   : > { %v898_v62 = vpop.f32.mrf.mxu0 }
 0x52c   : > { %1035 = vrot.lane.b32.xlu1 %v898_v62, %s1318_s13 }
 0x52d   : > { %v1241_v63 = vpop.f32.mrf.mxu0 }
 0x52f   : > { %v901_v0 = vpop.f32.mrf.mxu0 }
 0x531   : > { %v1242_v2 = vpop.f32.mrf.mxu0 }
 0x533   : > { %v1008_v3 = vpop.f32.mrf.mxu0 }
 0x534   : > { %1039 = vrot.lane.b32.xlu0 %v1008_v3, %s1317_s12 }
 0x535   : > { %v1253_v4 = vpop.f32.mrf.mxu0 }
 0x537   : > { %v1011_v5 = vpop.f32.mrf.mxu0 }
 0x539   : > { %v1254_v6 = vpop.f32.mrf.mxu0 }
 0x551   : > { %v1016_v7 = vpop.permute.xlu1 %1015 }
 0x552   : > { %v1042_v10 = vsel %vm135_vm1, %v1415_v50, %v1016_v7 }
 0x559   : > { %v1020_v8 = vpop.permute.xlu1 %1019 }
 0x55a   : > { %v1044_v11 = vsel %vm1043_vm5, %v1042_v10, %v1020_v8 }
 0x561   : > { %v1024_v9 = vpop.permute.xlu0 %1023 }
 0x562   : > { %v1046_v13 = vsel %vm1045_vm6, %v1044_v11, %v1024_v9 }
 0x58e   : > { %v1028_v23 = vpop.permute.xlu1 %1027 }
 0x58f   : > { %v1048_v15 = vsel %vm1047_vm7, %v1046_v13, %v1028_v23 }
 0x596   : > { %v1032_v12 = vpop.permute.xlu0 %1031 }
 0x597   : > { %v1050_v16 = vsel %vm1049_vm8, %v1048_v15, %v1032_v12 }
 0x59e   : > { %v1036_v14 = vpop.permute.xlu1 %1035 }
 0x59f   : > { %v1052_v17 = vsel %vm1051_vm9, %v1050_v16, %v1036_v14 }
 0x5a6   : > { %v1040_v18 = vpop.permute.xlu0 %1039 }
 0x5a7   : > { %v1054_v19 = vsel %vm1053_vm10, %v1052_v17, %v1040_v18 }
 0x5a8   : > { %v1055_v20 = vpack.c.bf16 %v1054_v19, %v1054_v19 }
 0x5aa   : > { %1056 = vst [vmem:[%s109_s21] sm:$0x1] %v1055_v20 }
 0x5ab PF: > { %s11_s6 = sadd.s32 1, %s1312_s6  }
 0x5ac   : > { %p8_p4 = scmp.ge.s32.totalorder %s11_s6, 6  }
 0x5ae   :  { %10 = sbr.rel (!%p8_p4) target bundleno = 1 (0x1), region = 54 }

</bundles_post_ra>
